<compile_context>
chip_gen: v7x
topology: tpu7x:2x2x1
jax: 0.10.0
libtpu: 0.0.40
codegen_flags: <defaults>
</compile_context>

<pallas_src>
import functools

import jax
import jax.numpy as jnp
import numpy as np
from jax.experimental import pallas as pl
from jax.experimental.pallas import tpu as pltpu

BN_EPS = 1e-5


# ------------------------------ kernel --------------------------------------


def _shift_rows(x, direction):
    """Shift rows of a (H, W*C) slab by one, zero-filling the vacated row."""
    zero_row = jnp.zeros((1, x.shape[1]), x.dtype)
    if direction > 0:          # row i sees original row i-1
        return jnp.concatenate([zero_row, x[:-1, :]], axis=0)
    return jnp.concatenate([x[1:, :], zero_row], axis=0)   # row i sees i+1


def _conv3x3_rows(x, w3_ref):
    """Zero-padded 3x3 conv on a flattened-row (H, W*Cin) slab.

    w3_ref: (3, W*Cin, W*Cout) banded weights (Toeplitz over W), one slab per
    kernel row dy.  Three lane-dense MXU matmuls, accumulated in f32.
    """
    acc = jnp.dot(_shift_rows(x, +1), w3_ref[0],
                  preferred_element_type=jnp.float32)
    acc = acc + jnp.dot(x, w3_ref[1], preferred_element_type=jnp.float32)
    acc = acc + jnp.dot(_shift_rows(x, -1), w3_ref[2],
                        preferred_element_type=jnp.float32)
    return acc


def _conv_block_res_kernel(*refs, has_in_affine, has_shortcut, has_pool):
    it = iter(refs)
    x_ref = next(it)                                   # (1, H, W*Cin)
    if has_in_affine:
        isc_ref = next(it)                             # (1, W*Cin)
        ish_ref = next(it)
    w1_ref = next(it)                                  # (3, W*Cin, W*Cout)
    s1_ref = next(it)                                  # (1, W*Cout)
    b1_ref = next(it)
    w2_ref = next(it)                                  # (3, W*Cout, W*Cout)
    s2_ref = next(it)
    b2_ref = next(it)
    if has_shortcut:
        wsc_ref = next(it)                             # (W*Cin, W*Cout)
        bsc_ref = next(it)                             # (1, W*Cout)
    if has_pool:
        prow_ref = next(it)                            # (Ho, H)
        pcol_ref = next(it)                            # (W*Cout, Wo*Cout)
    o_ref = next(it)                                   # (1, H, W*Cout)
    if has_pool:
        op_ref = next(it)                              # (1, Ho, Wo*Cout)

    x = x_ref[0]
    if has_in_affine:                                  # fused Encoder.bn
        x = x * isc_ref[0] + ish_ref[0]

    # conv1 + BN(eval) + ReLU   (h stays in VMEM / vregs)
    h = jnp.maximum(_conv3x3_rows(x, w1_ref) * s1_ref[0] + b1_ref[0], 0.0)
    # conv2 + BN(eval) + ReLU
    y = jnp.maximum(_conv3x3_rows(h, w2_ref) * s2_ref[0] + b2_ref[0], 0.0)

    # residual
    if has_shortcut:
        y = y + jnp.dot(x, wsc_ref[...],
                        preferred_element_type=jnp.float32) + bsc_ref[0]
    else:
        y = y + x                                      # Cin == Cout

    o_ref[0] = y

    if has_pool:
        # AvgPool2d(kh, kw) as two constant matmuls: prow @ y @ pcol.
        yp = jnp.dot(y, pcol_ref[...], preferred_element_type=jnp.float32)
        op_ref[0] = jnp.dot(prow_ref[...], yp,
                            preferred_element_type=jnp.float32)


# --------------------------- host-side helpers -------------------------------


def _band_weights(w, W):
    """(3,3,Cin,Cout) conv taps -> (3, W*Cin, W*Cout) banded matrices.

    banded[dy, wi*Cin+ci, wo*Cout+co] = w[dy, wi-wo+1, ci, co] (0 elsewhere),
    i.e. the W-direction of the zero-padded conv folded into the matmul.
    """
    _, _, Cin, Cout = w.shape
    wi = jnp.arange(W)[:, None]
    wo = jnp.arange(W)[None, :]
    sel = jnp.stack([(wi == wo + dx - 1) for dx in range(3)],
                    axis=0).astype(w.dtype)            # (3, W, W)
    banded = jnp.einsum("dpq,ydio->ypiqo", sel, w)     # (3, W, Cin, W, Cout)
    return banded.reshape(3, W * Cin, W * Cout)


def _blockdiag_1x1(wsc, W):
    """(Cin, Cout) 1x1-conv weight -> block-diagonal (W*Cin, W*Cout)."""
    return jnp.kron(jnp.eye(W, dtype=wsc.dtype), wsc)


def _pool_mats(H, W, C, kh, kw):
    Ho, Wo = H // kh, W // kw
    prow = jnp.kron(jnp.eye(Ho, dtype=jnp.float32),
                    jnp.ones((1, kh), jnp.float32)) / kh       # (Ho, H)
    pw = jnp.kron(jnp.eye(Wo, dtype=jnp.float32),
                  jnp.ones((kw, 1), jnp.float32)) / kw         # (W, Wo)
    pcol = jnp.kron(pw, jnp.eye(C, dtype=jnp.float32))         # (W*C, Wo*C)
    return prow, pcol


def _tile_c(v, W):
    """Per-channel vector (C,) -> (1, W*C) matching the flattened-row layout."""
    return jnp.tile(v, W).reshape(1, W * v.shape[0])


# ------------------------------ block wrapper --------------------------------


def conv_block_res(x_flat, blk, H, W, *, in_affine=None, pool=None):
    """Fused ConvBlockRes (+ optional input affine, + optional AvgPool).

    x_flat: (N, H, W*Cin) f32 activations in flattened-row NHWC layout.
    Returns (full, pooled) where pooled is None when pool is None.
    """
    N = x_flat.shape[0]
    Cin = blk["w1"].shape[2]
    Cout = blk["w1"].shape[3]
    has_shortcut = "wsc" in blk
    has_in_affine = in_affine is not None
    has_pool = pool is not None

    w1b = _band_weights(blk["w1"], W)                  # (3, W*Cin, W*Cout)
    w2b = _band_weights(blk["w2"], W)                  # (3, W*Cout, W*Cout)

    args = [x_flat]
    in_specs = [pl.BlockSpec((1, H, W * Cin), lambda n: (n, 0, 0))]
    if has_in_affine:
        args += [_tile_c(in_affine[0], W), _tile_c(in_affine[1], W)]
        in_specs += [pl.BlockSpec((1, W * Cin), lambda n: (0, 0))] * 2
    args += [w1b, _tile_c(blk["s1"], W), _tile_c(blk["b1"], W),
             w2b, _tile_c(blk["s2"], W), _tile_c(blk["b2"], W)]
    in_specs += [
        pl.BlockSpec((3, W * Cin, W * Cout), lambda n: (0, 0, 0)),
        pl.BlockSpec((1, W * Cout), lambda n: (0, 0)),
        pl.BlockSpec((1, W * Cout), lambda n: (0, 0)),
        pl.BlockSpec((3, W * Cout, W * Cout), lambda n: (0, 0, 0)),
        pl.BlockSpec((1, W * Cout), lambda n: (0, 0)),
        pl.BlockSpec((1, W * Cout), lambda n: (0, 0)),
    ]
    if has_shortcut:
        args += [_blockdiag_1x1(blk["wsc"], W), _tile_c(blk["bsc"], W)]
        in_specs += [
            pl.BlockSpec((W * Cin, W * Cout), lambda n: (0, 0)),
            pl.BlockSpec((1, W * Cout), lambda n: (0, 0)),
        ]
    if has_pool:
        kh, kw = pool
        assert H % kh == 0 and W % kw == 0, "AvgPool requires divisible H/W"
        Ho, Wo = H // kh, W // kw
        prow, pcol = _pool_mats(H, W, Cout, kh, kw)
        args += [prow, pcol]
        in_specs += [
            pl.BlockSpec((Ho, H), lambda n: (0, 0)),
            pl.BlockSpec((W * Cout, Wo * Cout), lambda n: (0, 0)),
        ]

    out_shape = jax.ShapeDtypeStruct((N, H, W * Cout), jnp.float32)
    out_spec = pl.BlockSpec((1, H, W * Cout), lambda n: (n, 0, 0))
    if has_pool:
        out_shape = (out_shape,
                     jax.ShapeDtypeStruct((N, Ho, Wo * Cout), jnp.float32))
        out_spec = (out_spec,
                    pl.BlockSpec((1, Ho, Wo * Cout), lambda n: (n, 0, 0)))

    kernel = functools.partial(
        _conv_block_res_kernel,
        has_in_affine=has_in_affine,
        has_shortcut=has_shortcut,
        has_pool=has_pool,
    )
    outs = pl.pallas_call(
        kernel,
        grid=(N,),
        in_specs=in_specs,
        out_specs=out_spec,
        out_shape=out_shape,
        compiler_params=pltpu.CompilerParams(
            dimension_semantics=("parallel",)),
    )(*args)

    if has_pool:
        return outs[0], outs[1]
    return outs, None


# ------------------------------ parameters -----------------------------------


def _bn_scale_shift(key, c):
    k1, k2, k3, k4 = jax.random.split(key, 4)
    gamma = 1.0 + 0.1 * jax.random.normal(k1, (c,), jnp.float32)
    beta = 0.1 * jax.random.normal(k2, (c,), jnp.float32)
    rmean = 0.1 * jax.random.normal(k3, (c,), jnp.float32)
    rvar = 1.0 + 0.1 * jax.random.uniform(k4, (c,), jnp.float32)
    scale = gamma / jnp.sqrt(rvar + BN_EPS)
    shift = beta - rmean * scale
    return scale, shift


def init_conv_block_res(key, cin, cout):
    ks = jax.random.split(key, 5)
    blk = {
        "w1": 0.2 * jax.random.normal(ks[0], (3, 3, cin, cout), jnp.float32),
        "w2": 0.2 * jax.random.normal(ks[1], (3, 3, cout, cout), jnp.float32),
    }
    blk["s1"], blk["b1"] = _bn_scale_shift(ks[2], cout)
    blk["s2"], blk["b2"] = _bn_scale_shift(ks[3], cout)
    if cin != cout:                       # is_shortcut: 1x1 conv with bias
        k5, k6 = jax.random.split(ks[4])
        blk["wsc"] = 0.2 * jax.random.normal(k5, (cin, cout), jnp.float32)
        blk["bsc"] = 0.1 * jax.random.normal(k6, (cout,), jnp.float32)
    return blk


def init_encoder(key, in_channels, n_encoders, n_blocks, out_channels):
    key, kbn = jax.random.split(key)
    params = {}
    params["bn0_scale"], params["bn0_shift"] = _bn_scale_shift(kbn,
                                                               in_channels)
    layers = []
    cin, cout = in_channels, out_channels
    for _ in range(n_encoders):
        blocks = []
        bc_in = cin
        for _ in range(n_blocks):
            key, kb = jax.random.split(key)
            blocks.append(init_conv_block_res(kb, bc_in, cout))
            bc_in = cout
        layers.append(blocks)
        cin = cout
        cout *= 2
    params["layers"] = layers
    return params


# ------------------------------ forward --------------------------------------


def encoder_forward(params, x_nchw, kernel_size):
    kh, kw = kernel_size
    N, C, H, W = x_nchw.shape
    # Single boundary transpose NCHW -> NHWC, then free reshape to the
    # flattened-row layout (N, H, W*C) used by every kernel.
    x = jnp.transpose(x_nchw, (0, 2, 3, 1)).astype(jnp.float32)
    x = x.reshape(N, H, W * C)
    in_affine = (params["bn0_scale"], params["bn0_shift"])   # fused into blk 0
    concat_tensors = []
    for blocks in params["layers"]:                          # ResEncoderBlock
        n_blocks = len(blocks)
        for bi, blk in enumerate(blocks):                    # ConvBlockRes
            is_last = bi == n_blocks - 1
            full, pooled = conv_block_res(
                x, blk, H, W,
                in_affine=in_affine,
                pool=(kh, kw) if is_last else None)
            in_affine = None
            cout = blk["w1"].shape[3]
            if is_last:
                concat_tensors.append(
                    jnp.transpose(full.reshape(N, H, W, cout), (0, 3, 1, 2)))
                x = pooled
                H, W = H // kh, W // kw
            else:
                x = full
    c_last = params["layers"][-1][-1]["w1"].shape[3]
    out = jnp.transpose(x.reshape(N, H, W, c_last), (0, 3, 1, 2))
    return out, concat_tensors


# --------------------------- pure-JAX reference -------------------------------


def _ref_forward(params, x_nchw, kernel_size):
    kh, kw = kernel_size
    x = jnp.transpose(x_nchw, (0, 2, 3, 1)).astype(jnp.float32)
    x = x * params["bn0_scale"] + params["bn0_shift"]
    concat = []
    for blocks in params["layers"]:
        for blk in blocks:
            h = jax.lax.conv_general_dilated(
                x, blk["w1"], (1, 1), ((1, 1), (1, 1)),
                dimension_numbers=("NHWC", "HWIO", "NHWC"))
            h = jnp.maximum(h * blk["s1"] + blk["b1"], 0.0)
            y = jax.lax.conv_general_dilated(
                h, blk["w2"], (1, 1), ((1, 1), (1, 1)),
                dimension_numbers=("NHWC", "HWIO", "NHWC"))
            y = jnp.maximum(y * blk["s2"] + blk["b2"], 0.0)
            if "wsc" in blk:
                res = jnp.einsum("nhwc,cd->nhwd", x, blk["wsc"]) + blk["bsc"]
            else:
                res = x
            x = y + res
        concat.append(jnp.transpose(x, (0, 3, 1, 2)))
        n, hh, ww, cc = x.shape
        x = x.reshape(n, hh // kh, kh, ww // kw, kw, cc).mean(axis=(2, 4))
    return jnp.transpose(x, (0, 3, 1, 2)), concat


def _check(a, b, name, tol=5e-2):
    a = np.asarray(a)
    b = np.asarray(b)
    scale = max(float(np.abs(b).max()), 1.0)
    err = float(np.abs(a - b).max()) / scale
    assert err < tol, f"{name}: normalized max err {err:.3e} >= {tol}"


# --------------------------------- main ---------------------------------------


if __name__ == "__main__":
    # Encoder(in_channels, in_size, n_encoders, kernel_size, n_blocks, out_ch)
    N = 2
    IN_CHANNELS = 2
    IN_SIZE = 16
    N_ENCODERS = 2
    KERNEL_SIZE = (2, 2)
    N_BLOCKS = 2          # exercises both the 1x1-shortcut and identity paths
    OUT_CHANNELS = 8

    params = init_encoder(jax.random.PRNGKey(42), IN_CHANNELS,
                          N_ENCODERS, N_BLOCKS, OUT_CHANNELS)
    x = jax.random.normal(jax.random.PRNGKey(0),
                          (N, IN_CHANNELS, IN_SIZE, IN_SIZE), jnp.float32)

    fwd = jax.jit(functools.partial(encoder_forward, kernel_size=KERNEL_SIZE))
    out, concat = fwd(params, x)
    jax.block_until_ready((out, concat))

    # Shape checks against the PyTorch module's bookkeeping.
    assert out.shape == (N, OUT_CHANNELS * (2 ** (N_ENCODERS - 1)),
                         IN_SIZE // (2 ** N_ENCODERS),
                         IN_SIZE // (2 ** N_ENCODERS)), out.shape
    assert concat[0].shape == (N, OUT_CHANNELS, IN_SIZE, IN_SIZE)
    assert concat[1].shape == (N, OUT_CHANNELS * 2, IN_SIZE // 2, IN_SIZE // 2)

    # Numerical check against a pure-JAX reference of the same (eval-mode) math.
    ref_out, ref_concat = _ref_forward(params, x, KERNEL_SIZE)
    _check(out, ref_out, "out")
    for i, (a, b) in enumerate(zip(concat, ref_concat)):
        _check(a, b, f"concat[{i}]")

    print("KERNEL_OK")
</pallas_src>

<mosaic_0001>
module attributes {stable_mosaic.version = 11 : i64} {
  func.func @_conv_block_res_kernel(%arg0: i32, %arg1: memref<1x16x32xf32, #tpu.memory_space<vmem>>, %arg2: memref<1x32xf32, #tpu.memory_space<vmem>>, %arg3: memref<1x32xf32, #tpu.memory_space<vmem>>, %arg4: memref<3x32x128xf32, #tpu.memory_space<vmem>>, %arg5: memref<1x128xf32, #tpu.memory_space<vmem>>, %arg6: memref<1x128xf32, #tpu.memory_space<vmem>>, %arg7: memref<3x128x128xf32, #tpu.memory_space<vmem>>, %arg8: memref<1x128xf32, #tpu.memory_space<vmem>>, %arg9: memref<1x128xf32, #tpu.memory_space<vmem>>, %arg10: memref<32x128xf32, #tpu.memory_space<vmem>>, %arg11: memref<1x128xf32, #tpu.memory_space<vmem>>, %arg12: memref<1x16x128xf32, #tpu.memory_space<vmem>>) attributes {dimension_semantics = [#tpu.dimension_semantics<parallel>], iteration_bounds = array<i64: 2>, scalar_prefetch = 0 : i64, scratch_operands = 0 : i64, tpu.core_type = #tpu.core_type<tc>, window_params = [{transform_indices = @transform_0, window_bounds = array<i64: 1, 16, 32>}, {pipeline_mode = #tpu.pipeline_mode<synchronous>, transform_indices = @transform_1, window_bounds = array<i64: 1, 32>}, {pipeline_mode = #tpu.pipeline_mode<synchronous>, transform_indices = @transform_2, window_bounds = array<i64: 1, 32>}, {pipeline_mode = #tpu.pipeline_mode<synchronous>, transform_indices = @transform_3, window_bounds = array<i64: 3, 32, 128>}, {pipeline_mode = #tpu.pipeline_mode<synchronous>, transform_indices = @transform_4, window_bounds = array<i64: 1, 128>}, {pipeline_mode = #tpu.pipeline_mode<synchronous>, transform_indices = @transform_5, window_bounds = array<i64: 1, 128>}, {pipeline_mode = #tpu.pipeline_mode<synchronous>, transform_indices = @transform_6, window_bounds = array<i64: 3, 128, 128>}, {pipeline_mode = #tpu.pipeline_mode<synchronous>, transform_indices = @transform_7, window_bounds = array<i64: 1, 128>}, {pipeline_mode = #tpu.pipeline_mode<synchronous>, transform_indices = @transform_8, window_bounds = array<i64: 1, 128>}, {pipeline_mode = #tpu.pipeline_mode<synchronous>, transform_indices = @transform_9, window_bounds = array<i64: 32, 128>}, {pipeline_mode = #tpu.pipeline_mode<synchronous>, transform_indices = @transform_10, window_bounds = array<i64: 1, 128>}, {transform_indices = @transform_11, window_bounds = array<i64: 1, 16, 128>}]} {
    %c0 = arith.constant 0 : index
    %c0_0 = arith.constant 0 : index
    %c0_1 = arith.constant 0 : index
    %0 = vector.load %arg1[%c0, %c0_0, %c0_1] : memref<1x16x32xf32, #tpu.memory_space<vmem>>, vector<1x16x32xf32>
    %1 = vector.shape_cast %0 : vector<1x16x32xf32> to vector<16x32xf32>
    %c0_2 = arith.constant 0 : index
    %c0_3 = arith.constant 0 : index
    %2 = vector.load %arg2[%c0_2, %c0_3] : memref<1x32xf32, #tpu.memory_space<vmem>>, vector<1x32xf32>
    %3 = vector.shape_cast %2 : vector<1x32xf32> to vector<32xf32>
    %4 = vector.shape_cast %3 : vector<32xf32> to vector<1x32xf32>
    %5 = vector.broadcast %4 : vector<1x32xf32> to vector<16x32xf32>
    %6 = arith.mulf %1, %5 : vector<16x32xf32>
    %c0_4 = arith.constant 0 : index
    %c0_5 = arith.constant 0 : index
    %7 = vector.load %arg3[%c0_4, %c0_5] : memref<1x32xf32, #tpu.memory_space<vmem>>, vector<1x32xf32>
    %8 = vector.shape_cast %7 : vector<1x32xf32> to vector<32xf32>
    %9 = vector.shape_cast %8 : vector<32xf32> to vector<1x32xf32>
    %10 = vector.broadcast %9 : vector<1x32xf32> to vector<16x32xf32>
    %11 = arith.addf %6, %10 : vector<16x32xf32>
    %cst = arith.constant 0.000000e+00 : f32
    %12 = vector.broadcast %cst : f32 to vector<1x32xf32>
    %13 = vector.extract_strided_slice %11 {offsets = [0, 0], sizes = [15, 32], strides = [1, 1]} : vector<16x32xf32> to vector<15x32xf32>
    %14 = tpu.concatenate %12, %13 in 0 : vector<1x32xf32>, vector<15x32xf32> -> vector<16x32xf32>
    %c0_6 = arith.constant 0 : index
    %c0_7 = arith.constant 0 : index
    %c0_8 = arith.constant 0 : index
    %15 = vector.load %arg4[%c0_6, %c0_7, %c0_8] : memref<3x32x128xf32, #tpu.memory_space<vmem>>, vector<1x32x128xf32>
    %16 = vector.shape_cast %15 : vector<1x32x128xf32> to vector<32x128xf32>
    %cst_9 = arith.constant dense<0.000000e+00> : vector<16x128xf32>
    %17 = tpu.matmul %14, %16, %cst_9 {dimension_numbers = #tpu.dot_dimension_numbers<[1], [0], [0], [1], [0, 0, 1, 1], [], []>} : vector<16x32xf32>, vector<32x128xf32>, vector<16x128xf32> -> vector<16x128xf32>
    %c1 = arith.constant 1 : index
    %c0_10 = arith.constant 0 : index
    %c0_11 = arith.constant 0 : index
    %18 = vector.load %arg4[%c1, %c0_10, %c0_11] : memref<3x32x128xf32, #tpu.memory_space<vmem>>, vector<1x32x128xf32>
    %19 = vector.shape_cast %18 : vector<1x32x128xf32> to vector<32x128xf32>
    %cst_12 = arith.constant dense<0.000000e+00> : vector<16x128xf32>
    %20 = tpu.matmul %11, %19, %cst_12 {dimension_numbers = #tpu.dot_dimension_numbers<[1], [0], [0], [1], [0, 0, 1, 1], [], []>} : vector<16x32xf32>, vector<32x128xf32>, vector<16x128xf32> -> vector<16x128xf32>
    %21 = arith.addf %17, %20 : vector<16x128xf32>
    %cst_13 = arith.constant 0.000000e+00 : f32
    %22 = vector.broadcast %cst_13 : f32 to vector<1x32xf32>
    %23 = vector.extract_strided_slice %11 {offsets = [1, 0], sizes = [15, 32], strides = [1, 1]} : vector<16x32xf32> to vector<15x32xf32>
    %24 = tpu.concatenate %23, %22 in 0 : vector<15x32xf32>, vector<1x32xf32> -> vector<16x32xf32>
    %c2 = arith.constant 2 : index
    %c0_14 = arith.constant 0 : index
    %c0_15 = arith.constant 0 : index
    %25 = vector.load %arg4[%c2, %c0_14, %c0_15] : memref<3x32x128xf32, #tpu.memory_space<vmem>>, vector<1x32x128xf32>
    %26 = vector.shape_cast %25 : vector<1x32x128xf32> to vector<32x128xf32>
    %cst_16 = arith.constant dense<0.000000e+00> : vector<16x128xf32>
    %27 = tpu.matmul %24, %26, %cst_16 {dimension_numbers = #tpu.dot_dimension_numbers<[1], [0], [0], [1], [0, 0, 1, 1], [], []>} : vector<16x32xf32>, vector<32x128xf32>, vector<16x128xf32> -> vector<16x128xf32>
    %28 = arith.addf %21, %27 : vector<16x128xf32>
    %c0_17 = arith.constant 0 : index
    %c0_18 = arith.constant 0 : index
    %29 = vector.load %arg5[%c0_17, %c0_18] : memref<1x128xf32, #tpu.memory_space<vmem>>, vector<1x128xf32>
    %30 = vector.shape_cast %29 : vector<1x128xf32> to vector<128xf32>
    %31 = vector.shape_cast %30 : vector<128xf32> to vector<1x128xf32>
    %32 = vector.broadcast %31 : vector<1x128xf32> to vector<16x128xf32>
    %33 = arith.mulf %28, %32 : vector<16x128xf32>
    %c0_19 = arith.constant 0 : index
    %c0_20 = arith.constant 0 : index
    %34 = vector.load %arg6[%c0_19, %c0_20] : memref<1x128xf32, #tpu.memory_space<vmem>>, vector<1x128xf32>
    %35 = vector.shape_cast %34 : vector<1x128xf32> to vector<128xf32>
    %36 = vector.shape_cast %35 : vector<128xf32> to vector<1x128xf32>
    %37 = vector.broadcast %36 : vector<1x128xf32> to vector<16x128xf32>
    %38 = arith.addf %33, %37 : vector<16x128xf32>
    %cst_21 = arith.constant 0.000000e+00 : f32
    %39 = vector.broadcast %cst_21 : f32 to vector<16x128xf32>
    %40 = arith.maximumf %38, %39 : vector<16x128xf32>
    %cst_22 = arith.constant 0.000000e+00 : f32
    %41 = vector.broadcast %cst_22 : f32 to vector<1x128xf32>
    %42 = vector.extract_strided_slice %40 {offsets = [0, 0], sizes = [15, 128], strides = [1, 1]} : vector<16x128xf32> to vector<15x128xf32>
    %43 = tpu.concatenate %41, %42 in 0 : vector<1x128xf32>, vector<15x128xf32> -> vector<16x128xf32>
    %c0_23 = arith.constant 0 : index
    %c0_24 = arith.constant 0 : index
    %c0_25 = arith.constant 0 : index
    %44 = vector.load %arg7[%c0_23, %c0_24, %c0_25] : memref<3x128x128xf32, #tpu.memory_space<vmem>>, vector<1x128x128xf32>
    %45 = vector.shape_cast %44 : vector<1x128x128xf32> to vector<128x128xf32>
    %cst_26 = arith.constant dense<0.000000e+00> : vector<16x128xf32>
    %46 = tpu.matmul %43, %45, %cst_26 {dimension_numbers = #tpu.dot_dimension_numbers<[1], [0], [0], [1], [0, 0, 1, 1], [], []>} : vector<16x128xf32>, vector<128x128xf32>, vector<16x128xf32> -> vector<16x128xf32>
    %c1_27 = arith.constant 1 : index
    %c0_28 = arith.constant 0 : index
    %c0_29 = arith.constant 0 : index
    %47 = vector.load %arg7[%c1_27, %c0_28, %c0_29] : memref<3x128x128xf32, #tpu.memory_space<vmem>>, vector<1x128x128xf32>
    %48 = vector.shape_cast %47 : vector<1x128x128xf32> to vector<128x128xf32>
    %cst_30 = arith.constant dense<0.000000e+00> : vector<16x128xf32>
    %49 = tpu.matmul %40, %48, %cst_30 {dimension_numbers = #tpu.dot_dimension_numbers<[1], [0], [0], [1], [0, 0, 1, 1], [], []>} : vector<16x128xf32>, vector<128x128xf32>, vector<16x128xf32> -> vector<16x128xf32>
    %50 = arith.addf %46, %49 : vector<16x128xf32>
    %cst_31 = arith.constant 0.000000e+00 : f32
    %51 = vector.broadcast %cst_31 : f32 to vector<1x128xf32>
    %52 = vector.extract_strided_slice %40 {offsets = [1, 0], sizes = [15, 128], strides = [1, 1]} : vector<16x128xf32> to vector<15x128xf32>
    %53 = tpu.concatenate %52, %51 in 0 : vector<15x128xf32>, vector<1x128xf32> -> vector<16x128xf32>
    %c2_32 = arith.constant 2 : index
    %c0_33 = arith.constant 0 : index
    %c0_34 = arith.constant 0 : index
    %54 = vector.load %arg7[%c2_32, %c0_33, %c0_34] : memref<3x128x128xf32, #tpu.memory_space<vmem>>, vector<1x128x128xf32>
    %55 = vector.shape_cast %54 : vector<1x128x128xf32> to vector<128x128xf32>
    %cst_35 = arith.constant dense<0.000000e+00> : vector<16x128xf32>
    %56 = tpu.matmul %53, %55, %cst_35 {dimension_numbers = #tpu.dot_dimension_numbers<[1], [0], [0], [1], [0, 0, 1, 1], [], []>} : vector<16x128xf32>, vector<128x128xf32>, vector<16x128xf32> -> vector<16x128xf32>
    %57 = arith.addf %50, %56 : vector<16x128xf32>
    %c0_36 = arith.constant 0 : index
    %c0_37 = arith.constant 0 : index
    %58 = vector.load %arg8[%c0_36, %c0_37] : memref<1x128xf32, #tpu.memory_space<vmem>>, vector<1x128xf32>
    %59 = vector.shape_cast %58 : vector<1x128xf32> to vector<128xf32>
    %60 = vector.shape_cast %59 : vector<128xf32> to vector<1x128xf32>
    %61 = vector.broadcast %60 : vector<1x128xf32> to vector<16x128xf32>
    %62 = arith.mulf %57, %61 : vector<16x128xf32>
    %c0_38 = arith.constant 0 : index
    %c0_39 = arith.constant 0 : index
    %63 = vector.load %arg9[%c0_38, %c0_39] : memref<1x128xf32, #tpu.memory_space<vmem>>, vector<1x128xf32>
    %64 = vector.shape_cast %63 : vector<1x128xf32> to vector<128xf32>
    %65 = vector.shape_cast %64 : vector<128xf32> to vector<1x128xf32>
    %66 = vector.broadcast %65 : vector<1x128xf32> to vector<16x128xf32>
    %67 = arith.addf %62, %66 : vector<16x128xf32>
    %cst_40 = arith.constant 0.000000e+00 : f32
    %68 = vector.broadcast %cst_40 : f32 to vector<16x128xf32>
    %69 = arith.maximumf %67, %68 : vector<16x128xf32>
    %c0_41 = arith.constant 0 : index
    %c0_42 = arith.constant 0 : index
    %70 = vector.load %arg10[%c0_41, %c0_42] : memref<32x128xf32, #tpu.memory_space<vmem>>, vector<32x128xf32>
    %cst_43 = arith.constant dense<0.000000e+00> : vector<16x128xf32>
    %71 = tpu.matmul %11, %70, %cst_43 {dimension_numbers = #tpu.dot_dimension_numbers<[1], [0], [0], [1], [0, 0, 1, 1], [], []>} : vector<16x32xf32>, vector<32x128xf32>, vector<16x128xf32> -> vector<16x128xf32>
    %72 = arith.addf %69, %71 : vector<16x128xf32>
    %c0_44 = arith.constant 0 : index
    %c0_45 = arith.constant 0 : index
    %73 = vector.load %arg11[%c0_44, %c0_45] : memref<1x128xf32, #tpu.memory_space<vmem>>, vector<1x128xf32>
    %74 = vector.shape_cast %73 : vector<1x128xf32> to vector<128xf32>
    %75 = vector.shape_cast %74 : vector<128xf32> to vector<1x128xf32>
    %76 = vector.broadcast %75 : vector<1x128xf32> to vector<16x128xf32>
    %77 = arith.addf %72, %76 : vector<16x128xf32>
    %c0_46 = arith.constant 0 : index
    %c0_47 = arith.constant 0 : index
    %c0_48 = arith.constant 0 : index
    %78 = vector.load %arg12[%c0_46, %c0_47, %c0_48] : memref<1x16x128xf32, #tpu.memory_space<vmem>>, vector<1x16x128xf32>
    %79 = vector.shape_cast %78 : vector<1x16x128xf32> to vector<16x128xf32>
    %80 = vector.shape_cast %77 : vector<16x128xf32> to vector<1x16x128xf32>
    tpu.vector_store %arg12[%c0_46, %c0_47, %c0_48], %80 {strides = array<i32>} : memref<1x16x128xf32, #tpu.memory_space<vmem>>, vector<1x16x128xf32>,
    return
  }
  func.func @transform_0(%arg0: i32) -> (i32, i32, i32) {
    %c0_i32 = arith.constant 0 : i32
    %c0_i32_0 = arith.constant 0 : i32
    %c0_i32_1 = arith.constant 0 : i32
    return %arg0, %c0_i32, %c0_i32_0 : i32, i32, i32
  }
  func.func @transform_1(%arg0: i32) -> (i32, i32) {
    %c0_i32 = arith.constant 0 : i32
    %c0_i32_0 = arith.constant 0 : i32
    %c0_i32_1 = arith.constant 0 : i32
    return %c0_i32, %c0_i32_0 : i32, i32
  }
  func.func @transform_2(%arg0: i32) -> (i32, i32) {
    %c0_i32 = arith.constant 0 : i32
    %c0_i32_0 = arith.constant 0 : i32
    %c0_i32_1 = arith.constant 0 : i32
    return %c0_i32, %c0_i32_0 : i32, i32
  }
  func.func @transform_3(%arg0: i32) -> (i32, i32, i32) {
    %c0_i32 = arith.constant 0 : i32
    %c0_i32_0 = arith.constant 0 : i32
    %c0_i32_1 = arith.constant 0 : i32
    %c0_i32_2 = arith.constant 0 : i32
    return %c0_i32, %c0_i32_0, %c0_i32_1 : i32, i32, i32
  }
  func.func @transform_4(%arg0: i32) -> (i32, i32) {
    %c0_i32 = arith.constant 0 : i32
    %c0_i32_0 = arith.constant 0 : i32
    %c0_i32_1 = arith.constant 0 : i32
    return %c0_i32, %c0_i32_0 : i32, i32
  }
  func.func @transform_5(%arg0: i32) -> (i32, i32) {
    %c0_i32 = arith.constant 0 : i32
    %c0_i32_0 = arith.constant 0 : i32
    %c0_i32_1 = arith.constant 0 : i32
    return %c0_i32, %c0_i32_0 : i32, i32
  }
  func.func @transform_6(%arg0: i32) -> (i32, i32, i32) {
    %c0_i32 = arith.constant 0 : i32
    %c0_i32_0 = arith.constant 0 : i32
    %c0_i32_1 = arith.constant 0 : i32
    %c0_i32_2 = arith.constant 0 : i32
    return %c0_i32, %c0_i32_0, %c0_i32_1 : i32, i32, i32
  }
  func.func @transform_7(%arg0: i32) -> (i32, i32) {
    %c0_i32 = arith.constant 0 : i32
    %c0_i32_0 = arith.constant 0 : i32
    %c0_i32_1 = arith.constant 0 : i32
    return %c0_i32, %c0_i32_0 : i32, i32
  }
  func.func @transform_8(%arg0: i32) -> (i32, i32) {
    %c0_i32 = arith.constant 0 : i32
    %c0_i32_0 = arith.constant 0 : i32
    %c0_i32_1 = arith.constant 0 : i32
    return %c0_i32, %c0_i32_0 : i32, i32
  }
  func.func @transform_9(%arg0: i32) -> (i32, i32) {
    %c0_i32 = arith.constant 0 : i32
    %c0_i32_0 = arith.constant 0 : i32
    %c0_i32_1 = arith.constant 0 : i32
    return %c0_i32, %c0_i32_0 : i32, i32
  }
  func.func @transform_10(%arg0: i32) -> (i32, i32) {
    %c0_i32 = arith.constant 0 : i32
    %c0_i32_0 = arith.constant 0 : i32
    %c0_i32_1 = arith.constant 0 : i32
    return %c0_i32, %c0_i32_0 : i32, i32
  }
  func.func @transform_11(%arg0: i32) -> (i32, i32, i32) {
    %c0_i32 = arith.constant 0 : i32
    %c0_i32_0 = arith.constant 0 : i32
    %c0_i32_1 = arith.constant 0 : i32
    return %arg0, %c0_i32, %c0_i32_0 : i32, i32, i32
  }
}

module attributes {stable_mosaic.version = 11 : i64} {
  func.func @_conv_block_res_kernel(%arg0: i32, %arg1: memref<1x16x128xf32, #tpu.memory_space<vmem>>, %arg2: memref<3x128x128xf32, #tpu.memory_space<vmem>>, %arg3: memref<1x128xf32, #tpu.memory_space<vmem>>, %arg4: memref<1x128xf32, #tpu.memory_space<vmem>>, %arg5: memref<3x128x128xf32, #tpu.memory_space<vmem>>, %arg6: memref<1x128xf32, #tpu.memory_space<vmem>>, %arg7: memref<1x128xf32, #tpu.memory_space<vmem>>, %arg8: memref<8x16xf32, #tpu.memory_space<vmem>>, %arg9: memref<128x64xf32, #tpu.memory_space<vmem>>, %arg10: memref<1x16x128xf32, #tpu.memory_space<vmem>>, %arg11: memref<1x8x64xf32, #tpu.memory_space<vmem>>) attributes {dimension_semantics = [#tpu.dimension_semantics<parallel>], iteration_bounds = array<i64: 2>, scalar_prefetch = 0 : i64, scratch_operands = 0 : i64, tpu.core_type = #tpu.core_type<tc>, window_params = [{transform_indices = @transform_0, window_bounds = array<i64: 1, 16, 128>}, {pipeline_mode = #tpu.pipeline_mode<synchronous>, transform_indices = @transform_1, window_bounds = array<i64: 3, 128, 128>}, {pipeline_mode = #tpu.pipeline_mode<synchronous>, transform_indices = @transform_2, window_bounds = array<i64: 1, 128>}, {pipeline_mode = #tpu.pipeline_mode<synchronous>, transform_indices = @transform_3, window_bounds = array<i64: 1, 128>}, {pipeline_mode = #tpu.pipeline_mode<synchronous>, transform_indices = @transform_4, window_bounds = array<i64: 3, 128, 128>}, {pipeline_mode = #tpu.pipeline_mode<synchronous>, transform_indices = @transform_5, window_bounds = array<i64: 1, 128>}, {pipeline_mode = #tpu.pipeline_mode<synchronous>, transform_indices = @transform_6, window_bounds = array<i64: 1, 128>}, {pipeline_mode = #tpu.pipeline_mode<synchronous>, transform_indices = @transform_7, window_bounds = array<i64: 8, 16>}, {pipeline_mode = #tpu.pipeline_mode<synchronous>, transform_indices = @transform_8, window_bounds = array<i64: 128, 64>}, {transform_indices = @transform_9, window_bounds = array<i64: 1, 16, 128>}, {transform_indices = @transform_10, window_bounds = array<i64: 1, 8, 64>}]} {
    %c0 = arith.constant 0 : index
    %c0_0 = arith.constant 0 : index
    %c0_1 = arith.constant 0 : index
    %0 = vector.load %arg1[%c0, %c0_0, %c0_1] : memref<1x16x128xf32, #tpu.memory_space<vmem>>, vector<1x16x128xf32>
    %1 = vector.shape_cast %0 : vector<1x16x128xf32> to vector<16x128xf32>
    %cst = arith.constant 0.000000e+00 : f32
    %2 = vector.broadcast %cst : f32 to vector<1x128xf32>
    %3 = vector.extract_strided_slice %1 {offsets = [0, 0], sizes = [15, 128], strides = [1, 1]} : vector<16x128xf32> to vector<15x128xf32>
    %4 = tpu.concatenate %2, %3 in 0 : vector<1x128xf32>, vector<15x128xf32> -> vector<16x128xf32>
    %c0_2 = arith.constant 0 : index
    %c0_3 = arith.constant 0 : index
    %c0_4 = arith.constant 0 : index
    %5 = vector.load %arg2[%c0_2, %c0_3, %c0_4] : memref<3x128x128xf32, #tpu.memory_space<vmem>>, vector<1x128x128xf32>
    %6 = vector.shape_cast %5 : vector<1x128x128xf32> to vector<128x128xf32>
    %cst_5 = arith.constant dense<0.000000e+00> : vector<16x128xf32>
    %7 = tpu.matmul %4, %6, %cst_5 {dimension_numbers = #tpu.dot_dimension_numbers<[1], [0], [0], [1], [0, 0, 1, 1], [], []>} : vector<16x128xf32>, vector<128x128xf32>, vector<16x128xf32> -> vector<16x128xf32>
    %c1 = arith.constant 1 : index
    %c0_6 = arith.constant 0 : index
    %c0_7 = arith.constant 0 : index
    %8 = vector.load %arg2[%c1, %c0_6, %c0_7] : memref<3x128x128xf32, #tpu.memory_space<vmem>>, vector<1x128x128xf32>
    %9 = vector.shape_cast %8 : vector<1x128x128xf32> to vector<128x128xf32>
    %cst_8 = arith.constant dense<0.000000e+00> : vector<16x128xf32>
    %10 = tpu.matmul %1, %9, %cst_8 {dimension_numbers = #tpu.dot_dimension_numbers<[1], [0], [0], [1], [0, 0, 1, 1], [], []>} : vector<16x128xf32>, vector<128x128xf32>, vector<16x128xf32> -> vector<16x128xf32>
    %11 = arith.addf %7, %10 : vector<16x128xf32>
    %cst_9 = arith.constant 0.000000e+00 : f32
    %12 = vector.broadcast %cst_9 : f32 to vector<1x128xf32>
    %13 = vector.extract_strided_slice %1 {offsets = [1, 0], sizes = [15, 128], strides = [1, 1]} : vector<16x128xf32> to vector<15x128xf32>
    %14 = tpu.concatenate %13, %12 in 0 : vector<15x128xf32>, vector<1x128xf32> -> vector<16x128xf32>
    %c2 = arith.constant 2 : index
    %c0_10 = arith.constant 0 : index
    %c0_11 = arith.constant 0 : index
    %15 = vector.load %arg2[%c2, %c0_10, %c0_11] : memref<3x128x128xf32, #tpu.memory_space<vmem>>, vector<1x128x128xf32>
    %16 = vector.shape_cast %15 : vector<1x128x128xf32> to vector<128x128xf32>
    %cst_12 = arith.constant dense<0.000000e+00> : vector<16x128xf32>
    %17 = tpu.matmul %14, %16, %cst_12 {dimension_numbers = #tpu.dot_dimension_numbers<[1], [0], [0], [1], [0, 0, 1, 1], [], []>} : vector<16x128xf32>, vector<128x128xf32>, vector<16x128xf32> -> vector<16x128xf32>
    %18 = arith.addf %11, %17 : vector<16x128xf32>
    %c0_13 = arith.constant 0 : index
    %c0_14 = arith.constant 0 : index
    %19 = vector.load %arg3[%c0_13, %c0_14] : memref<1x128xf32, #tpu.memory_space<vmem>>, vector<1x128xf32>
    %20 = vector.shape_cast %19 : vector<1x128xf32> to vector<128xf32>
    %21 = vector.shape_cast %20 : vector<128xf32> to vector<1x128xf32>
    %22 = vector.broadcast %21 : vector<1x128xf32> to vector<16x128xf32>
    %23 = arith.mulf %18, %22 : vector<16x128xf32>
    %c0_15 = arith.constant 0 : index
    %c0_16 = arith.constant 0 : index
    %24 = vector.load %arg4[%c0_15, %c0_16] : memref<1x128xf32, #tpu.memory_space<vmem>>, vector<1x128xf32>
    %25 = vector.shape_cast %24 : vector<1x128xf32> to vector<128xf32>
    %26 = vector.shape_cast %25 : vector<128xf32> to vector<1x128xf32>
    %27 = vector.broadcast %26 : vector<1x128xf32> to vector<16x128xf32>
    %28 = arith.addf %23, %27 : vector<16x128xf32>
    %cst_17 = arith.constant 0.000000e+00 : f32
    %29 = vector.broadcast %cst_17 : f32 to vector<16x128xf32>
    %30 = arith.maximumf %28, %29 : vector<16x128xf32>
    %cst_18 = arith.constant 0.000000e+00 : f32
    %31 = vector.broadcast %cst_18 : f32 to vector<1x128xf32>
    %32 = vector.extract_strided_slice %30 {offsets = [0, 0], sizes = [15, 128], strides = [1, 1]} : vector<16x128xf32> to vector<15x128xf32>
    %33 = tpu.concatenate %31, %32 in 0 : vector<1x128xf32>, vector<15x128xf32> -> vector<16x128xf32>
    %c0_19 = arith.constant 0 : index
    %c0_20 = arith.constant 0 : index
    %c0_21 = arith.constant 0 : index
    %34 = vector.load %arg5[%c0_19, %c0_20, %c0_21] : memref<3x128x128xf32, #tpu.memory_space<vmem>>, vector<1x128x128xf32>
    %35 = vector.shape_cast %34 : vector<1x128x128xf32> to vector<128x128xf32>
    %cst_22 = arith.constant dense<0.000000e+00> : vector<16x128xf32>
    %36 = tpu.matmul %33, %35, %cst_22 {dimension_numbers = #tpu.dot_dimension_numbers<[1], [0], [0], [1], [0, 0, 1, 1], [], []>} : vector<16x128xf32>, vector<128x128xf32>, vector<16x128xf32> -> vector<16x128xf32>
    %c1_23 = arith.constant 1 : index
    %c0_24 = arith.constant 0 : index
    %c0_25 = arith.constant 0 : index
    %37 = vector.load %arg5[%c1_23, %c0_24, %c0_25] : memref<3x128x128xf32, #tpu.memory_space<vmem>>, vector<1x128x128xf32>
    %38 = vector.shape_cast %37 : vector<1x128x128xf32> to vector<128x128xf32>
    %cst_26 = arith.constant dense<0.000000e+00> : vector<16x128xf32>
    %39 = tpu.matmul %30, %38, %cst_26 {dimension_numbers = #tpu.dot_dimension_numbers<[1], [0], [0], [1], [0, 0, 1, 1], [], []>} : vector<16x128xf32>, vector<128x128xf32>, vector<16x128xf32> -> vector<16x128xf32>
    %40 = arith.addf %36, %39 : vector<16x128xf32>
    %cst_27 = arith.constant 0.000000e+00 : f32
    %41 = vector.broadcast %cst_27 : f32 to vector<1x128xf32>
    %42 = vector.extract_strided_slice %30 {offsets = [1, 0], sizes = [15, 128], strides = [1, 1]} : vector<16x128xf32> to vector<15x128xf32>
    %43 = tpu.concatenate %42, %41 in 0 : vector<15x128xf32>, vector<1x128xf32> -> vector<16x128xf32>
    %c2_28 = arith.constant 2 : index
    %c0_29 = arith.constant 0 : index
    %c0_30 = arith.constant 0 : index
    %44 = vector.load %arg5[%c2_28, %c0_29, %c0_30] : memref<3x128x128xf32, #tpu.memory_space<vmem>>, vector<1x128x128xf32>
    %45 = vector.shape_cast %44 : vector<1x128x128xf32> to vector<128x128xf32>
    %cst_31 = arith.constant dense<0.000000e+00> : vector<16x128xf32>
    %46 = tpu.matmul %43, %45, %cst_31 {dimension_numbers = #tpu.dot_dimension_numbers<[1], [0], [0], [1], [0, 0, 1, 1], [], []>} : vector<16x128xf32>, vector<128x128xf32>, vector<16x128xf32> -> vector<16x128xf32>
    %47 = arith.addf %40, %46 : vector<16x128xf32>
    %c0_32 = arith.constant 0 : index
    %c0_33 = arith.constant 0 : index
    %48 = vector.load %arg6[%c0_32, %c0_33] : memref<1x128xf32, #tpu.memory_space<vmem>>, vector<1x128xf32>
    %49 = vector.shape_cast %48 : vector<1x128xf32> to vector<128xf32>
    %50 = vector.shape_cast %49 : vector<128xf32> to vector<1x128xf32>
    %51 = vector.broadcast %50 : vector<1x128xf32> to vector<16x128xf32>
    %52 = arith.mulf %47, %51 : vector<16x128xf32>
    %c0_34 = arith.constant 0 : index
    %c0_35 = arith.constant 0 : index
    %53 = vector.load %arg7[%c0_34, %c0_35] : memref<1x128xf32, #tpu.memory_space<vmem>>, vector<1x128xf32>
    %54 = vector.shape_cast %53 : vector<1x128xf32> to vector<128xf32>
    %55 = vector.shape_cast %54 : vector<128xf32> to vector<1x128xf32>
    %56 = vector.broadcast %55 : vector<1x128xf32> to vector<16x128xf32>
    %57 = arith.addf %52, %56 : vector<16x128xf32>
    %cst_36 = arith.constant 0.000000e+00 : f32
    %58 = vector.broadcast %cst_36 : f32 to vector<16x128xf32>
    %59 = arith.maximumf %57, %58 : vector<16x128xf32>
    %60 = arith.addf %59, %1 : vector<16x128xf32>
    %c0_37 = arith.constant 0 : index
    %c0_38 = arith.constant 0 : index
    %c0_39 = arith.constant 0 : index
    %61 = vector.load %arg10[%c0_37, %c0_38, %c0_39] : memref<1x16x128xf32, #tpu.memory_space<vmem>>, vector<1x16x128xf32>
    %62 = vector.shape_cast %61 : vector<1x16x128xf32> to vector<16x128xf32>
    %63 = vector.shape_cast %60 : vector<16x128xf32> to vector<1x16x128xf32>
    tpu.vector_store %arg10[%c0_37, %c0_38, %c0_39], %63 {strides = array<i32>} : memref<1x16x128xf32, #tpu.memory_space<vmem>>, vector<1x16x128xf32>,
    %c0_40 = arith.constant 0 : index
    %c0_41 = arith.constant 0 : index
    %64 = vector.load %arg9[%c0_40, %c0_41] : memref<128x64xf32, #tpu.memory_space<vmem>>, vector<128x64xf32>
    %cst_42 = arith.constant dense<0.000000e+00> : vector<16x64xf32>
    %65 = tpu.matmul %60, %64, %cst_42 {dimension_numbers = #tpu.dot_dimension_numbers<[1], [0], [0], [1], [0, 0, 1, 1], [], []>} : vector<16x128xf32>, vector<128x64xf32>, vector<16x64xf32> -> vector<16x64xf32>
    %c0_43 = arith.constant 0 : index
    %c0_44 = arith.constant 0 : index
    %66 = vector.load %arg8[%c0_43, %c0_44] : memref<8x16xf32, #tpu.memory_space<vmem>>, vector<8x16xf32>
    %cst_45 = arith.constant dense<0.000000e+00> : vector<8x64xf32>
    %67 = tpu.matmul %66, %65, %cst_45 {dimension_numbers = #tpu.dot_dimension_numbers<[1], [0], [0], [1], [0, 0, 1, 1], [], []>} : vector<8x16xf32>, vector<16x64xf32>, vector<8x64xf32> -> vector<8x64xf32>
    %c0_46 = arith.constant 0 : index
    %c0_47 = arith.constant 0 : index
    %c0_48 = arith.constant 0 : index
    %68 = vector.load %arg11[%c0_46, %c0_47, %c0_48] : memref<1x8x64xf32, #tpu.memory_space<vmem>>, vector<1x8x64xf32>
    %69 = vector.shape_cast %68 : vector<1x8x64xf32> to vector<8x64xf32>
    %70 = vector.shape_cast %67 : vector<8x64xf32> to vector<1x8x64xf32>
    tpu.vector_store %arg11[%c0_46, %c0_47, %c0_48], %70 {strides = array<i32>} : memref<1x8x64xf32, #tpu.memory_space<vmem>>, vector<1x8x64xf32>,
    return
  }
  func.func @transform_0(%arg0: i32) -> (i32, i32, i32) {
    %c0_i32 = arith.constant 0 : i32
    %c0_i32_0 = arith.constant 0 : i32
    %c0_i32_1 = arith.constant 0 : i32
    return %arg0, %c0_i32, %c0_i32_0 : i32, i32, i32
  }
  func.func @transform_1(%arg0: i32) -> (i32, i32, i32) {
    %c0_i32 = arith.constant 0 : i32
    %c0_i32_0 = arith.constant 0 : i32
    %c0_i32_1 = arith.constant 0 : i32
    %c0_i32_2 = arith.constant 0 : i32
    return %c0_i32, %c0_i32_0, %c0_i32_1 : i32, i32, i32
  }
  func.func @transform_2(%arg0: i32) -> (i32, i32) {
    %c0_i32 = arith.constant 0 : i32
    %c0_i32_0 = arith.constant 0 : i32
    %c0_i32_1 = arith.constant 0 : i32
    return %c0_i32, %c0_i32_0 : i32, i32
  }
  func.func @transform_3(%arg0: i32) -> (i32, i32) {
    %c0_i32 = arith.constant 0 : i32
    %c0_i32_0 = arith.constant 0 : i32
    %c0_i32_1 = arith.constant 0 : i32
    return %c0_i32, %c0_i32_0 : i32, i32
  }
  func.func @transform_4(%arg0: i32) -> (i32, i32, i32) {
    %c0_i32 = arith.constant 0 : i32
    %c0_i32_0 = arith.constant 0 : i32
    %c0_i32_1 = arith.constant 0 : i32
    %c0_i32_2 = arith.constant 0 : i32
    return %c0_i32, %c0_i32_0, %c0_i32_1 : i32, i32, i32
  }
  func.func @transform_5(%arg0: i32) -> (i32, i32) {
    %c0_i32 = arith.constant 0 : i32
    %c0_i32_0 = arith.constant 0 : i32
    %c0_i32_1 = arith.constant 0 : i32
    return %c0_i32, %c0_i32_0 : i32, i32
  }
  func.func @transform_6(%arg0: i32) -> (i32, i32) {
    %c0_i32 = arith.constant 0 : i32
    %c0_i32_0 = arith.constant 0 : i32
    %c0_i32_1 = arith.constant 0 : i32
    return %c0_i32, %c0_i32_0 : i32, i32
  }
  func.func @transform_7(%arg0: i32) -> (i32, i32) {
    %c0_i32 = arith.constant 0 : i32
    %c0_i32_0 = arith.constant 0 : i32
    %c0_i32_1 = arith.constant 0 : i32
    return %c0_i32, %c0_i32_0 : i32, i32
  }
  func.func @transform_8(%arg0: i32) -> (i32, i32) {
    %c0_i32 = arith.constant 0 : i32
    %c0_i32_0 = arith.constant 0 : i32
    %c0_i32_1 = arith.constant 0 : i32
    return %c0_i32, %c0_i32_0 : i32, i32
  }
  func.func @transform_9(%arg0: i32) -> (i32, i32, i32) {
    %c0_i32 = arith.constant 0 : i32
    %c0_i32_0 = arith.constant 0 : i32
    %c0_i32_1 = arith.constant 0 : i32
    return %arg0, %c0_i32, %c0_i32_0 : i32, i32, i32
  }
  func.func @transform_10(%arg0: i32) -> (i32, i32, i32) {
    %c0_i32 = arith.constant 0 : i32
    %c0_i32_0 = arith.constant 0 : i32
    %c0_i32_1 = arith.constant 0 : i32
    return %arg0, %c0_i32, %c0_i32_0 : i32, i32, i32
  }
}

module attributes {stable_mosaic.version = 11 : i64} {
  func.func @_conv_block_res_kernel(%arg0: i32, %arg1: memref<1x8x64xf32, #tpu.memory_space<vmem>>, %arg2: memref<3x64x128xf32, #tpu.memory_space<vmem>>, %arg3: memref<1x128xf32, #tpu.memory_space<vmem>>, %arg4: memref<1x128xf32, #tpu.memory_space<vmem>>, %arg5: memref<3x128x128xf32, #tpu.memory_space<vmem>>, %arg6: memref<1x128xf32, #tpu.memory_space<vmem>>, %arg7: memref<1x128xf32, #tpu.memory_space<vmem>>, %arg8: memref<64x128xf32, #tpu.memory_space<vmem>>, %arg9: memref<1x128xf32, #tpu.memory_space<vmem>>, %arg10: memref<1x8x128xf32, #tpu.memory_space<vmem>>) attributes {dimension_semantics = [#tpu.dimension_semantics<parallel>], iteration_bounds = array<i64: 2>, scalar_prefetch = 0 : i64, scratch_operands = 0 : i64, tpu.core_type = #tpu.core_type<tc>, window_params = [{transform_indices = @transform_0, window_bounds = array<i64: 1, 8, 64>}, {pipeline_mode = #tpu.pipeline_mode<synchronous>, transform_indices = @transform_1, window_bounds = array<i64: 3, 64, 128>}, {pipeline_mode = #tpu.pipeline_mode<synchronous>, transform_indices = @transform_2, window_bounds = array<i64: 1, 128>}, {pipeline_mode = #tpu.pipeline_mode<synchronous>, transform_indices = @transform_3, window_bounds = array<i64: 1, 128>}, {pipeline_mode = #tpu.pipeline_mode<synchronous>, transform_indices = @transform_4, window_bounds = array<i64: 3, 128, 128>}, {pipeline_mode = #tpu.pipeline_mode<synchronous>, transform_indices = @transform_5, window_bounds = array<i64: 1, 128>}, {pipeline_mode = #tpu.pipeline_mode<synchronous>, transform_indices = @transform_6, window_bounds = array<i64: 1, 128>}, {pipeline_mode = #tpu.pipeline_mode<synchronous>, transform_indices = @transform_7, window_bounds = array<i64: 64, 128>}, {pipeline_mode = #tpu.pipeline_mode<synchronous>, transform_indices = @transform_8, window_bounds = array<i64: 1, 128>}, {transform_indices = @transform_9, window_bounds = array<i64: 1, 8, 128>}]} {
    %c0 = arith.constant 0 : index
    %c0_0 = arith.constant 0 : index
    %c0_1 = arith.constant 0 : index
    %0 = vector.load %arg1[%c0, %c0_0, %c0_1] : memref<1x8x64xf32, #tpu.memory_space<vmem>>, vector<1x8x64xf32>
    %1 = vector.shape_cast %0 : vector<1x8x64xf32> to vector<8x64xf32>
    %cst = arith.constant 0.000000e+00 : f32
    %2 = vector.broadcast %cst : f32 to vector<1x64xf32>
    %3 = vector.extract_strided_slice %1 {offsets = [0, 0], sizes = [7, 64], strides = [1, 1]} : vector<8x64xf32> to vector<7x64xf32>
    %4 = tpu.concatenate %2, %3 in 0 : vector<1x64xf32>, vector<7x64xf32> -> vector<8x64xf32>
    %c0_2 = arith.constant 0 : index
    %c0_3 = arith.constant 0 : index
    %c0_4 = arith.constant 0 : index
    %5 = vector.load %arg2[%c0_2, %c0_3, %c0_4] : memref<3x64x128xf32, #tpu.memory_space<vmem>>, vector<1x64x128xf32>
    %6 = vector.shape_cast %5 : vector<1x64x128xf32> to vector<64x128xf32>
    %cst_5 = arith.constant dense<0.000000e+00> : vector<8x128xf32>
    %7 = tpu.matmul %4, %6, %cst_5 {dimension_numbers = #tpu.dot_dimension_numbers<[1], [0], [0], [1], [0, 0, 1, 1], [], []>} : vector<8x64xf32>, vector<64x128xf32>, vector<8x128xf32> -> vector<8x128xf32>
    %c1 = arith.constant 1 : index
    %c0_6 = arith.constant 0 : index
    %c0_7 = arith.constant 0 : index
    %8 = vector.load %arg2[%c1, %c0_6, %c0_7] : memref<3x64x128xf32, #tpu.memory_space<vmem>>, vector<1x64x128xf32>
    %9 = vector.shape_cast %8 : vector<1x64x128xf32> to vector<64x128xf32>
    %cst_8 = arith.constant dense<0.000000e+00> : vector<8x128xf32>
    %10 = tpu.matmul %1, %9, %cst_8 {dimension_numbers = #tpu.dot_dimension_numbers<[1], [0], [0], [1], [0, 0, 1, 1], [], []>} : vector<8x64xf32>, vector<64x128xf32>, vector<8x128xf32> -> vector<8x128xf32>
    %11 = arith.addf %7, %10 : vector<8x128xf32>
    %cst_9 = arith.constant 0.000000e+00 : f32
    %12 = vector.broadcast %cst_9 : f32 to vector<1x64xf32>
    %13 = vector.extract_strided_slice %1 {offsets = [1, 0], sizes = [7, 64], strides = [1, 1]} : vector<8x64xf32> to vector<7x64xf32>
    %14 = tpu.concatenate %13, %12 in 0 : vector<7x64xf32>, vector<1x64xf32> -> vector<8x64xf32>
    %c2 = arith.constant 2 : index
    %c0_10 = arith.constant 0 : index
    %c0_11 = arith.constant 0 : index
    %15 = vector.load %arg2[%c2, %c0_10, %c0_11] : memref<3x64x128xf32, #tpu.memory_space<vmem>>, vector<1x64x128xf32>
    %16 = vector.shape_cast %15 : vector<1x64x128xf32> to vector<64x128xf32>
    %cst_12 = arith.constant dense<0.000000e+00> : vector<8x128xf32>
    %17 = tpu.matmul %14, %16, %cst_12 {dimension_numbers = #tpu.dot_dimension_numbers<[1], [0], [0], [1], [0, 0, 1, 1], [], []>} : vector<8x64xf32>, vector<64x128xf32>, vector<8x128xf32> -> vector<8x128xf32>
    %18 = arith.addf %11, %17 : vector<8x128xf32>
    %c0_13 = arith.constant 0 : index
    %c0_14 = arith.constant 0 : index
    %19 = vector.load %arg3[%c0_13, %c0_14] : memref<1x128xf32, #tpu.memory_space<vmem>>, vector<1x128xf32>
    %20 = vector.shape_cast %19 : vector<1x128xf32> to vector<128xf32>
    %21 = vector.shape_cast %20 : vector<128xf32> to vector<1x128xf32>
    %22 = vector.broadcast %21 : vector<1x128xf32> to vector<8x128xf32>
    %23 = arith.mulf %18, %22 : vector<8x128xf32>
    %c0_15 = arith.constant 0 : index
    %c0_16 = arith.constant 0 : index
    %24 = vector.load %arg4[%c0_15, %c0_16] : memref<1x128xf32, #tpu.memory_space<vmem>>, vector<1x128xf32>
    %25 = vector.shape_cast %24 : vector<1x128xf32> to vector<128xf32>
    %26 = vector.shape_cast %25 : vector<128xf32> to vector<1x128xf32>
    %27 = vector.broadcast %26 : vector<1x128xf32> to vector<8x128xf32>
    %28 = arith.addf %23, %27 : vector<8x128xf32>
    %cst_17 = arith.constant 0.000000e+00 : f32
    %29 = vector.broadcast %cst_17 : f32 to vector<8x128xf32>
    %30 = arith.maximumf %28, %29 : vector<8x128xf32>
    %cst_18 = arith.constant 0.000000e+00 : f32
    %31 = vector.broadcast %cst_18 : f32 to vector<1x128xf32>
    %32 = vector.extract_strided_slice %30 {offsets = [0, 0], sizes = [7, 128], strides = [1, 1]} : vector<8x128xf32> to vector<7x128xf32>
    %33 = tpu.concatenate %31, %32 in 0 : vector<1x128xf32>, vector<7x128xf32> -> vector<8x128xf32>
    %c0_19 = arith.constant 0 : index
    %c0_20 = arith.constant 0 : index
    %c0_21 = arith.constant 0 : index
    %34 = vector.load %arg5[%c0_19, %c0_20, %c0_21] : memref<3x128x128xf32, #tpu.memory_space<vmem>>, vector<1x128x128xf32>
    %35 = vector.shape_cast %34 : vector<1x128x128xf32> to vector<128x128xf32>
    %cst_22 = arith.constant dense<0.000000e+00> : vector<8x128xf32>
    %36 = tpu.matmul %33, %35, %cst_22 {dimension_numbers = #tpu.dot_dimension_numbers<[1], [0], [0], [1], [0, 0, 1, 1], [], []>} : vector<8x128xf32>, vector<128x128xf32>, vector<8x128xf32> -> vector<8x128xf32>
    %c1_23 = arith.constant 1 : index
    %c0_24 = arith.constant 0 : index
    %c0_25 = arith.constant 0 : index
    %37 = vector.load %arg5[%c1_23, %c0_24, %c0_25] : memref<3x128x128xf32, #tpu.memory_space<vmem>>, vector<1x128x128xf32>
    %38 = vector.shape_cast %37 : vector<1x128x128xf32> to vector<128x128xf32>
    %cst_26 = arith.constant dense<0.000000e+00> : vector<8x128xf32>
    %39 = tpu.matmul %30, %38, %cst_26 {dimension_numbers = #tpu.dot_dimension_numbers<[1], [0], [0], [1], [0, 0, 1, 1], [], []>} : vector<8x128xf32>, vector<128x128xf32>, vector<8x128xf32> -> vector<8x128xf32>
    %40 = arith.addf %36, %39 : vector<8x128xf32>
    %cst_27 = arith.constant 0.000000e+00 : f32
    %41 = vector.broadcast %cst_27 : f32 to vector<1x128xf32>
    %42 = vector.extract_strided_slice %30 {offsets = [1, 0], sizes = [7, 128], strides = [1, 1]} : vector<8x128xf32> to vector<7x128xf32>
    %43 = tpu.concatenate %42, %41 in 0 : vector<7x128xf32>, vector<1x128xf32> -> vector<8x128xf32>
    %c2_28 = arith.constant 2 : index
    %c0_29 = arith.constant 0 : index
    %c0_30 = arith.constant 0 : index
    %44 = vector.load %arg5[%c2_28, %c0_29, %c0_30] : memref<3x128x128xf32, #tpu.memory_space<vmem>>, vector<1x128x128xf32>
    %45 = vector.shape_cast %44 : vector<1x128x128xf32> to vector<128x128xf32>
    %cst_31 = arith.constant dense<0.000000e+00> : vector<8x128xf32>
    %46 = tpu.matmul %43, %45, %cst_31 {dimension_numbers = #tpu.dot_dimension_numbers<[1], [0], [0], [1], [0, 0, 1, 1], [], []>} : vector<8x128xf32>, vector<128x128xf32>, vector<8x128xf32> -> vector<8x128xf32>
    %47 = arith.addf %40, %46 : vector<8x128xf32>
    %c0_32 = arith.constant 0 : index
    %c0_33 = arith.constant 0 : index
    %48 = vector.load %arg6[%c0_32, %c0_33] : memref<1x128xf32, #tpu.memory_space<vmem>>, vector<1x128xf32>
    %49 = vector.shape_cast %48 : vector<1x128xf32> to vector<128xf32>
    %50 = vector.shape_cast %49 : vector<128xf32> to vector<1x128xf32>
    %51 = vector.broadcast %50 : vector<1x128xf32> to vector<8x128xf32>
    %52 = arith.mulf %47, %51 : vector<8x128xf32>
    %c0_34 = arith.constant 0 : index
    %c0_35 = arith.constant 0 : index
    %53 = vector.load %arg7[%c0_34, %c0_35] : memref<1x128xf32, #tpu.memory_space<vmem>>, vector<1x128xf32>
    %54 = vector.shape_cast %53 : vector<1x128xf32> to vector<128xf32>
    %55 = vector.shape_cast %54 : vector<128xf32> to vector<1x128xf32>
    %56 = vector.broadcast %55 : vector<1x128xf32> to vector<8x128xf32>
    %57 = arith.addf %52, %56 : vector<8x128xf32>
    %cst_36 = arith.constant 0.000000e+00 : f32
    %58 = vector.broadcast %cst_36 : f32 to vector<8x128xf32>
    %59 = arith.maximumf %57, %58 : vector<8x128xf32>
    %c0_37 = arith.constant 0 : index
    %c0_38 = arith.constant 0 : index
    %60 = vector.load %arg8[%c0_37, %c0_38] : memref<64x128xf32, #tpu.memory_space<vmem>>, vector<64x128xf32>
    %cst_39 = arith.constant dense<0.000000e+00> : vector<8x128xf32>
    %61 = tpu.matmul %1, %60, %cst_39 {dimension_numbers = #tpu.dot_dimension_numbers<[1], [0], [0], [1], [0, 0, 1, 1], [], []>} : vector<8x64xf32>, vector<64x128xf32>, vector<8x128xf32> -> vector<8x128xf32>
    %62 = arith.addf %59, %61 : vector<8x128xf32>
    %c0_40 = arith.constant 0 : index
    %c0_41 = arith.constant 0 : index
    %63 = vector.load %arg9[%c0_40, %c0_41] : memref<1x128xf32, #tpu.memory_space<vmem>>, vector<1x128xf32>
    %64 = vector.shape_cast %63 : vector<1x128xf32> to vector<128xf32>
    %65 = vector.shape_cast %64 : vector<128xf32> to vector<1x128xf32>
    %66 = vector.broadcast %65 : vector<1x128xf32> to vector<8x128xf32>
    %67 = arith.addf %62, %66 : vector<8x128xf32>
    %c0_42 = arith.constant 0 : index
    %c0_43 = arith.constant 0 : index
    %c0_44 = arith.constant 0 : index
    %68 = vector.load %arg10[%c0_42, %c0_43, %c0_44] : memref<1x8x128xf32, #tpu.memory_space<vmem>>, vector<1x8x128xf32>
    %69 = vector.shape_cast %68 : vector<1x8x128xf32> to vector<8x128xf32>
    %70 = vector.shape_cast %67 : vector<8x128xf32> to vector<1x8x128xf32>
    tpu.vector_store %arg10[%c0_42, %c0_43, %c0_44], %70 {strides = array<i32>} : memref<1x8x128xf32, #tpu.memory_space<vmem>>, vector<1x8x128xf32>,
    return
  }
  func.func @transform_0(%arg0: i32) -> (i32, i32, i32) {
    %c0_i32 = arith.constant 0 : i32
    %c0_i32_0 = arith.constant 0 : i32
    %c0_i32_1 = arith.constant 0 : i32
    return %arg0, %c0_i32, %c0_i32_0 : i32, i32, i32
  }
  func.func @transform_1(%arg0: i32) -> (i32, i32, i32) {
    %c0_i32 = arith.constant 0 : i32
    %c0_i32_0 = arith.constant 0 : i32
    %c0_i32_1 = arith.constant 0 : i32
    %c0_i32_2 = arith.constant 0 : i32
    return %c0_i32, %c0_i32_0, %c0_i32_1 : i32, i32, i32
  }
  func.func @transform_2(%arg0: i32) -> (i32, i32) {
    %c0_i32 = arith.constant 0 : i32
    %c0_i32_0 = arith.constant 0 : i32
    %c0_i32_1 = arith.constant 0 : i32
    return %c0_i32, %c0_i32_0 : i32, i32
  }
  func.func @transform_3(%arg0: i32) -> (i32, i32) {
    %c0_i32 = arith.constant 0 : i32
    %c0_i32_0 = arith.constant 0 : i32
    %c0_i32_1 = arith.constant 0 : i32
    return %c0_i32, %c0_i32_0 : i32, i32
  }
  func.func @transform_4(%arg0: i32) -> (i32, i32, i32) {
    %c0_i32 = arith.constant 0 : i32
    %c0_i32_0 = arith.constant 0 : i32
    %c0_i32_1 = arith.constant 0 : i32
    %c0_i32_2 = arith.constant 0 : i32
    return %c0_i32, %c0_i32_0, %c0_i32_1 : i32, i32, i32
  }
  func.func @transform_5(%arg0: i32) -> (i32, i32) {
    %c0_i32 = arith.constant 0 : i32
    %c0_i32_0 = arith.constant 0 : i32
    %c0_i32_1 = arith.constant 0 : i32
    return %c0_i32, %c0_i32_0 : i32, i32
  }
  func.func @transform_6(%arg0: i32) -> (i32, i32) {
    %c0_i32 = arith.constant 0 : i32
    %c0_i32_0 = arith.constant 0 : i32
    %c0_i32_1 = arith.constant 0 : i32
    return %c0_i32, %c0_i32_0 : i32, i32
  }
  func.func @transform_7(%arg0: i32) -> (i32, i32) {
    %c0_i32 = arith.constant 0 : i32
    %c0_i32_0 = arith.constant 0 : i32
    %c0_i32_1 = arith.constant 0 : i32
    return %c0_i32, %c0_i32_0 : i32, i32
  }
  func.func @transform_8(%arg0: i32) -> (i32, i32) {
    %c0_i32 = arith.constant 0 : i32
    %c0_i32_0 = arith.constant 0 : i32
    %c0_i32_1 = arith.constant 0 : i32
    return %c0_i32, %c0_i32_0 : i32, i32
  }
  func.func @transform_9(%arg0: i32) -> (i32, i32, i32) {
    %c0_i32 = arith.constant 0 : i32
    %c0_i32_0 = arith.constant 0 : i32
    %c0_i32_1 = arith.constant 0 : i32
    return %arg0, %c0_i32, %c0_i32_0 : i32, i32, i32
  }
}

module attributes {stable_mosaic.version = 11 : i64} {
  func.func @_conv_block_res_kernel(%arg0: i32, %arg1: memref<1x8x128xf32, #tpu.memory_space<vmem>>, %arg2: memref<3x128x128xf32, #tpu.memory_space<vmem>>, %arg3: memref<1x128xf32, #tpu.memory_space<vmem>>, %arg4: memref<1x128xf32, #tpu.memory_space<vmem>>, %arg5: memref<3x128x128xf32, #tpu.memory_space<vmem>>, %arg6: memref<1x128xf32, #tpu.memory_space<vmem>>, %arg7: memref<1x128xf32, #tpu.memory_space<vmem>>, %arg8: memref<4x8xf32, #tpu.memory_space<vmem>>, %arg9: memref<128x64xf32, #tpu.memory_space<vmem>>, %arg10: memref<1x8x128xf32, #tpu.memory_space<vmem>>, %arg11: memref<1x4x64xf32, #tpu.memory_space<vmem>>) attributes {dimension_semantics = [#tpu.dimension_semantics<parallel>], iteration_bounds = array<i64: 2>, scalar_prefetch = 0 : i64, scratch_operands = 0 : i64, tpu.core_type = #tpu.core_type<tc>, window_params = [{transform_indices = @transform_0, window_bounds = array<i64: 1, 8, 128>}, {pipeline_mode = #tpu.pipeline_mode<synchronous>, transform_indices = @transform_1, window_bounds = array<i64: 3, 128, 128>}, {pipeline_mode = #tpu.pipeline_mode<synchronous>, transform_indices = @transform_2, window_bounds = array<i64: 1, 128>}, {pipeline_mode = #tpu.pipeline_mode<synchronous>, transform_indices = @transform_3, window_bounds = array<i64: 1, 128>}, {pipeline_mode = #tpu.pipeline_mode<synchronous>, transform_indices = @transform_4, window_bounds = array<i64: 3, 128, 128>}, {pipeline_mode = #tpu.pipeline_mode<synchronous>, transform_indices = @transform_5, window_bounds = array<i64: 1, 128>}, {pipeline_mode = #tpu.pipeline_mode<synchronous>, transform_indices = @transform_6, window_bounds = array<i64: 1, 128>}, {pipeline_mode = #tpu.pipeline_mode<synchronous>, transform_indices = @transform_7, window_bounds = array<i64: 4, 8>}, {pipeline_mode = #tpu.pipeline_mode<synchronous>, transform_indices = @transform_8, window_bounds = array<i64: 128, 64>}, {transform_indices = @transform_9, window_bounds = array<i64: 1, 8, 128>}, {transform_indices = @transform_10, window_bounds = array<i64: 1, 4, 64>}]} {
    %c0 = arith.constant 0 : index
    %c0_0 = arith.constant 0 : index
    %c0_1 = arith.constant 0 : index
    %0 = vector.load %arg1[%c0, %c0_0, %c0_1] : memref<1x8x128xf32, #tpu.memory_space<vmem>>, vector<1x8x128xf32>
    %1 = vector.shape_cast %0 : vector<1x8x128xf32> to vector<8x128xf32>
    %cst = arith.constant 0.000000e+00 : f32
    %2 = vector.broadcast %cst : f32 to vector<1x128xf32>
    %3 = vector.extract_strided_slice %1 {offsets = [0, 0], sizes = [7, 128], strides = [1, 1]} : vector<8x128xf32> to vector<7x128xf32>
    %4 = tpu.concatenate %2, %3 in 0 : vector<1x128xf32>, vector<7x128xf32> -> vector<8x128xf32>
    %c0_2 = arith.constant 0 : index
    %c0_3 = arith.constant 0 : index
    %c0_4 = arith.constant 0 : index
    %5 = vector.load %arg2[%c0_2, %c0_3, %c0_4] : memref<3x128x128xf32, #tpu.memory_space<vmem>>, vector<1x128x128xf32>
    %6 = vector.shape_cast %5 : vector<1x128x128xf32> to vector<128x128xf32>
    %cst_5 = arith.constant dense<0.000000e+00> : vector<8x128xf32>
    %7 = tpu.matmul %4, %6, %cst_5 {dimension_numbers = #tpu.dot_dimension_numbers<[1], [0], [0], [1], [0, 0, 1, 1], [], []>} : vector<8x128xf32>, vector<128x128xf32>, vector<8x128xf32> -> vector<8x128xf32>
    %c1 = arith.constant 1 : index
    %c0_6 = arith.constant 0 : index
    %c0_7 = arith.constant 0 : index
    %8 = vector.load %arg2[%c1, %c0_6, %c0_7] : memref<3x128x128xf32, #tpu.memory_space<vmem>>, vector<1x128x128xf32>
    %9 = vector.shape_cast %8 : vector<1x128x128xf32> to vector<128x128xf32>
    %cst_8 = arith.constant dense<0.000000e+00> : vector<8x128xf32>
    %10 = tpu.matmul %1, %9, %cst_8 {dimension_numbers = #tpu.dot_dimension_numbers<[1], [0], [0], [1], [0, 0, 1, 1], [], []>} : vector<8x128xf32>, vector<128x128xf32>, vector<8x128xf32> -> vector<8x128xf32>
    %11 = arith.addf %7, %10 : vector<8x128xf32>
    %cst_9 = arith.constant 0.000000e+00 : f32
    %12 = vector.broadcast %cst_9 : f32 to vector<1x128xf32>
    %13 = vector.extract_strided_slice %1 {offsets = [1, 0], sizes = [7, 128], strides = [1, 1]} : vector<8x128xf32> to vector<7x128xf32>
    %14 = tpu.concatenate %13, %12 in 0 : vector<7x128xf32>, vector<1x128xf32> -> vector<8x128xf32>
    %c2 = arith.constant 2 : index
    %c0_10 = arith.constant 0 : index
    %c0_11 = arith.constant 0 : index
    %15 = vector.load %arg2[%c2, %c0_10, %c0_11] : memref<3x128x128xf32, #tpu.memory_space<vmem>>, vector<1x128x128xf32>
    %16 = vector.shape_cast %15 : vector<1x128x128xf32> to vector<128x128xf32>
    %cst_12 = arith.constant dense<0.000000e+00> : vector<8x128xf32>
    %17 = tpu.matmul %14, %16, %cst_12 {dimension_numbers = #tpu.dot_dimension_numbers<[1], [0], [0], [1], [0, 0, 1, 1], [], []>} : vector<8x128xf32>, vector<128x128xf32>, vector<8x128xf32> -> vector<8x128xf32>
    %18 = arith.addf %11, %17 : vector<8x128xf32>
    %c0_13 = arith.constant 0 : index
    %c0_14 = arith.constant 0 : index
    %19 = vector.load %arg3[%c0_13, %c0_14] : memref<1x128xf32, #tpu.memory_space<vmem>>, vector<1x128xf32>
    %20 = vector.shape_cast %19 : vector<1x128xf32> to vector<128xf32>
    %21 = vector.shape_cast %20 : vector<128xf32> to vector<1x128xf32>
    %22 = vector.broadcast %21 : vector<1x128xf32> to vector<8x128xf32>
    %23 = arith.mulf %18, %22 : vector<8x128xf32>
    %c0_15 = arith.constant 0 : index
    %c0_16 = arith.constant 0 : index
    %24 = vector.load %arg4[%c0_15, %c0_16] : memref<1x128xf32, #tpu.memory_space<vmem>>, vector<1x128xf32>
    %25 = vector.shape_cast %24 : vector<1x128xf32> to vector<128xf32>
    %26 = vector.shape_cast %25 : vector<128xf32> to vector<1x128xf32>
    %27 = vector.broadcast %26 : vector<1x128xf32> to vector<8x128xf32>
    %28 = arith.addf %23, %27 : vector<8x128xf32>
    %cst_17 = arith.constant 0.000000e+00 : f32
    %29 = vector.broadcast %cst_17 : f32 to vector<8x128xf32>
    %30 = arith.maximumf %28, %29 : vector<8x128xf32>
    %cst_18 = arith.constant 0.000000e+00 : f32
    %31 = vector.broadcast %cst_18 : f32 to vector<1x128xf32>
    %32 = vector.extract_strided_slice %30 {offsets = [0, 0], sizes = [7, 128], strides = [1, 1]} : vector<8x128xf32> to vector<7x128xf32>
    %33 = tpu.concatenate %31, %32 in 0 : vector<1x128xf32>, vector<7x128xf32> -> vector<8x128xf32>
    %c0_19 = arith.constant 0 : index
    %c0_20 = arith.constant 0 : index
    %c0_21 = arith.constant 0 : index
    %34 = vector.load %arg5[%c0_19, %c0_20, %c0_21] : memref<3x128x128xf32, #tpu.memory_space<vmem>>, vector<1x128x128xf32>
    %35 = vector.shape_cast %34 : vector<1x128x128xf32> to vector<128x128xf32>
    %cst_22 = arith.constant dense<0.000000e+00> : vector<8x128xf32>
    %36 = tpu.matmul %33, %35, %cst_22 {dimension_numbers = #tpu.dot_dimension_numbers<[1], [0], [0], [1], [0, 0, 1, 1], [], []>} : vector<8x128xf32>, vector<128x128xf32>, vector<8x128xf32> -> vector<8x128xf32>
    %c1_23 = arith.constant 1 : index
    %c0_24 = arith.constant 0 : index
    %c0_25 = arith.constant 0 : index
    %37 = vector.load %arg5[%c1_23, %c0_24, %c0_25] : memref<3x128x128xf32, #tpu.memory_space<vmem>>, vector<1x128x128xf32>
    %38 = vector.shape_cast %37 : vector<1x128x128xf32> to vector<128x128xf32>
    %cst_26 = arith.constant dense<0.000000e+00> : vector<8x128xf32>
    %39 = tpu.matmul %30, %38, %cst_26 {dimension_numbers = #tpu.dot_dimension_numbers<[1], [0], [0], [1], [0, 0, 1, 1], [], []>} : vector<8x128xf32>, vector<128x128xf32>, vector<8x128xf32> -> vector<8x128xf32>
    %40 = arith.addf %36, %39 : vector<8x128xf32>
    %cst_27 = arith.constant 0.000000e+00 : f32
    %41 = vector.broadcast %cst_27 : f32 to vector<1x128xf32>
    %42 = vector.extract_strided_slice %30 {offsets = [1, 0], sizes = [7, 128], strides = [1, 1]} : vector<8x128xf32> to vector<7x128xf32>
    %43 = tpu.concatenate %42, %41 in 0 : vector<7x128xf32>, vector<1x128xf32> -> vector<8x128xf32>
    %c2_28 = arith.constant 2 : index
    %c0_29 = arith.constant 0 : index
    %c0_30 = arith.constant 0 : index
    %44 = vector.load %arg5[%c2_28, %c0_29, %c0_30] : memref<3x128x128xf32, #tpu.memory_space<vmem>>, vector<1x128x128xf32>
    %45 = vector.shape_cast %44 : vector<1x128x128xf32> to vector<128x128xf32>
    %cst_31 = arith.constant dense<0.000000e+00> : vector<8x128xf32>
    %46 = tpu.matmul %43, %45, %cst_31 {dimension_numbers = #tpu.dot_dimension_numbers<[1], [0], [0], [1], [0, 0, 1, 1], [], []>} : vector<8x128xf32>, vector<128x128xf32>, vector<8x128xf32> -> vector<8x128xf32>
    %47 = arith.addf %40, %46 : vector<8x128xf32>
    %c0_32 = arith.constant 0 : index
    %c0_33 = arith.constant 0 : index
    %48 = vector.load %arg6[%c0_32, %c0_33] : memref<1x128xf32, #tpu.memory_space<vmem>>, vector<1x128xf32>
    %49 = vector.shape_cast %48 : vector<1x128xf32> to vector<128xf32>
    %50 = vector.shape_cast %49 : vector<128xf32> to vector<1x128xf32>
    %51 = vector.broadcast %50 : vector<1x128xf32> to vector<8x128xf32>
    %52 = arith.mulf %47, %51 : vector<8x128xf32>
    %c0_34 = arith.constant 0 : index
    %c0_35 = arith.constant 0 : index
    %53 = vector.load %arg7[%c0_34, %c0_35] : memref<1x128xf32, #tpu.memory_space<vmem>>, vector<1x128xf32>
    %54 = vector.shape_cast %53 : vector<1x128xf32> to vector<128xf32>
    %55 = vector.shape_cast %54 : vector<128xf32> to vector<1x128xf32>
    %56 = vector.broadcast %55 : vector<1x128xf32> to vector<8x128xf32>
    %57 = arith.addf %52, %56 : vector<8x128xf32>
    %cst_36 = arith.constant 0.000000e+00 : f32
    %58 = vector.broadcast %cst_36 : f32 to vector<8x128xf32>
    %59 = arith.maximumf %57, %58 : vector<8x128xf32>
    %60 = arith.addf %59, %1 : vector<8x128xf32>
    %c0_37 = arith.constant 0 : index
    %c0_38 = arith.constant 0 : index
    %c0_39 = arith.constant 0 : index
    %61 = vector.load %arg10[%c0_37, %c0_38, %c0_39] : memref<1x8x128xf32, #tpu.memory_space<vmem>>, vector<1x8x128xf32>
    %62 = vector.shape_cast %61 : vector<1x8x128xf32> to vector<8x128xf32>
    %63 = vector.shape_cast %60 : vector<8x128xf32> to vector<1x8x128xf32>
    tpu.vector_store %arg10[%c0_37, %c0_38, %c0_39], %63 {strides = array<i32>} : memref<1x8x128xf32, #tpu.memory_space<vmem>>, vector<1x8x128xf32>,
    %c0_40 = arith.constant 0 : index
    %c0_41 = arith.constant 0 : index
    %64 = vector.load %arg9[%c0_40, %c0_41] : memref<128x64xf32, #tpu.memory_space<vmem>>, vector<128x64xf32>
    %cst_42 = arith.constant dense<0.000000e+00> : vector<8x64xf32>
    %65 = tpu.matmul %60, %64, %cst_42 {dimension_numbers = #tpu.dot_dimension_numbers<[1], [0], [0], [1], [0, 0, 1, 1], [], []>} : vector<8x128xf32>, vector<128x64xf32>, vector<8x64xf32> -> vector<8x64xf32>
    %c0_43 = arith.constant 0 : index
    %c0_44 = arith.constant 0 : index
    %66 = vector.load %arg8[%c0_43, %c0_44] : memref<4x8xf32, #tpu.memory_space<vmem>>, vector<4x8xf32>
    %cst_45 = arith.constant dense<0.000000e+00> : vector<4x64xf32>
    %67 = tpu.matmul %66, %65, %cst_45 {dimension_numbers = #tpu.dot_dimension_numbers<[1], [0], [0], [1], [0, 0, 1, 1], [], []>} : vector<4x8xf32>, vector<8x64xf32>, vector<4x64xf32> -> vector<4x64xf32>
    %c0_46 = arith.constant 0 : index
    %c0_47 = arith.constant 0 : index
    %c0_48 = arith.constant 0 : index
    %68 = vector.load %arg11[%c0_46, %c0_47, %c0_48] : memref<1x4x64xf32, #tpu.memory_space<vmem>>, vector<1x4x64xf32>
    %69 = vector.shape_cast %68 : vector<1x4x64xf32> to vector<4x64xf32>
    %70 = vector.shape_cast %67 : vector<4x64xf32> to vector<1x4x64xf32>
    tpu.vector_store %arg11[%c0_46, %c0_47, %c0_48], %70 {strides = array<i32>} : memref<1x4x64xf32, #tpu.memory_space<vmem>>, vector<1x4x64xf32>,
    return
  }
  func.func @transform_0(%arg0: i32) -> (i32, i32, i32) {
    %c0_i32 = arith.constant 0 : i32
    %c0_i32_0 = arith.constant 0 : i32
    %c0_i32_1 = arith.constant 0 : i32
    return %arg0, %c0_i32, %c0_i32_0 : i32, i32, i32
  }
  func.func @transform_1(%arg0: i32) -> (i32, i32, i32) {
    %c0_i32 = arith.constant 0 : i32
    %c0_i32_0 = arith.constant 0 : i32
    %c0_i32_1 = arith.constant 0 : i32
    %c0_i32_2 = arith.constant 0 : i32
    return %c0_i32, %c0_i32_0, %c0_i32_1 : i32, i32, i32
  }
  func.func @transform_2(%arg0: i32) -> (i32, i32) {
    %c0_i32 = arith.constant 0 : i32
    %c0_i32_0 = arith.constant 0 : i32
    %c0_i32_1 = arith.constant 0 : i32
    return %c0_i32, %c0_i32_0 : i32, i32
  }
  func.func @transform_3(%arg0: i32) -> (i32, i32) {
    %c0_i32 = arith.constant 0 : i32
    %c0_i32_0 = arith.constant 0 : i32
    %c0_i32_1 = arith.constant 0 : i32
    return %c0_i32, %c0_i32_0 : i32, i32
  }
  func.func @transform_4(%arg0: i32) -> (i32, i32, i32) {
    %c0_i32 = arith.constant 0 : i32
    %c0_i32_0 = arith.constant 0 : i32
    %c0_i32_1 = arith.constant 0 : i32
    %c0_i32_2 = arith.constant 0 : i32
    return %c0_i32, %c0_i32_0, %c0_i32_1 : i32, i32, i32
  }
  func.func @transform_5(%arg0: i32) -> (i32, i32) {
    %c0_i32 = arith.constant 0 : i32
    %c0_i32_0 = arith.constant 0 : i32
    %c0_i32_1 = arith.constant 0 : i32
    return %c0_i32, %c0_i32_0 : i32, i32
  }
  func.func @transform_6(%arg0: i32) -> (i32, i32) {
    %c0_i32 = arith.constant 0 : i32
    %c0_i32_0 = arith.constant 0 : i32
    %c0_i32_1 = arith.constant 0 : i32
    return %c0_i32, %c0_i32_0 : i32, i32
  }
  func.func @transform_7(%arg0: i32) -> (i32, i32) {
    %c0_i32 = arith.constant 0 : i32
    %c0_i32_0 = arith.constant 0 : i32
    %c0_i32_1 = arith.constant 0 : i32
    return %c0_i32, %c0_i32_0 : i32, i32
  }
  func.func @transform_8(%arg0: i32) -> (i32, i32) {
    %c0_i32 = arith.constant 0 : i32
    %c0_i32_0 = arith.constant 0 : i32
    %c0_i32_1 = arith.constant 0 : i32
    return %c0_i32, %c0_i32_0 : i32, i32
  }
  func.func @transform_9(%arg0: i32) -> (i32, i32, i32) {
    %c0_i32 = arith.constant 0 : i32
    %c0_i32_0 = arith.constant 0 : i32
    %c0_i32_1 = arith.constant 0 : i32
    return %arg0, %c0_i32, %c0_i32_0 : i32, i32, i32
  }
  func.func @transform_10(%arg0: i32) -> (i32, i32, i32) {
    %c0_i32 = arith.constant 0 : i32
    %c0_i32_0 = arith.constant 0 : i32
    %c0_i32_1 = arith.constant 0 : i32
    return %arg0, %c0_i32, %c0_i32_0 : i32, i32, i32
  }
}

</mosaic_0001>

<bundles_post_ra>
// kernel: tile.103
= control target key start
LH: loop header
LB: loop body
LE: loop exit
PB: predicated region body
PF: predicated region fallthrough
CT: control target
= control target key end

     0   :  { %s28_s0 = inlined_call_operand.vmem [shape: f32[2], index: 0, kind: input, shape index: {}]   ;;  %s29_s1 = inlined_call_operand.vmem [shape: f32[16,2], index: 1, kind: output, shape index: {}]  }
   0x1   :  { %v4_v0 = vld [vmem:[%s28_s0] ss:$0 sm:$0xff] }
   0x2   :  { %5 = vst [vmem:[%s29_s1] sm:$0xff] %v4_v0  ;;  %8 = vst [vmem:[%s29_s1 + $0x8] sm:$0xff] %v4_v0 }

// kernel: tile.104
= control target key start
LH: loop header
LB: loop body
LE: loop exit
PB: predicated region body
PF: predicated region fallthrough
CT: control target
= control target key end

     0   :  { %s131_s10 = smov 30   ;;  %s132_s11 = smov 26   ;;  %vm3_vm0 = vcmask 15360   ;;  %vm9_vm1 = vcmask 261360   ;;  %vm15_vm2 = vcmask 244960   ;;  %vm21_vm3 = vcmask 228560   ;;  %s207_s0 = inlined_call_operand.vmem [shape: f32[16,2], index: 0, kind: input, shape index: {}]   ;;  %s208_s1 = inlined_call_operand.vmem [shape: f32[1,32], index: 1, kind: output, shape index: {}]  }
   0x1   :  { %v101_v0 = vld [vmem:[%s207_s0 + $0xf] sm:$0x1]   ;;  %v103_v1 = vld [vmem:[%s207_s0 + $0xd] sm:$0x1]   ;;  %v102_v2 = vld [vmem:[%s207_s0 + $0xe] sm:$0x1]  }
   0x2   :  { %7 = vrot.lane.b32.xlu0 %v101_v0, %s131_s10  ;;  %19 = vrot.lane.b32.xlu1 %v103_v1, %s132_s11  ;;  %v104_v3 = vld [vmem:[%s207_s0 + $0xc] sm:$0x1]   ;;  %s133_s16 = smov 28   ;;  %s134_s17 = smov 24   ;;  %v105_v4 = vld [vmem:[%s207_s0 + $0xb] sm:$0x1]  }
   0x3   :  { %v106_v5 = vld [vmem:[%s207_s0 + $0xa] sm:$0x1]   ;;  %v2_v6 = vld [vmem:[%s207_s0] sm:$0x1]   ;;  %s135_s24 = smov 22   ;;  %s136_s25 = smov 20  }
   0x4   :  { %4 = vst.msk [vmem:[#allocation0] sm:$0x1] %vm3_vm0, %v2_v6   ;;  %v107_v7 = vld [vmem:[%s207_s0 + $0x9] sm:$0x1]   ;;  %v108_v8 = vld [vmem:[%s207_s0 + $0x8] sm:$0x1]  }
   0x5   :  { %s137_s30 = smov 18   ;;  %s138_s2 = smov 16   ;;  %v109_v9 = vld [vmem:[%s207_s0 + $0x7] sm:$0x1]   ;;  %v110_v10 = vld [vmem:[%s207_s0 + $0x6] sm:$0x1]  }
   0x6   :  { %13 = vrot.lane.b32.xlu0 %v102_v2, %s133_s16  ;;  %25 = vrot.lane.b32.xlu1 %v104_v3, %s134_s17  ;;  %s139_s7 = smov 14   ;;  %s140_s8 = smov 12   ;;  %v111_v11 = vld [vmem:[%s207_s0 + $0x5] sm:$0x1]   ;;  %v112_v12 = vld [vmem:[%s207_s0 + $0x4] sm:$0x1]  }
   0x7   :  { %s141_s13 = smov 10   ;;  %s142_s14 = smov 8   ;;  %v113_v13 = vld [vmem:[%s207_s0 + $0x3] sm:$0x1]   ;;  %v114_v14 = vld [vmem:[%s207_s0 + $0x2] sm:$0x1]  }
   0x8   :  { %s143_s19 = smov 6   ;;  %s144_s20 = smov 4   ;;  %v115_v15 = vld [vmem:[%s207_s0 + $0x1] sm:$0x1]   ;;  %vm27_vm4 = vcmask 212160   ;;  %vm33_vm5 = vcmask 195760  }
   0x9   :  { %s145_s0 = smov 2   ;;  %vm39_vm6 = vcmask 179360   ;;  %vm45_vm7 = vcmask 162960   ;;  %vm51_vm8 = vcmask 146560   ;;  %vm57_vm9 = vcmask 130160  }
   0xa   :  { %31 = vrot.lane.b32.xlu0 %v105_v4, %s135_s24  ;;  %37 = vrot.lane.b32.xlu1 %v106_v5, %s136_s25  ;;  %vm63_vm10 = vcmask 113760   ;;  %vm69_vm11 = vcmask 97360   ;;  %vm75_vm12 = vcmask 80960   ;;  %vm81_vm13 = vcmask 64560  }
   0xb   :  { %vm87_vm14 = vcmask 48160   ;;  %vm93_vm15 = vcmask 31760  }
   0xe   :  { %43 = vrot.lane.b32.xlu0 %v107_v7, %s137_s30  ;;  %49 = vrot.lane.b32.xlu1 %v108_v8, %s138_s2 }
  0x12   :  { %55 = vrot.lane.b32.xlu0 %v109_v9, %s139_s7  ;;  %61 = vrot.lane.b32.xlu1 %v110_v10, %s140_s8 }
  0x16   :  { %67 = vrot.lane.b32.xlu0 %v111_v11, %s141_s13  ;;  %73 = vrot.lane.b32.xlu1 %v112_v12, %s142_s14 }
  0x1a   :  { %79 = vrot.lane.b32.xlu0 %v113_v13, %s143_s19  ;;  %85 = vrot.lane.b32.xlu1 %v114_v14, %s144_s20 }
  0x1e   :  { %91 = vrot.lane.b32.xlu0 %v115_v15, %s145_s0 }
  0x74   :  { %v8_v16 = vpop.permute.xlu0 %7   ;;  %v20_v17 = vpop.permute.xlu1 %19  }
  0x75   :  { %10 = vst.msk [vmem:[#allocation0] sm:$0x1] %vm9_vm1, %v8_v16  }
  0x78   :  { %v14_v18 = vpop.permute.xlu0 %13   ;;  %v26_v19 = vpop.permute.xlu1 %25  }
  0x79   :  { %16 = vst.msk [vmem:[#allocation0] sm:$0x1] %vm15_vm2, %v14_v18  }
  0x7a   :  { %22 = vst.msk [vmem:[#allocation0] sm:$0x1] %vm21_vm3, %v20_v17  }
  0x7b   :  { %28 = vst.msk [vmem:[#allocation0] sm:$0x1] %vm27_vm4, %v26_v19  }
  0x7c   :  { %v32_v20 = vpop.permute.xlu0 %31   ;;  %v38_v21 = vpop.permute.xlu1 %37  }
  0x7d   :  { %34 = vst.msk [vmem:[#allocation0] sm:$0x1] %vm33_vm5, %v32_v20  }
  0x7e   :  { %40 = vst.msk [vmem:[#allocation0] sm:$0x1] %vm39_vm6, %v38_v21  }
  0x80   :  { %v44_v22 = vpop.permute.xlu0 %43   ;;  %v50_v23 = vpop.permute.xlu1 %49  }
  0x81   :  { %46 = vst.msk [vmem:[#allocation0] sm:$0x1] %vm45_vm7, %v44_v22  }
  0x82   :  { %52 = vst.msk [vmem:[#allocation0] sm:$0x1] %vm51_vm8, %v50_v23  }
  0x84   :  { %v56_v24 = vpop.permute.xlu0 %55   ;;  %v62_v25 = vpop.permute.xlu1 %61  }
  0x85   :  { %58 = vst.msk [vmem:[#allocation0] sm:$0x1] %vm57_vm9, %v56_v24  }
  0x86   :  { %64 = vst.msk [vmem:[#allocation0] sm:$0x1] %vm63_vm10, %v62_v25  }
  0x88   :  { %v68_v26 = vpop.permute.xlu0 %67   ;;  %v74_v27 = vpop.permute.xlu1 %73  }
  0x89   :  { %70 = vst.msk [vmem:[#allocation0] sm:$0x1] %vm69_vm11, %v68_v26  }
  0x8a   :  { %76 = vst.msk [vmem:[#allocation0] sm:$0x1] %vm75_vm12, %v74_v27  }
  0x8c   :  { %v80_v28 = vpop.permute.xlu0 %79   ;;  %v86_v29 = vpop.permute.xlu1 %85  }
  0x8d   :  { %82 = vst.msk [vmem:[#allocation0] sm:$0x1] %vm81_vm13, %v80_v28  }
  0x8e   :  { %88 = vst.msk [vmem:[#allocation0] sm:$0x1] %vm87_vm14, %v86_v29  }
  0x90   :  { %v92_v30 = vpop.permute.xlu0 %91  }
  0x91   :  { %94 = vst.msk [vmem:[#allocation0] sm:$0x1] %vm93_vm15, %v92_v30  }
  0x98   :  { %v98_v31 = vld [vmem:[#allocation0] sm:$0x1] }
  0x99   :  { %100 = vst [vmem:[%s208_s1] sm:$0x1] %v98_v31 }

// kernel: tile.113
= control target key start
LH: loop header
LB: loop body
LE: loop exit
PB: predicated region body
PF: predicated region fallthrough
CT: control target
= control target key end

     0   :  { %s28_s0 = inlined_call_operand.vmem [shape: f32[8], index: 0, kind: input, shape index: {}]   ;;  %s29_s1 = inlined_call_operand.vmem [shape: f32[16,8], index: 1, kind: output, shape index: {}]  }
   0x1   :  { %v4_v0 = vld [vmem:[%s28_s0] ss:$0 sm:$0xff] }
   0x2   :  { %5 = vst [vmem:[%s29_s1] sm:$0xff] %v4_v0  ;;  %8 = vst [vmem:[%s29_s1 + $0x8] sm:$0xff] %v4_v0 }

// kernel: tile.114
= control target key start
LH: loop header
LB: loop body
LE: loop exit
PB: predicated region body
PF: predicated region fallthrough
CT: control target
= control target key end

     0   :  { %s131_s10 = smov 120   ;;  %s132_s11 = smov 104   ;;  %vm3_vm0 = vcmask 64512   ;;  %vm9_vm1 = vcmask 1048512   ;;  %vm15_vm2 = vcmask 982912   ;;  %vm21_vm3 = vcmask 917312   ;;  %s207_s0 = inlined_call_operand.vmem [shape: f32[16,8], index: 0, kind: input, shape index: {}]   ;;  %s208_s1 = inlined_call_operand.vmem [shape: f32[1,128], index: 1, kind: output, shape index: {}]  }
   0x1   :  { %v101_v0 = vld [vmem:[%s207_s0 + $0xf] sm:$0x1]   ;;  %v103_v1 = vld [vmem:[%s207_s0 + $0xd] sm:$0x1]   ;;  %v102_v2 = vld [vmem:[%s207_s0 + $0xe] sm:$0x1]  }
   0x2   :  { %7 = vrot.lane.b32.xlu0 %v101_v0, %s131_s10  ;;  %19 = vrot.lane.b32.xlu1 %v103_v1, %s132_s11  ;;  %v104_v3 = vld [vmem:[%s207_s0 + $0xc] sm:$0x1]   ;;  %s133_s16 = smov 112   ;;  %s134_s17 = smov 96   ;;  %v105_v4 = vld [vmem:[%s207_s0 + $0xb] sm:$0x1]  }
   0x3   :  { %v106_v5 = vld [vmem:[%s207_s0 + $0xa] sm:$0x1]   ;;  %v2_v6 = vld [vmem:[%s207_s0] sm:$0x1]   ;;  %s135_s24 = smov 88   ;;  %s136_s25 = smov 80  }
   0x4   :  { %4 = vst.msk [vmem:[#allocation0] sm:$0x1] %vm3_vm0, %v2_v6   ;;  %v107_v7 = vld [vmem:[%s207_s0 + $0x9] sm:$0x1]   ;;  %v108_v8 = vld [vmem:[%s207_s0 + $0x8] sm:$0x1]  }
   0x5   :  { %s137_s30 = smov 72   ;;  %s138_s2 = smov 64   ;;  %v109_v9 = vld [vmem:[%s207_s0 + $0x7] sm:$0x1]   ;;  %v110_v10 = vld [vmem:[%s207_s0 + $0x6] sm:$0x1]  }
   0x6   :  { %13 = vrot.lane.b32.xlu0 %v102_v2, %s133_s16  ;;  %25 = vrot.lane.b32.xlu1 %v104_v3, %s134_s17  ;;  %s139_s7 = smov 56   ;;  %s140_s8 = smov 48   ;;  %v111_v11 = vld [vmem:[%s207_s0 + $0x5] sm:$0x1]   ;;  %v112_v12 = vld [vmem:[%s207_s0 + $0x4] sm:$0x1]  }
   0x7   :  { %s141_s13 = smov 40   ;;  %s142_s14 = smov 32   ;;  %v113_v13 = vld [vmem:[%s207_s0 + $0x3] sm:$0x1]   ;;  %v114_v14 = vld [vmem:[%s207_s0 + $0x2] sm:$0x1]  }
   0x8   :  { %s143_s19 = smov 24   ;;  %s144_s20 = smov 16   ;;  %v115_v15 = vld [vmem:[%s207_s0 + $0x1] sm:$0x1]   ;;  %vm27_vm4 = vcmask 851712   ;;  %vm33_vm5 = vcmask 786112  }
   0x9   :  { %s145_s0 = smov 8   ;;  %vm39_vm6 = vcmask 720512   ;;  %vm45_vm7 = vcmask 654912   ;;  %vm51_vm8 = vcmask 589312   ;;  %vm57_vm9 = vcmask 523712  }
   0xa   :  { %31 = vrot.lane.b32.xlu0 %v105_v4, %s135_s24  ;;  %37 = vrot.lane.b32.xlu1 %v106_v5, %s136_s25  ;;  %vm63_vm10 = vcmask 458112   ;;  %vm69_vm11 = vcmask 392512   ;;  %vm75_vm12 = vcmask 326912   ;;  %vm81_vm13 = vcmask 261312  }
   0xb   :  { %vm87_vm14 = vcmask 195712   ;;  %vm93_vm15 = vcmask 130112  }
   0xe   :  { %43 = vrot.lane.b32.xlu0 %v107_v7, %s137_s30  ;;  %49 = vrot.lane.b32.xlu1 %v108_v8, %s138_s2 }
  0x12   :  { %55 = vrot.lane.b32.xlu0 %v109_v9, %s139_s7  ;;  %61 = vrot.lane.b32.xlu1 %v110_v10, %s140_s8 }
  0x16   :  { %67 = vrot.lane.b32.xlu0 %v111_v11, %s141_s13  ;;  %73 = vrot.lane.b32.xlu1 %v112_v12, %s142_s14 }
  0x1a   :  { %79 = vrot.lane.b32.xlu0 %v113_v13, %s143_s19  ;;  %85 = vrot.lane.b32.xlu1 %v114_v14, %s144_s20 }
  0x1e   :  { %91 = vrot.lane.b32.xlu0 %v115_v15, %s145_s0 }
  0x74   :  { %v8_v16 = vpop.permute.xlu0 %7   ;;  %v20_v17 = vpop.permute.xlu1 %19  }
  0x75   :  { %10 = vst.msk [vmem:[#allocation0] sm:$0x1] %vm9_vm1, %v8_v16  }
  0x78   :  { %v14_v18 = vpop.permute.xlu0 %13   ;;  %v26_v19 = vpop.permute.xlu1 %25  }
  0x79   :  { %16 = vst.msk [vmem:[#allocation0] sm:$0x1] %vm15_vm2, %v14_v18  }
  0x7a   :  { %22 = vst.msk [vmem:[#allocation0] sm:$0x1] %vm21_vm3, %v20_v17  }
  0x7b   :  { %28 = vst.msk [vmem:[#allocation0] sm:$0x1] %vm27_vm4, %v26_v19  }
  0x7c   :  { %v32_v20 = vpop.permute.xlu0 %31   ;;  %v38_v21 = vpop.permute.xlu1 %37  }
  0x7d   :  { %34 = vst.msk [vmem:[#allocation0] sm:$0x1] %vm33_vm5, %v32_v20  }
  0x7e   :  { %40 = vst.msk [vmem:[#allocation0] sm:$0x1] %vm39_vm6, %v38_v21  }
  0x80   :  { %v44_v22 = vpop.permute.xlu0 %43   ;;  %v50_v23 = vpop.permute.xlu1 %49  }
  0x81   :  { %46 = vst.msk [vmem:[#allocation0] sm:$0x1] %vm45_vm7, %v44_v22  }
  0x82   :  { %52 = vst.msk [vmem:[#allocation0] sm:$0x1] %vm51_vm8, %v50_v23  }
  0x84   :  { %v56_v24 = vpop.permute.xlu0 %55   ;;  %v62_v25 = vpop.permute.xlu1 %61  }
  0x85   :  { %58 = vst.msk [vmem:[#allocation0] sm:$0x1] %vm57_vm9, %v56_v24  }
  0x86   :  { %64 = vst.msk [vmem:[#allocation0] sm:$0x1] %vm63_vm10, %v62_v25  }
  0x88   :  { %v68_v26 = vpop.permute.xlu0 %67   ;;  %v74_v27 = vpop.permute.xlu1 %73  }
  0x89   :  { %70 = vst.msk [vmem:[#allocation0] sm:$0x1] %vm69_vm11, %v68_v26  }
  0x8a   :  { %76 = vst.msk [vmem:[#allocation0] sm:$0x1] %vm75_vm12, %v74_v27  }
  0x8c   :  { %v80_v28 = vpop.permute.xlu0 %79   ;;  %v86_v29 = vpop.permute.xlu1 %85  }
  0x8d   :  { %82 = vst.msk [vmem:[#allocation0] sm:$0x1] %vm81_vm13, %v80_v28  }
  0x8e   :  { %88 = vst.msk [vmem:[#allocation0] sm:$0x1] %vm87_vm14, %v86_v29  }
  0x90   :  { %v92_v30 = vpop.permute.xlu0 %91  }
  0x91   :  { %94 = vst.msk [vmem:[#allocation0] sm:$0x1] %vm93_vm15, %v92_v30  }
  0x98   :  { %v98_v31 = vld [vmem:[#allocation0] sm:$0x1] }
  0x99   :  { %100 = vst [vmem:[%s208_s1] sm:$0x1] %v98_v31 }

// kernel: encoder_forward.4
= control target key start
LH: loop header
LB: loop body
LE: loop exit
PB: predicated region body
PF: predicated region fallthrough
CT: control target
= control target key end

     0   :  { %s1665_s17 = smov 0   ;;  %s1930_s0 = inlined_call_operand.vmem [shape: f32[2,16,32], index: 0, kind: input, shape index: {}]   ;;  %s1931_s1 = inlined_call_operand.vmem [shape: f32[1,32], index: 1, kind: input, shape index: {}]   ;;  %s1932_s2 = inlined_call_operand.vmem [shape: f32[1,32], index: 2, kind: input, shape index: {}]   ;;  %s1933_s3 = inlined_call_operand.vmem [shape: f32[3,32,128], index: 3, kind: input, shape index: {}]   ;;  %s1934_s4 = inlined_call_operand.vmem [shape: f32[1,128], index: 4, kind: input, shape index: {}]   ;;  %s1935_s5 = inlined_call_operand.vmem [shape: f32[1,128], index: 5, kind: input, shape index: {}]   ;;  %s1936_s6 = inlined_call_operand.vmem [shape: f32[3,128,128], index: 6, kind: input, shape index: {}]   ;;  %s1937_s7 = inlined_call_operand.vmem [shape: f32[1,128], index: 7, kind: input, shape index: {}]   ;;  %s1938_s8 = inlined_call_operand.vmem [shape: f32[1,128], index: 8, kind: input, shape index: {}]   ;;  %s1939_s9 = inlined_call_operand.vmem [shape: f32[32,128], index: 9, kind: input, shape index: {}]   ;;  %s1940_s10 = inlined_call_operand.vmem [shape: f32[1,128], index: 10, kind: input, shape index: {}]   ;;  %s1941_s11 = inlined_call_operand.vmem [shape: f32[2,16,128], index: 11, kind: output, shape index: {}]  }
   0x1 LB: > { %s1155_s18 = sadd.s32 4294967295, %s1603_s17   ;;  %p1159_p0 = scmp.ge.s32.totalorder %s1603_s17, 1  ;;  %s1603_s17 = sphi %s1665_s17, %s21_s17  }
   0x2   : > { %p337_p1 = scmp.lt.s32.totalorder %s1603_s17, 3 }
   0x4   : > { %p338_p2 = pnand %p1159_p0, %p337_p1 }
   0x5   : > { %v1166_v0 = vld [vmem:[%s1933_s3 + $0x20] sm:$0xff] (!%p338_p2)  ;;  %v1167_v1 = vld [vmem:[%s1933_s3 + $0x28] sm:$0xff] (!%p338_p2)  ;;  %v1168_v2 = vld [vmem:[%s1933_s3 + $0x30] sm:$0xff] (!%p338_p2)  ;;  %p377_p3 = scmp.lt.s32.totalorder (!%p338_p2), %s1155_s18, 1  ;;  %vm424_vm0 = vcmask (!%p338_p2), 261120   ;;  %vm409_vm1 = vcmask (!%p338_p2), 1040384  }
   0x6   : > { %341 = sbr.rel (%p338_p2) target bundleno = 518 (0x206), region = 64  ;;  %v1453_v3 = vpack.c.bf16 (!%p338_p2), %v1167_v1, %v1166_v0  ;;  %v1169_v4 = vld [vmem:[%s1933_s3 + $0x38] sm:$0xff] (!%p338_p2)  ;;  %v415_v6 = vld [vmem:[%s1933_s3] sm:$0xff] (!%p338_p2)  ;;  %v416_v7 = vld [vmem:[%s1933_s3 + $0x8] sm:$0xff] (!%p338_p2)  ;;  %vm584_vm2 = vcmask (!%p338_p2), 1046528  }
   0x7   : > { %v1457_v5 = vpack.c.bf16 (!%p338_p2), %v1169_v4, %v1168_v2  ;;  %v1164_v8 = vld [vmem:[%s1931_s1] ss:$0 sm:$0xff] (!%p338_p2)  ;;  %v1461_v10 = vpack.c.bf16 (!%p338_p2), %v416_v7, %v415_v6  ;;  %v706_v12 = vld [vmem:[%s1936_s6 + $0x8] sm:$0xff] (!%p338_p2)  ;;  %v417_v15 = vld [vmem:[%s1933_s3 + $0x10] sm:$0xff] (!%p338_p2) }
   0x8   : > { %1454 = vmatprep.subr.bf16.mxu0 (!%p338_p2), %v1453_v3  ;;  %v1165_v9 = vld [vmem:[%s1932_s2] ss:$0 sm:$0xff] (!%p338_p2)  ;;  %v418_v19 = vld [vmem:[%s1933_s3 + $0x18] sm:$0xff] (!%p338_p2)  ;;  %v707_v20 = vld [vmem:[%s1936_s6 + $0x10] sm:$0xff] (!%p338_p2) }
   0x9   : > { %1456 = vmatpush3.bf16.msra.mxu0 (!%p338_p2), %v1453_v3  ;;  %v705_v11 = vld [vmem:[%s1936_s6] sm:$0xff] (!%p338_p2)  ;;  %v708_v21 = vld [vmem:[%s1936_s6 + $0x18] sm:$0xff] (!%p338_p2)  ;;  %v710_v26 = vld [vmem:[%s1936_s6 + $0x28] sm:$0xff] (!%p338_p2)  ;;  %v1465_v27 = vpack.c.bf16 (!%p338_p2), %v418_v19, %v417_v15 }
   0xa   : > { %1458 = vmatprep.subr.bf16.mxu0 (!%p338_p2), %v1457_v5  ;;  %v1509_v16 = vpack.c.bf16 (!%p338_p2), %v706_v12, %v705_v11  ;;  %v1513_v22 = vpack.c.bf16 (!%p338_p2), %v708_v21, %v707_v20  ;;  %v709_v23 = vld [vmem:[%s1936_s6 + $0x20] sm:$0xff] (!%p338_p2)  ;;  %v1175_v30 = vld [vmem:[%s1933_s3 + $0x48] sm:$0xff] (!%p338_p2)  ;;  %v711_v32 = vld [vmem:[%s1936_s6 + $0x30] sm:$0xff] (!%p338_p2) }
   0xb   : > { %v1174_v28 = vld [vmem:[%s1933_s3 + $0x40] sm:$0xff] (!%p338_p2)  ;;  %v1517_v31 = vpack.c.bf16 (!%p338_p2), %v710_v26, %v709_v23  ;;  %v712_v33 = vld [vmem:[%s1936_s6 + $0x38] sm:$0xff] (!%p338_p2)  ;;  %v1176_v40 = vld [vmem:[%s1933_s3 + $0x50] sm:$0xff] (!%p338_p2) }
   0xc   : > { %1510 = vmatprep.subr.bf16.mxu1 (!%p338_p2), %v1509_v16  ;;  %v1469_v36 = vpack.c.bf16 (!%p338_p2), %v1175_v30, %v1174_v28  ;;  %v1521_v39 = vpack.c.bf16 (!%p338_p2), %v712_v33, %v711_v32  ;;  %v1177_v41 = vld [vmem:[%s1933_s3 + $0x58] sm:$0xff] (!%p338_p2)  ;;  %v713_v42 = vld [vmem:[%s1936_s6 + $0x40] sm:$0xff] (!%p338_p2)  ;;  %v714_v43 = vld [vmem:[%s1936_s6 + $0x48] sm:$0xff] (!%p338_p2) }
   0xd   : > { %s1943_s18 = smov (!%p377_p3, %s1155_s18), 1  ;;  %1460 = vmatpush3.bf16.msra.mxu0 %v1457_v5  ;;  %1512 = vmatpush3.bf16.msra.mxu1 %v1509_v16  ;;  %v1473_v45 = vpack.c.bf16 %v1177_v41, %v1176_v40  ;;  %v1182_v47 = vld [vmem:[%s1936_s6 + $0x80] sm:$0xff]  ;;  %v1183_v48 = vld [vmem:[%s1936_s6 + $0x88] sm:$0xff]  ;;  %v1525_v49 = vpack.c.bf16 %v714_v43, %v713_v42  ;;  %v715_v50 = vld [vmem:[%s1936_s6 + $0x50] sm:$0xff] }
   0xe   : > { %s1224_s12 = sshll.u32 %s1943_s18, 4  ;;  %1462 = vmatprep.subr.bf16.mxu0 %v1461_v10  ;;  %1514 = vmatprep.subr.bf16.mxu1 %v1513_v22  ;;  %v716_v51 = vld [vmem:[%s1936_s6 + $0x58] sm:$0xff]  ;;  %v1477_v52 = vpack.c.bf16 %v1183_v48, %v1182_v47  ;;  %v1184_v53 = vld [vmem:[%s1936_s6 + $0x90] sm:$0xff]  ;;  %v1186_v58 = vld [vmem:[%s1936_s6 + $0xa0] sm:$0xff] }
   0xf   : > { %s381_s19 = scalar_lea.vmem %s1930_s0, %s1224_s12  ;;  %v1185_v54 = vld [vmem:[%s1936_s6 + $0x98] sm:$0xff]  ;;  %v1529_v55 = vpack.c.bf16 %v716_v51, %v715_v50  ;;  %v1187_v59 = vld [vmem:[%s1936_s6 + $0xa8] sm:$0xff]  ;;  %v1188_v61 = vld [vmem:[%s1936_s6 + $0xb0] sm:$0xff]  ;;  %s386_s22 = scalar_lea.vmem %s1941_s11, %s1224_s12 }
  0x10   : > { %v387_v13 = vld [vmem:[%s381_s19] sm:$0xff]  ;;  %v388_v14 = vld [vmem:[%s381_s19 + $0x8] sm:$0xff]  ;;  %v1481_v57 = vpack.c.bf16 %v1185_v54, %v1184_v53  ;;  %v1485_v60 = vpack.c.bf16 %v1187_v59, %v1186_v58  ;;  %v1189_v62 = vld [vmem:[%s1936_s6 + $0xb8] sm:$0xff] }
  0x11   : > { %v396_v17 = vmul.f32 %v1164_v8, %v387_v13  ;;  %v397_v18 = vmul.f32 %v1164_v8, %v388_v14  ;;  %1516 = vmatpush3.bf16.msra.mxu1 %v1513_v22  ;;  %v1489_v63 = vpack.c.bf16 %v1189_v62, %v1188_v61  ;;  %v1190_v0 = vld [vmem:[%s1936_s6 + $0xc0] sm:$0xff]  ;;  %v1191_v1 = vld [vmem:[%s1936_s6 + $0xc8] sm:$0xff]  ;;  %v1192_v3 = vld [vmem:[%s1936_s6 + $0xd0] sm:$0xff] }
  0x12   : > { %1518 = vmatprep.subr.bf16.mxu1 %v1517_v31  ;;  %v1493_v2 = vpack.c.bf16 %v1191_v1, %v1190_v0  ;;  %v1193_v4 = vld [vmem:[%s1936_s6 + $0xd8] sm:$0xff]  ;;  %v1194_v6 = vld [vmem:[%s1936_s6 + $0xe0] sm:$0xff]  ;;  %v1195_v7 = vld [vmem:[%s1936_s6 + $0xe8] sm:$0xff] }
  0x13   : > { %v1726_v24 = vadd.f32 %v1165_v9, %v396_v17  ;;  %v1728_v25 = vadd.f32 %v1165_v9, %v397_v18  ;;  %v1497_v5 = vpack.c.bf16 %v1193_v4, %v1192_v3  ;;  %v1501_v8 = vpack.c.bf16 %v1195_v7, %v1194_v6  ;;  %v717_v9 = vld [vmem:[%s1936_s6 + $0x60] sm:$0xff]  ;;  %v1196_v12 = vld [vmem:[%s1936_s6 + $0xf0] sm:$0xff]  ;;  %v1197_v13 = vld [vmem:[%s1936_s6 + $0xf8] sm:$0xff] }
  0x14   : > { %v1505_v14 = vpack.c.bf16 %v1197_v13, %v1196_v12  ;;  %v719_v15 = vld [vmem:[%s1936_s6 + $0x70] sm:$0xff]  ;;  %v720_v16 = vld [vmem:[%s1936_s6 + $0x78] sm:$0xff]  ;;  %v1200_v18 = vld [vmem:[%s1936_s6 + $0x100] sm:$0xff] }
  0x15   : > { %1312 = vmatprep.mubr.msk.f32.mxu0 %vm424_vm0, %v1726_v24  ;;  %v410_v29 = vrot.slane %v1726_v24, 7  ;;  %v411_v35 = vrot.slane %v1728_v25, 7  ;;  %v585_v37 = vrot.slane %v1726_v24, 1  ;;  %v586_v38 = vrot.slane %v1728_v25, 1  ;;  %1520 = vmatpush3.bf16.msra.mxu1 %v1517_v31  ;;  %v1201_v19 = vld [vmem:[%s1936_s6 + $0x108] sm:$0xff]  ;;  %v1008_v21 = vld [vmem:[%s1939_s9] sm:$0xff]  ;;  %vm1198_vm3 = vmneg %vm409_vm1 }
  0x16   : > { %1313 = vmatmul.mubr.msk.f32.vlgmr.msra.gmra.mrb[0].mxu0 %vm424_vm0, %v1728_v25  ;;  %1522 = vmatprep.subr.bf16.mxu1 %v1521_v39  ;;  %v1537_v17 = vpack.c.bf16 %v720_v16, %v719_v15  ;;  %v1541_v20 = vpack.c.bf16 %v1201_v19, %v1200_v18  ;;  %v1009_v22 = vld [vmem:[%s1939_s9 + $0x8] sm:$0xff]  ;;  %v1180_v26 = vld [vmem:[%s1934_s4] ss:$0 sm:$0xff]  ;;  %v1206_v51 = vld [vmem:[%s1936_s6 + $0x130] sm:$0xff] }
  0x17   : > { %1464 = vmatpush3.bf16.msra.mxu0 %v1461_v10  ;;  %v414_v34 = vsel %vm409_vm1, 0.0, %v410_v29  ;;  %v412_v44 = vsel %vm409_vm1, %v410_v29, %v411_v35  ;;  %v587_v46 = vsel %vm584_vm2, %v585_v37, %v586_v38  ;;  %v589_v56 = vsel %vm584_vm2, %v586_v38, 0.0  ;;  %v718_v10 = vld [vmem:[%s1936_s6 + $0x68] sm:$0xff]  ;;  %v1181_v28 = vld [vmem:[%s1935_s5] ss:$0 sm:$0xff]  ;;  %v1011_v35 = vld [vmem:[%s1939_s9 + $0x18] sm:$0xff] }
  0x18   : > { %1466 = vmatprep.subr.bf16.mxu0 %v1465_v27  ;;  %1323 = vmatprep.mubr.msk.f32.mxu0 %vm424_vm0, %v414_v34  ;;  %v1533_v11 = vpack.c.bf16 %v718_v10, %v717_v9  ;;  %v1573_v23 = vpack.c.bf16 %v1009_v22, %v1008_v21  ;;  %v1010_v34 = vld [vmem:[%s1939_s9 + $0x10] sm:$0xff]  ;;  %v1204_v48 = vld [vmem:[%s1936_s6 + $0x120] sm:$0xff]  ;;  %v1213_v59 = vld [vmem:[%s1936_s6 + $0x168] sm:$0xff] }
  0x19   : > { %1524 = vmatpush3.bf16.msra.mxu1 %v1521_v39  ;;  %v1202_v38 = vld [vmem:[%s1936_s6 + $0x110] sm:$0xff]  ;;  %v1203_v39 = vld [vmem:[%s1936_s6 + $0x118] sm:$0xff]  ;;  %v1577_v42 = vpack.c.bf16 %v1011_v35, %v1010_v34  ;;  %v1208_v54 = vld [vmem:[%s1936_s6 + $0x140] sm:$0xff] }
  0x1a   : > { %1526 = vmatprep.subr.bf16.mxu1 %v1525_v49  ;;  %v1212_v58 = vld [vmem:[%s1936_s6 + $0x160] sm:$0xff]  ;;  %v1214_v61 = vld [vmem:[%s1936_s6 + $0x170] sm:$0xff]  ;;  %v1215_v62 = vld [vmem:[%s1936_s6 + $0x178] sm:$0xff] }
  0x1b   : > { %1468 = vmatpush3.bf16.msra.mxu0 %v1465_v27  ;;  %v1218_v9 = vld [vmem:[%s1938_s8] ss:$0 sm:$0xff] }
  0x1c   : > { %1470 = vmatprep.subr.bf16.mxu0 %v1469_v36  ;;  %v1221_v15 = vld [vmem:[%s1940_s10] ss:$0 sm:$0xff] }
  0x1d   : > { %1528 = vmatpush3.bf16.msra.mxu1 %v1525_v49  ;;  %v1205_v49 = vld [vmem:[%s1936_s6 + $0x128] sm:$0xff] }
  0x1e   : > { %1324 = vmatmul.mubr.msk.f32.vlgmr.msra.gmra.mrb[0].mxu0 %vm424_vm0, %v412_v44  ;;  %1530 = vmatprep.subr.bf16.mxu1 %v1529_v55  ;;  %v1549_v50 = vpack.c.bf16 %v1205_v49, %v1204_v48 }
  0x1f   : > { %1472 = vmatpush3.bf16.msra.mxu0 %v1469_v36  ;;  %1334 = vmatprep.mubr.msk.f32.mxu0 %vm424_vm0, %v587_v46 }
  0x20   : > { %1474 = vmatprep.subr.bf16.mxu0 %v1473_v45 }
  0x21   : > { %1532 = vmatpush3.bf16.msra.mxu1 %v1529_v55 }
  0x22   : > { %1534 = vmatprep.subr.bf16.mxu1 %v1533_v11 }
  0x23   : > { %1476 = vmatpush3.bf16.msra.mxu0 %v1473_v45  ;;  %v1545_v45 = vpack.c.bf16 %v1203_v39, %v1202_v38 }
  0x24   : > { %1478 = vmatprep.subr.bf16.mxu0 %v1477_v52 }
  0x25   : > { %1536 = vmatpush3.bf16.msra.mxu1 %v1533_v11 }
  0x26   : > { %1335 = vmatmul.mubr.msk.f32.vlgmr.msra.gmra.mrb[0].mxu0 %vm424_vm0, %v589_v56  ;;  %1538 = vmatprep.subr.bf16.mxu1 %v1537_v17  ;;  %v1210_v56 = vld [vmem:[%s1936_s6 + $0x150] sm:$0xff] }
  0x27   : > { %1480 = vmatpush3.bf16.msra.mxu0 %v1477_v52  ;;  %v1207_v52 = vld [vmem:[%s1936_s6 + $0x138] sm:$0xff] }
  0x28   : > { %1482 = vmatprep.subr.bf16.mxu0 %v1481_v57  ;;  %v1553_v53 = vpack.c.bf16 %v1207_v52, %v1206_v51 }
  0x29   : > { %1540 = vmatpush3.bf16.msra.mxu1 %v1537_v17 }
  0x2a   : > { %1542 = vmatprep.subr.bf16.mxu1 %v1541_v20 }
  0x2b   : > { %1484 = vmatpush3.bf16.msra.mxu0 %v1481_v57  ;;  %v1211_v57 = vld [vmem:[%s1936_s6 + $0x158] sm:$0xff] }
  0x2c   : > { %1486 = vmatprep.subr.bf16.mxu0 %v1485_v60 }
  0x2f   : > { %1488 = vmatpush3.bf16.msra.mxu0 %v1485_v60  ;;  %v1565_v60 = vpack.c.bf16 %v1213_v59, %v1212_v58 }
  0x30   : > { %1490 = vmatprep.subr.bf16.mxu0 %v1489_v63 }
  0x33   : > { %1492 = vmatpush3.bf16.msra.mxu0 %v1489_v63  ;;  %v1569_v63 = vpack.c.bf16 %v1215_v62, %v1214_v61 }
  0x34   : > { %1494 = vmatprep.subr.bf16.mxu0 %v1493_v2 }
  0x37   : > { %1496 = vmatpush3.bf16.msra.mxu0 %v1493_v2 }
  0x38   : > { %1498 = vmatprep.subr.bf16.mxu0 %v1497_v5 }
  0x3b   : > { %1500 = vmatpush3.bf16.msra.mxu0 %v1497_v5  ;;  %v1217_v5 = vld [vmem:[%s1937_s7] ss:$0 sm:$0xff] }
  0x3c   : > { %1502 = vmatprep.subr.bf16.mxu0 %v1501_v8 }
  0x3f   : > { %1504 = vmatpush3.bf16.msra.mxu0 %v1501_v8 }
  0x40   : > { %1506 = vmatprep.subr.bf16.mxu0 %v1505_v14 }
  0x43   : > { %1508 = vmatpush3.bf16.msra.mxu0 %v1505_v14 }
  0x44   : > { %1574 = vmatprep.subr.bf16.mxu0 %v1573_v23 }
  0xf9   : > { %v1336_v27 = vpop.f32.mrb[0].mxu0 }
  0xfa   : > { %v685_v29 = vmul.f32 %v1336_v27, %v1180_v26  ;;  %v666_v30 = vpop.f32.mrb[1].mxu0 }
  0xfb   : > { %v684_v31 = vmul.f32 %v1180_v26, %v666_v30 }
  0xfc   : > { %v694_v32 = vadd.f32 %v1181_v28, %v685_v29 }
  0xfd   : > { %v693_v33 = vadd.f32 %v1181_v28, %v684_v31 }
  0xfe   : > { %v696_v36 = vmax.f32 %v694_v32, 0.0 }
  0xff   : > { %v695_v37 = vmax.f32 %v693_v33, 0.0 }
 0x100   : > { %v700_v40 = vrot.slane %v696_v36, 7  ;;  %v889_v41 = vrot.slane %v696_v36, 1 }
 0x101   : > { %1369 = vmatprep.mubr.f32.mxu0 %v695_v37  ;;  %v699_v43 = vrot.slane %v695_v37, 7  ;;  %v888_v44 = vrot.slane %v695_v37, 1 }
 0x102   : > { %1370 = vmatmul.mubr.f32.vlgmr.msra.gmra.mrb[2].mxu0 %v696_v36 }
 0x103   : > { %1404 = vmatprep.mubr.msk.f32.mxu1 %vm1198_vm3, %v699_v43  ;;  %v701_v46 = vsel %vm409_vm1, %v699_v43, %v700_v40  ;;  %v890_v47 = vsel %vm584_vm2, %v888_v44, %v889_v41  ;;  %1576 = vmatpush3.bf16.msra.mxu0 %v1573_v23 }
 0x104   : > { %1405 = vmatmul.mubr.f32.vlgmr.msra.gmra.mrb[0].mxu1 %v701_v46  ;;  %1578 = vmatprep.subr.bf16.mxu0 %v1577_v42 }
 0x105   : > { %1544 = vmatpush3.bf16.msra.mxu1 %v1541_v20  ;;  %1439 = vmatprep.mubr.f32.mxu1 %v890_v47 }
 0x106   : > { %1546 = vmatprep.subr.bf16.mxu1 %v1545_v45  ;;  %1450 = vmatprep.mubr.msk.f32.mxu0 %vm424_vm0, %v1726_v24  ;;  %v1209_v24 = vld [vmem:[%s1936_s6 + $0x148] sm:$0xff] }
 0x107   : > { %1580 = vmatpush3.bf16.msra.mxu0 %v1577_v42  ;;  %v1557_v55 = vpack.c.bf16 %v1209_v24, %v1208_v54 }
 0x109   : > { %1548 = vmatpush3.bf16.msra.mxu1 %v1545_v45 }
 0x10a   : > { %1550 = vmatprep.subr.bf16.mxu1 %v1549_v50  ;;  %1451 = vmatmul.mubr.msk.f32.vlgmr.msra.gmra.mrb[4].mxu0 %vm424_vm0, %v1728_v25  ;;  %v1561_v25 = vpack.c.bf16 %v1211_v57, %v1210_v56 }
 0x10d   : > { %1552 = vmatpush3.bf16.msra.mxu1 %v1549_v50 }
 0x10e   : > { %1554 = vmatprep.subr.bf16.mxu1 %v1553_v53 }
 0x111   : > { %1556 = vmatpush3.bf16.msra.mxu1 %v1553_v53 }
 0x112   : > { %1558 = vmatprep.subr.bf16.mxu1 %v1557_v55 }
 0x115   : > { %1560 = vmatpush3.bf16.msra.mxu1 %v1557_v55 }
 0x116   : > { %1562 = vmatprep.subr.bf16.mxu1 %v1561_v25 }
 0x119   : > { %1564 = vmatpush3.bf16.msra.mxu1 %v1561_v25 }
 0x11a   : > { %1566 = vmatprep.subr.bf16.mxu1 %v1565_v60 }
 0x11d   : > { %1568 = vmatpush3.bf16.msra.mxu1 %v1565_v60 }
 0x11e   : > { %1570 = vmatprep.subr.bf16.mxu1 %v1569_v63 }
 0x121   : > { %1572 = vmatpush3.bf16.msra.mxu1 %v1569_v63 }
 0x124   : > { %1440 = vmatmul.mubr.msk.f32.vlgmr.msra.gmra.mrb[0].mxu1 %vm584_vm2, %v889_v41 }
 0x1d5   : > { %v1371_v0 = vpop.f32.mrb[2].mxu0 }
 0x1d6   : > { %v804_v1 = vpop.f32.mrb[3].mxu0 }
 0x1dd   : > { %v1452_v2 = vpop.f32.mrb[4].mxu0 }
 0x1de   : > { %v1078_v3 = vpop.f32.mrb[5].mxu0 }
 0x1f7   : > { %v1441_v4 = vpop.f32.mrb[0].mxu1 }
 0x1f8   : > { %v1581_v6 = vadd.f32 %v1441_v4, %v1371_v0  ;;  %v977_v7 = vpop.f32.mrb[1].mxu1 }
 0x1f9   : > { %v1582_v8 = vadd.f32 %v977_v7, %v804_v1 }
 0x1fa   : > { %v996_v10 = vmul.f32 %v1581_v6, %v1217_v5 }
 0x1fb   : > { %v995_v11 = vmul.f32 %v1582_v8, %v1217_v5 }
 0x1fc   : > { %v1005_v12 = vadd.f32 %v1218_v9, %v996_v10 }
 0x1fd   : > { %v1004_v13 = vadd.f32 %v1218_v9, %v995_v11 }
 0x1fe   : > { %v1007_v14 = vmax.f32 %v1005_v12, 0.0 }
 0x1ff   : > { %v1006_v16 = vmax.f32 %v1004_v13, 0.0 }
 0x200   : > { %v1088_v17 = vadd.f32 %v1452_v2, %v1007_v14 }
 0x201   : > { %v1087_v18 = vadd.f32 %v1078_v3, %v1006_v16 }
 0x202   : > { %v1097_v19 = vadd.f32 %v1221_v15, %v1088_v17 }
 0x203   : > { %v1096_v20 = vadd.f32 %v1221_v15, %v1087_v18 }
 0x204   : > { %1099 = vst [vmem:[%s386_s22 + $0x8] sm:$0xff] %v1097_v19 }
 0x205   : > { %1098 = vst [vmem:[%s386_s22] sm:$0xff] %v1096_v20 }
 0x206 PF: > { %s21_s17 = sadd.s32 1, %s1603_s17  }
 0x207   : > { %p18_p4 = scmp.ge.s32.totalorder %s21_s17, 4  }
 0x209   :  { %20 = sbr.rel (!%p18_p4) target bundleno = 1 (0x1), region = 98 }

// kernel: encoder_forward.5
= control target key start
LH: loop header
LB: loop body
LE: loop exit
PB: predicated region body
PF: predicated region fallthrough
CT: control target
= control target key end

     0   :  { %s2037_s13 = smov 0   ;;  %s2456_s0 = inlined_call_operand.vmem [shape: f32[2,16,128], index: 0, kind: input, shape index: {}]   ;;  %s2457_s1 = inlined_call_operand.vmem [shape: f32[3,128,128], index: 1, kind: input, shape index: {}]   ;;  %s2458_s2 = inlined_call_operand.vmem [shape: f32[1,128], index: 2, kind: input, shape index: {}]   ;;  %s2459_s3 = inlined_call_operand.vmem [shape: f32[1,128], index: 3, kind: input, shape index: {}]   ;;  %s2460_s4 = inlined_call_operand.vmem [shape: f32[3,128,128], index: 4, kind: input, shape index: {}]   ;;  %s2461_s5 = inlined_call_operand.vmem [shape: f32[1,128], index: 5, kind: input, shape index: {}]   ;;  %s2462_s6 = inlined_call_operand.vmem [shape: f32[1,128], index: 6, kind: input, shape index: {}]   ;;  %s2463_s7 = inlined_call_operand.vmem [shape: f32[8,16], index: 7, kind: input, shape index: {}]   ;;  %s2464_s8 = inlined_call_operand.vmem [shape: f32[128,64], index: 8, kind: input, shape index: {}]   ;;  %s2465_s9 = inlined_call_operand.vmem [shape: f32[2,16,128], index: 9, kind: output, shape index: {0}]   ;;  %s2466_s10 = inlined_call_operand.vmem [shape: f32[2,8,64], index: 10, kind: output, shape index: {1}]  }
   0x1 LB: > { %s1255_s14 = sadd.s32 4294967295, %s1977_s13   ;;  %p1259_p0 = scmp.ge.s32.totalorder %s1977_s13, 1  ;;  %s1977_s13 = sphi %s2037_s13, %s21_s13  }
   0x2   : > { %p315_p1 = scmp.lt.s32.totalorder %s1977_s13, 3 }
   0x4   : > { %p316_p2 = pnand %p1259_p0, %p315_p1 }
   0x5   : > { %v1265_v0 = vld [vmem:[%s2457_s1 + $0x80] sm:$0xff] (!%p316_p2)  ;;  %v1266_v1 = vld [vmem:[%s2457_s1 + $0x88] sm:$0xff] (!%p316_p2)  ;;  %v1267_v2 = vld [vmem:[%s2457_s1 + $0x90] sm:$0xff] (!%p316_p2)  ;;  %p357_p3 = scmp.lt.s32.totalorder (!%p316_p2), %s1255_s14, 1  ;;  %vm375_vm0 = vcmask (!%p316_p2), 1040384   ;;  %vm565_vm2 = vcmask (!%p316_p2), 1046528  }
   0x6   : > { %319 = sbr.rel (%p316_p2) target bundleno = 1041 (0x411), region = 56  ;;  %v1725_v3 = vpack.c.bf16 (!%p316_p2), %v1266_v1, %v1265_v0  ;;  %v1268_v4 = vld [vmem:[%s2457_s1 + $0x98] sm:$0xff] (!%p316_p2)  ;;  %v1269_v6 = vld [vmem:[%s2457_s1 + $0xa0] sm:$0xff] (!%p316_p2)  ;;  %v1270_v7 = vld [vmem:[%s2457_s1 + $0xa8] sm:$0xff] (!%p316_p2)  ;;  %vm1980_vm3 = vmmov (!%p316_p2), 0   ;;  %vm1093_vm4 = vcmask (!%p316_p2), 130048  }
   0x7   : > { %v1729_v5 = vpack.c.bf16 (!%p316_p2), %v1268_v4, %v1267_v2  ;;  %v1733_v8 = vpack.c.bf16 (!%p316_p2), %v1270_v7, %v1269_v6  ;;  %v1271_v9 = vld [vmem:[%s2457_s1 + $0xb0] sm:$0xff] (!%p316_p2)  ;;  %v1272_v10 = vld [vmem:[%s2457_s1 + $0xb8] sm:$0xff] (!%p316_p2)  ;;  %v1273_v13 = vld [vmem:[%s2457_s1 + $0xc0] sm:$0xff] (!%p316_p2)  ;;  %vm1167_vm5 = vcmask (!%p316_p2), 523264  }
   0x8   : > { %1726 = vmatprep.subr.bf16.mxu0 (!%p316_p2), %v1725_v3  ;;  %v1737_v12 = vpack.c.bf16 (!%p316_p2), %v1272_v10, %v1271_v9  ;;  %v1274_v14 = vld [vmem:[%s2457_s1 + $0xc8] sm:$0xff] (!%p316_p2)  ;;  %v1275_v16 = vld [vmem:[%s2457_s1 + $0xd0] sm:$0xff] (!%p316_p2)  ;;  %v1276_v17 = vld [vmem:[%s2457_s1 + $0xd8] sm:$0xff] (!%p316_p2) }
   0x9   : > { %1728 = vmatpush3.bf16.msra.mxu0 (!%p316_p2), %v1725_v3  ;;  %v1741_v15 = vpack.c.bf16 (!%p316_p2), %v1274_v14, %v1273_v13  ;;  %v1745_v18 = vpack.c.bf16 (!%p316_p2), %v1276_v17, %v1275_v16  ;;  %v1302_v19 = vld [vmem:[%s2460_s4 + $0x80] sm:$0xff] (!%p316_p2)  ;;  %v1303_v20 = vld [vmem:[%s2460_s4 + $0x88] sm:$0xff] (!%p316_p2)  ;;  %v1304_v21 = vld [vmem:[%s2460_s4 + $0x90] sm:$0xff] (!%p316_p2) }
   0xa   : > { %1730 = vmatprep.subr.bf16.mxu0 (!%p316_p2), %v1729_v5  ;;  %v1277_v22 = vld [vmem:[%s2457_s1 + $0xe0] sm:$0xff] (!%p316_p2)  ;;  %v1278_v23 = vld [vmem:[%s2457_s1 + $0xe8] sm:$0xff] (!%p316_p2)  ;;  %v1821_v24 = vpack.c.bf16 (!%p316_p2), %v1303_v20, %v1302_v19  ;;  %v1305_v25 = vld [vmem:[%s2460_s4 + $0x98] sm:$0xff] (!%p316_p2) }
   0xb   : > { %v1825_v26 = vpack.c.bf16 (!%p316_p2), %v1305_v25, %v1304_v21  ;;  %v1306_v27 = vld [vmem:[%s2460_s4 + $0xa0] sm:$0xff] (!%p316_p2)  ;;  %v1307_v28 = vld [vmem:[%s2460_s4 + $0xa8] sm:$0xff] (!%p316_p2)  ;;  %v1749_v29 = vpack.c.bf16 (!%p316_p2), %v1278_v23, %v1277_v22  ;;  %v1279_v30 = vld [vmem:[%s2457_s1 + $0xf0] sm:$0xff] (!%p316_p2) }
   0xc   : > { %1822 = vmatprep.subr.bf16.mxu1 (!%p316_p2), %v1821_v24  ;;  %v1280_v31 = vld [vmem:[%s2457_s1 + $0xf8] sm:$0xff] (!%p316_p2)  ;;  %v1829_v32 = vpack.c.bf16 (!%p316_p2), %v1307_v28, %v1306_v27  ;;  %v1308_v33 = vld [vmem:[%s2460_s4 + $0xb0] sm:$0xff] (!%p316_p2)  ;;  %v382_v36 = vld [vmem:[%s2457_s1] sm:$0xff] (!%p316_p2) }
   0xd   : > { %s2470_s14 = smov (!%p357_p3, %s1255_s14), 1  ;;  %1732 = vmatpush3.bf16.msra.mxu0 %v1729_v5  ;;  %1824 = vmatpush3.bf16.msra.mxu1 %v1821_v24  ;;  %v1309_v34 = vld [vmem:[%s2460_s4 + $0xb8] sm:$0xff]  ;;  %v1753_v35 = vpack.c.bf16 %v1280_v31, %v1279_v30  ;;  %v383_v37 = vld [vmem:[%s2457_s1 + $0x8] sm:$0xff]  ;;  %v1310_v39 = vld [vmem:[%s2460_s4 + $0xc0] sm:$0xff] }
   0xe   : > { %s1342_s27 = sshll.u32 %s2470_s14, 4  ;;  %1734 = vmatprep.subr.bf16.mxu0 %v1733_v8  ;;  %1826 = vmatprep.subr.bf16.mxu1 %v1825_v26  ;;  %v1833_v38 = vpack.c.bf16 %v1309_v34, %v1308_v33  ;;  %v1311_v40 = vld [vmem:[%s2460_s4 + $0xc8] sm:$0xff]  ;;  %v1757_v41 = vpack.c.bf16 %v383_v37, %v382_v36  ;;  %v384_v42 = vld [vmem:[%s2457_s1 + $0x10] sm:$0xff]  ;;  %v385_v43 = vld [vmem:[%s2457_s1 + $0x18] sm:$0xff]  ;;  %s1264_s19 = sshll.u32 %s2470_s14, 3 }
   0xf   : > { %s2071_s30 = scalar_lea.vmem %s2456_s0, %s1342_s27  ;;  %v1837_v44 = vpack.c.bf16 %v1311_v40, %v1310_v39  ;;  %v1312_v45 = vld [vmem:[%s2460_s4 + $0xd0] sm:$0xff]  ;;  %v1313_v46 = vld [vmem:[%s2460_s4 + $0xd8] sm:$0xff]  ;;  %v1761_v49 = vpack.c.bf16 %v385_v43, %v384_v42  ;;  %vm2160_vm1 = vmneg %vm375_vm0  ;;  %s366_s17 = scalar_lea.vmem %s2465_s9, %s1342_s27 }
  0x10   : > { %v2080_v11 = vld [vmem:[%s2071_s30] sm:$0xff]  ;;  %v2156_v47 = vld [vmem:[%s2071_s30 + $0x8] sm:$0xff]  ;;  %v1841_v53 = vpack.c.bf16 %v1313_v46, %v1312_v45  ;;  %v388_v55 = vld [vmem:[%s2457_s1 + $0x30] sm:$0xff]  ;;  %s370_s21 = scalar_lea.vmem %s2466_s10, %s1264_s19 }
  0x11   : > { %1505 = vmatprep.mubr.f32.mxu0 %v2080_v11  ;;  %1736 = vmatpush3.bf16.msra.mxu0 %v1733_v8  ;;  %v376_v48 = vrot.slane %v2080_v11, 7  ;;  %v386_v51 = vld [vmem:[%s2457_s1 + $0x20] sm:$0xff]  ;;  %v387_v52 = vld [vmem:[%s2457_s1 + $0x28] sm:$0xff]  ;;  %v389_v56 = vld [vmem:[%s2457_s1 + $0x38] sm:$0xff]  ;;  %v377_v8 = vrot.slane %v2156_v47, 7  ;;  %v566_v10 = vrot.slane %v2080_v11, 1 }
  0x12   : > { %1738 = vmatprep.subr.bf16.mxu0 %v1737_v12  ;;  %1828 = vmatpush3.bf16.msra.mxu1 %v1825_v26  ;;  %v1765_v54 = vpack.c.bf16 %v387_v52, %v386_v51  ;;  %v1769_v57 = vpack.c.bf16 %v389_v56, %v388_v55  ;;  %v390_v58 = vld [vmem:[%s2457_s1 + $0x40] sm:$0xff]  ;;  %v391_v59 = vld [vmem:[%s2457_s1 + $0x48] sm:$0xff]  ;;  %v392_v61 = vld [vmem:[%s2457_s1 + $0x50] sm:$0xff] }
  0x13   : > { %1830 = vmatprep.subr.bf16.mxu1 %v1829_v32  ;;  %v1773_v60 = vpack.c.bf16 %v391_v59, %v390_v58  ;;  %v393_v62 = vld [vmem:[%s2457_s1 + $0x58] sm:$0xff]  ;;  %v394_v0 = vld [vmem:[%s2457_s1 + $0x60] sm:$0xff]  ;;  %v395_v1 = vld [vmem:[%s2457_s1 + $0x68] sm:$0xff] }
  0x14   : > { %v1777_v63 = vpack.c.bf16 %v393_v62, %v392_v61  ;;  %v1781_v2 = vpack.c.bf16 %v395_v1, %v394_v0  ;;  %v396_v3 = vld [vmem:[%s2457_s1 + $0x70] sm:$0xff]  ;;  %v397_v4 = vld [vmem:[%s2457_s1 + $0x78] sm:$0xff]  ;;  %v1283_v6 = vld [vmem:[%s2457_s1 + $0x100] sm:$0xff] }
  0x15   : > { %1740 = vmatpush3.bf16.msra.mxu0 %v1737_v12  ;;  %v1785_v5 = vpack.c.bf16 %v397_v4, %v396_v3  ;;  %v1284_v7 = vld [vmem:[%s2457_s1 + $0x108] sm:$0xff]  ;;  %v567_v12 = vrot.slane %v2156_v47, 1  ;;  %v1285_v13 = vld [vmem:[%s2457_s1 + $0x110] sm:$0xff]  ;;  %v1286_v14 = vld [vmem:[%s2457_s1 + $0x118] sm:$0xff] }
  0x16   : > { %1742 = vmatprep.subr.bf16.mxu0 %v1741_v15  ;;  %1832 = vmatpush3.bf16.msra.mxu1 %v1829_v32  ;;  %v1789_v9 = vpack.c.bf16 %v1284_v7, %v1283_v6  ;;  %v1793_v16 = vpack.c.bf16 %v1286_v14, %v1285_v13  ;;  %v1288_v19 = vld [vmem:[%s2457_s1 + $0x128] sm:$0xff]  ;;  %v1289_v21 = vld [vmem:[%s2457_s1 + $0x130] sm:$0xff]  ;;  %v1290_v22 = vld [vmem:[%s2457_s1 + $0x138] sm:$0xff] }
  0x17   : > { %1834 = vmatprep.subr.bf16.mxu1 %v1833_v38  ;;  %v568_v17 = vsel %vm565_vm2, %v566_v10, %v567_v12  ;;  %v1801_v23 = vpack.c.bf16 %v1290_v22, %v1289_v21  ;;  %v1291_v24 = vld [vmem:[%s2457_s1 + $0x140] sm:$0xff]  ;;  %v1292_v25 = vld [vmem:[%s2457_s1 + $0x148] sm:$0xff]  ;;  %v1293_v27 = vld [vmem:[%s2457_s1 + $0x150] sm:$0xff] }
  0x18   : > { %v1805_v26 = vpack.c.bf16 %v1292_v25, %v1291_v24  ;;  %v1294_v28 = vld [vmem:[%s2457_s1 + $0x158] sm:$0xff]  ;;  %v1295_v30 = vld [vmem:[%s2457_s1 + $0x160] sm:$0xff]  ;;  %v1296_v31 = vld [vmem:[%s2457_s1 + $0x168] sm:$0xff] }
  0x19   : > { %1744 = vmatpush3.bf16.msra.mxu0 %v1741_v15  ;;  %v378_v15 = vsel %vm375_vm0, %v376_v48, %v377_v8  ;;  %v1813_v32 = vpack.c.bf16 %v1296_v31, %v1295_v30  ;;  %v1297_v33 = vld [vmem:[%s2457_s1 + $0x170] sm:$0xff]  ;;  %v1298_v34 = vld [vmem:[%s2457_s1 + $0x178] sm:$0xff]  ;;  %v1314_v36 = vld [vmem:[%s2460_s4 + $0xe0] sm:$0xff] }
  0x1a   : > { %1746 = vmatprep.subr.bf16.mxu0 %v1745_v18  ;;  %1836 = vmatpush3.bf16.msra.mxu1 %v1833_v38  ;;  %v1315_v37 = vld [vmem:[%s2460_s4 + $0xe8] sm:$0xff]  ;;  %v1316_v39 = vld [vmem:[%s2460_s4 + $0xf0] sm:$0xff]  ;;  %v1317_v40 = vld [vmem:[%s2460_s4 + $0xf8] sm:$0xff] }
  0x1b   : > { %1838 = vmatprep.subr.bf16.mxu1 %v1837_v44  ;;  %v1845_v38 = vpack.c.bf16 %v1315_v37, %v1314_v36  ;;  %v694_v42 = vld [vmem:[%s2460_s4] sm:$0xff]  ;;  %v695_v43 = vld [vmem:[%s2460_s4 + $0x8] sm:$0xff]  ;;  %v1004_v51 = vld [vmem:[%s2464_s8 + $0x18] sm:$0xff] }
  0x1c   : > { %v1001_v45 = vld [vmem:[%s2464_s8] sm:$0xff]  ;;  %v1002_v46 = vld [vmem:[%s2464_s8 + $0x8] sm:$0xff]  ;;  %v1007_v56 = vld [vmem:[%s2464_s8 + $0x30] sm:$0xff] }
  0x1d   : > { %1748 = vmatpush3.bf16.msra.mxu0 %v1745_v18  ;;  %v1287_v18 = vld [vmem:[%s2457_s1 + $0x120] sm:$0xff]  ;;  %v1011_v62 = vld [vmem:[%s2464_s8 + $0x50] sm:$0xff]  ;;  %v697_v10 = vld [vmem:[%s2460_s4 + $0x18] sm:$0xff] }
  0x1e   : > { %1750 = vmatprep.subr.bf16.mxu0 %v1749_v29  ;;  %1840 = vmatpush3.bf16.msra.mxu1 %v1837_v44  ;;  %v1797_v20 = vpack.c.bf16 %v1288_v19, %v1287_v18  ;;  %v1853_v44 = vpack.c.bf16 %v695_v43, %v694_v42  ;;  %v1009_v59 = vld [vmem:[%s2464_s8 + $0x40] sm:$0xff]  ;;  %v699_v19 = vld [vmem:[%s2460_s4 + $0x28] sm:$0xff]  ;;  %v700_v24 = vld [vmem:[%s2460_s4 + $0x30] sm:$0xff] }
  0x1f   : > { %1842 = vmatprep.subr.bf16.mxu1 %v1841_v53  ;;  %v1300_v1 = vld [vmem:[%s2458_s2] ss:$0 sm:$0xff]  ;;  %v701_v25 = vld [vmem:[%s2460_s4 + $0x38] sm:$0xff] }
  0x20   : > { %v1301_v3 = vld [vmem:[%s2459_s3] ss:$0 sm:$0xff]  ;;  %v1865_v50 = vpack.c.bf16 %v701_v25, %v700_v24  ;;  %v705_v30 = vld [vmem:[%s2460_s4 + $0x58] sm:$0xff] }
  0x21   : > { %1752 = vmatpush3.bf16.msra.mxu0 %v1749_v29  ;;  %v1809_v29 = vpack.c.bf16 %v1294_v28, %v1293_v27  ;;  %v698_v18 = vld [vmem:[%s2460_s4 + $0x20] sm:$0xff]  ;;  %v703_v27 = vld [vmem:[%s2460_s4 + $0x48] sm:$0xff]  ;;  %v709_v36 = vld [vmem:[%s2460_s4 + $0x78] sm:$0xff] }
  0x22   : > { %1754 = vmatprep.subr.bf16.mxu0 %v1753_v35  ;;  %1844 = vmatpush3.bf16.msra.mxu1 %v1841_v53  ;;  %v1005_v53 = vld [vmem:[%s2464_s8 + $0x20] sm:$0xff]  ;;  %v1323_v42 = vld [vmem:[%s2460_s4 + $0x118] sm:$0xff] }
  0x23   : > { %1846 = vmatprep.subr.bf16.mxu1 %v1845_v38 }
  0x25   : > { %1756 = vmatpush3.bf16.msra.mxu0 %v1753_v35  ;;  %v1817_v35 = vpack.c.bf16 %v1298_v34, %v1297_v33  ;;  %v707_v33 = vld [vmem:[%s2460_s4 + $0x68] sm:$0xff] }
  0x26   : > { %1758 = vmatprep.subr.bf16.mxu0 %v1757_v41  ;;  %1848 = vmatpush3.bf16.msra.mxu1 %v1845_v38  ;;  %v1320_v38 = vld [vmem:[%s2460_s4 + $0x100] sm:$0xff] }
  0x28   : > { %1506 = vmatmul.mubr.f32.vlgmr.msra.gmra.mrb[0].mxu0 %v2156_v47 }
  0x29   : > { %1760 = vmatpush3.bf16.msra.mxu0 %v1757_v41  ;;  %1540 = vmatprep.mubr.msk.f32.mxu0 %vm2160_vm1, %v376_v48  ;;  %v1849_v41 = vpack.c.bf16 %v1317_v40, %v1316_v39  ;;  %v1003_v48 = vld [vmem:[%s2464_s8 + $0x10] sm:$0xff]  ;;  %v1321_v39 = vld [vmem:[%s2460_s4 + $0x108] sm:$0xff] }
  0x2a   : > { %1762 = vmatprep.subr.bf16.mxu0 %v1761_v49  ;;  %v1921_v52 = vpack.c.bf16 %v1004_v51, %v1003_v48  ;;  %v1885_v40 = vpack.c.bf16 %v1321_v39, %v1320_v38  ;;  %v1326_v48 = vld [vmem:[%s2460_s4 + $0x130] sm:$0xff] }
  0x2b   : > { %1850 = vmatprep.subr.bf16.mxu1 %v1849_v41 }
  0x2c   : > { %1852 = vmatpush3.bf16.msra.mxu1 %v1849_v41  ;;  %v1322_v41 = vld [vmem:[%s2460_s4 + $0x110] sm:$0xff] }
  0x2d   : > { %1764 = vmatpush3.bf16.msra.mxu0 %v1761_v49  ;;  %1854 = vmatprep.subr.bf16.mxu1 %v1853_v44  ;;  %v1917_v49 = vpack.c.bf16 %v1002_v46, %v1001_v45  ;;  %v1889_v43 = vpack.c.bf16 %v1323_v42, %v1322_v41  ;;  %v1325_v45 = vld [vmem:[%s2460_s4 + $0x128] sm:$0xff] }
  0x2e   : > { %1766 = vmatprep.subr.bf16.mxu0 %v1765_v54 }
  0x31   : > { %1768 = vmatpush3.bf16.msra.mxu0 %v1765_v54  ;;  %v1006_v54 = vld [vmem:[%s2464_s8 + $0x28] sm:$0xff] }
  0x32   : > { %1770 = vmatprep.subr.bf16.mxu0 %v1769_v57  ;;  %v1925_v55 = vpack.c.bf16 %v1006_v54, %v1005_v53  ;;  %v1329_v53 = vld [vmem:[%s2460_s4 + $0x148] sm:$0xff] }
  0x35   : > { %1772 = vmatpush3.bf16.msra.mxu0 %v1769_v57  ;;  %v1008_v57 = vld [vmem:[%s2464_s8 + $0x38] sm:$0xff] }
  0x36   : > { %1774 = vmatprep.subr.bf16.mxu0 %v1773_v60  ;;  %v1929_v58 = vpack.c.bf16 %v1008_v57, %v1007_v56  ;;  %v1331_v56 = vld [vmem:[%s2460_s4 + $0x158] sm:$0xff] }
  0x39   : > { %1776 = vmatpush3.bf16.msra.mxu0 %v1773_v60  ;;  %v1010_v60 = vld [vmem:[%s2464_s8 + $0x48] sm:$0xff] }
  0x3a   : > { %1778 = vmatprep.subr.bf16.mxu0 %v1777_v63  ;;  %v1933_v61 = vpack.c.bf16 %v1010_v60, %v1009_v59  ;;  %v1333_v59 = vld [vmem:[%s2460_s4 + $0x168] sm:$0xff] }
  0x3d   : > { %1780 = vmatpush3.bf16.msra.mxu0 %v1777_v63  ;;  %v1012_v63 = vld [vmem:[%s2464_s8 + $0x58] sm:$0xff] }
  0x3e   : > { %1782 = vmatprep.subr.bf16.mxu0 %v1781_v2  ;;  %v1937_v0 = vpack.c.bf16 %v1012_v63, %v1011_v62  ;;  %v1335_v62 = vld [vmem:[%s2460_s4 + $0x178] sm:$0xff] }
  0x41   : > { %1784 = vmatpush3.bf16.msra.mxu0 %v1781_v2 }
  0x42   : > { %1786 = vmatprep.subr.bf16.mxu0 %v1785_v5 }
  0x45   : > { %1788 = vmatpush3.bf16.msra.mxu0 %v1785_v5 }
  0x46   : > { %1790 = vmatprep.subr.bf16.mxu0 %v1789_v9 }
  0x48   : > { %1541 = vmatmul.mubr.f32.vlgmr.msra.gmra.mrb[0].mxu0 %v378_v15 }
  0x49   : > { %1792 = vmatpush3.bf16.msra.mxu0 %v1789_v9  ;;  %1575 = vmatprep.mubr.f32.mxu0 %v568_v17  ;;  %v696_v9 = vld [vmem:[%s2460_s4 + $0x10] sm:$0xff] }
  0x4a   : > { %1794 = vmatprep.subr.bf16.mxu0 %v1793_v16  ;;  %v1857_v15 = vpack.c.bf16 %v697_v10, %v696_v9 }
  0x4d   : > { %1796 = vmatpush3.bf16.msra.mxu0 %v1793_v16 }
  0x4e   : > { %1798 = vmatprep.subr.bf16.mxu0 %v1797_v20 }
  0x51   : > { %1800 = vmatpush3.bf16.msra.mxu0 %v1797_v20 }
  0x52   : > { %1802 = vmatprep.subr.bf16.mxu0 %v1801_v23 }
  0x55   : > { %1804 = vmatpush3.bf16.msra.mxu0 %v1801_v23  ;;  %v1861_v23 = vpack.c.bf16 %v699_v19, %v698_v18  ;;  %v1979_v19 = vmov 0.0|0.0  }
  0x56   : > { %1806 = vmatprep.subr.bf16.mxu0 %v1805_v26 }
  0x59   : > { %1808 = vmatpush3.bf16.msra.mxu0 %v1805_v26  ;;  %v702_v26 = vld [vmem:[%s2460_s4 + $0x40] sm:$0xff] }
  0x5a   : > { %1810 = vmatprep.subr.bf16.mxu0 %v1809_v29  ;;  %v1869_v28 = vpack.c.bf16 %v703_v27, %v702_v26 }
  0x5d   : > { %1812 = vmatpush3.bf16.msra.mxu0 %v1809_v29  ;;  %v704_v29 = vld [vmem:[%s2460_s4 + $0x50] sm:$0xff] }
  0x5e   : > { %1814 = vmatprep.subr.bf16.mxu0 %v1813_v32  ;;  %v1873_v31 = vpack.c.bf16 %v705_v30, %v704_v29 }
  0x61   : > { %1816 = vmatpush3.bf16.msra.mxu0 %v1813_v32  ;;  %v706_v32 = vld [vmem:[%s2460_s4 + $0x60] sm:$0xff] }
  0x62   : > { %1818 = vmatprep.subr.bf16.mxu0 %v1817_v35  ;;  %v1877_v34 = vpack.c.bf16 %v707_v33, %v706_v32 }
  0x65   : > { %1820 = vmatpush3.bf16.msra.mxu0 %v1817_v35  ;;  %v708_v35 = vld [vmem:[%s2460_s4 + $0x70] sm:$0xff] }
  0x66   : > { %1918 = vmatprep.subr.bf16.mxu0 %v1917_v49  ;;  %v1881_v37 = vpack.c.bf16 %v709_v36, %v708_v35 }
  0x68   : > { %1576 = vmatmul.mubr.msk.f32.vlgmr.msra.gmra.mrb[0].mxu0 %vm565_vm2, %v567_v12 }
  0x69   : > { %1920 = vmatpush3.bf16.msra.mxu0 %v1917_v49  ;;  %v1327_v49 = vld [vmem:[%s2460_s4 + $0x138] sm:$0xff] }
  0x6a   : > { %1922 = vmatprep.subr.bf16.mxu0 %v1921_v52  ;;  %v1897_v51 = vpack.c.bf16 %v1327_v49, %v1326_v48 }
  0x6d   : > { %1924 = vmatpush3.bf16.msra.mxu0 %v1921_v52  ;;  %v1328_v52 = vld [vmem:[%s2460_s4 + $0x140] sm:$0xff] }
  0x6e   : > { %1926 = vmatprep.subr.bf16.mxu0 %v1925_v55  ;;  %v1901_v54 = vpack.c.bf16 %v1329_v53, %v1328_v52 }
  0x71   : > { %1928 = vmatpush3.bf16.msra.mxu0 %v1925_v55  ;;  %v1330_v55 = vld [vmem:[%s2460_s4 + $0x150] sm:$0xff] }
  0x72   : > { %1930 = vmatprep.subr.bf16.mxu0 %v1929_v58  ;;  %v1905_v57 = vpack.c.bf16 %v1331_v56, %v1330_v55 }
  0x75   : > { %1932 = vmatpush3.bf16.msra.mxu0 %v1929_v58  ;;  %v1332_v58 = vld [vmem:[%s2460_s4 + $0x160] sm:$0xff] }
  0x76   : > { %1934 = vmatprep.subr.bf16.mxu0 %v1933_v61  ;;  %v1909_v60 = vpack.c.bf16 %v1333_v59, %v1332_v58 }
  0x79   : > { %1936 = vmatpush3.bf16.msra.mxu0 %v1933_v61  ;;  %v1334_v61 = vld [vmem:[%s2460_s4 + $0x170] sm:$0xff] }
  0x7a   : > { %1938 = vmatprep.subr.bf16.mxu0 %v1937_v0  ;;  %v1913_v63 = vpack.c.bf16 %v1335_v62, %v1334_v61 }
  0x7d   : > { %1940 = vmatpush3.bf16.msra.mxu0 %v1937_v0  ;;  %v1013_v0 = vld [vmem:[%s2464_s8 + $0x60] sm:$0xff] }
 0x13b   : > { %v1577_v2 = vpop.f32.mrb[0].mxu0 }
 0x13c   : > { %v674_v4 = vmul.f32 %v1577_v2, %v1300_v1  ;;  %v655_v5 = vpop.f32.mrb[1].mxu0 }
 0x13d   : > { %v673_v6 = vmul.f32 %v1300_v1, %v655_v5  ;;  %v1014_v1 = vld [vmem:[%s2464_s8 + $0x68] sm:$0xff] }
 0x13e   : > { %v683_v7 = vadd.f32 %v1301_v3, %v674_v4  ;;  %v1941_v2 = vpack.c.bf16 %v1014_v1, %v1013_v0  ;;  %v1016_v4 = vld [vmem:[%s2464_s8 + $0x78] sm:$0xff] }
 0x13f   : > { %v682_v8 = vadd.f32 %v1301_v3, %v673_v6  ;;  %v1015_v3 = vld [vmem:[%s2464_s8 + $0x70] sm:$0xff]  ;;  %v1337_v6 = vld [vmem:[%s2461_s5] ss:$0 sm:$0xff] }
 0x140   : > { %v2323_v12 = vmax.f32 %v683_v7, 0.0  ;;  %1942 = vmatprep.subr.bf16.mxu0 %v1941_v2  ;;  %v1945_v5 = vpack.c.bf16 %v1016_v4, %v1015_v3 }
 0x141   : > { %v684_v13 = vmax.f32 %v682_v8, 0.0  ;;  %1944 = vmatpush3.bf16.msra.mxu0 %v1941_v2  ;;  %v1338_v8 = vld [vmem:[%s2462_s6] ss:$0 sm:$0xff] }
 0x142   : > { %v689_v14 = vrot.slane %v2323_v12, 7  ;;  %v878_v16 = vrot.slane %v2323_v12, 1  ;;  %1946 = vmatprep.subr.bf16.mxu0 %v1945_v5 }
 0x143   : > { %1610 = vmatprep.mubr.f32.mxu1 %v684_v13  ;;  %v688_v17 = vrot.slane %v684_v13, 7  ;;  %v877_v20 = vrot.slane %v684_v13, 1 }
 0x144   : > { %1611 = vmatmul.mubr.f32.vlgmr.msra.gmra.mrb[0].mxu1 %v2323_v12 }
 0x145   : > { %1856 = vmatpush3.bf16.msra.mxu1 %v1853_v44  ;;  %1645 = vmatprep.mubr.msk.f32.mxu1 %vm2160_vm1, %v688_v17  ;;  %v690_v21 = vsel %vm375_vm0, %v688_v17, %v689_v14  ;;  %v879_v22 = vsel %vm565_vm2, %v877_v20, %v878_v16  ;;  %v1324_v44 = vld [vmem:[%s2460_s4 + $0x120] sm:$0xff]  ;;  %v1981_v20 = vmov 0.0  }
 0x146   : > { %1858 = vmatprep.subr.bf16.mxu1 %v1857_v15  ;;  %v1893_v46 = vpack.c.bf16 %v1325_v45, %v1324_v44  ;;  %1948 = vmatpush3.bf16.msra.mxu0 %v1945_v5 }
 0x149   : > { %1860 = vmatpush3.bf16.msra.mxu1 %v1857_v15 }
 0x14a   : > { %1862 = vmatprep.subr.bf16.mxu1 %v1861_v23 }
 0x14d   : > { %1864 = vmatpush3.bf16.msra.mxu1 %v1861_v23 }
 0x14e   : > { %1866 = vmatprep.subr.bf16.mxu1 %v1865_v50 }
 0x151   : > { %1868 = vmatpush3.bf16.msra.mxu1 %v1865_v50 }
 0x152   : > { %1870 = vmatprep.subr.bf16.mxu1 %v1869_v28 }
 0x155   : > { %1872 = vmatpush3.bf16.msra.mxu1 %v1869_v28 }
 0x156   : > { %1874 = vmatprep.subr.bf16.mxu1 %v1873_v31 }
 0x159   : > { %1876 = vmatpush3.bf16.msra.mxu1 %v1873_v31 }
 0x15a   : > { %1878 = vmatprep.subr.bf16.mxu1 %v1877_v34 }
 0x15d   : > { %1880 = vmatpush3.bf16.msra.mxu1 %v1877_v34 }
 0x15e   : > { %1882 = vmatprep.subr.bf16.mxu1 %v1881_v37 }
 0x161   : > { %1884 = vmatpush3.bf16.msra.mxu1 %v1881_v37 }
 0x162   : > { %1886 = vmatprep.subr.bf16.mxu1 %v1885_v40 }
 0x164   : > { %1646 = vmatmul.mubr.f32.vlgmr.msra.gmra.mrb[0].mxu1 %v690_v21 }
 0x165   : > { %1888 = vmatpush3.bf16.msra.mxu1 %v1885_v40  ;;  %1680 = vmatprep.mubr.f32.mxu1 %v879_v22 }
 0x166   : > { %1890 = vmatprep.subr.bf16.mxu1 %v1889_v43 }
 0x169   : > { %1892 = vmatpush3.bf16.msra.mxu1 %v1889_v43 }
 0x16a   : > { %1894 = vmatprep.subr.bf16.mxu1 %v1893_v46 }
 0x16d   : > { %1896 = vmatpush3.bf16.msra.mxu1 %v1893_v46 }
 0x16e   : > { %1898 = vmatprep.subr.bf16.mxu1 %v1897_v51 }
 0x171   : > { %1900 = vmatpush3.bf16.msra.mxu1 %v1897_v51 }
 0x172   : > { %1902 = vmatprep.subr.bf16.mxu1 %v1901_v54 }
 0x175   : > { %1904 = vmatpush3.bf16.msra.mxu1 %v1901_v54 }
 0x176   : > { %1906 = vmatprep.subr.bf16.mxu1 %v1905_v57 }
 0x179   : > { %1908 = vmatpush3.bf16.msra.mxu1 %v1905_v57 }
 0x17a   : > { %1910 = vmatprep.subr.bf16.mxu1 %v1909_v60 }
 0x17d   : > { %1912 = vmatpush3.bf16.msra.mxu1 %v1909_v60 }
 0x17e   : > { %1914 = vmatprep.subr.bf16.mxu1 %v1913_v63 }
 0x181   : > { %1916 = vmatpush3.bf16.msra.mxu1 %v1913_v63 }
 0x182   : > { %1949 = vmatprep.subr.bf16.mxu1 %v1979_v19 }
 0x184   : > { %1681 = vmatmul.mubr.msk.f32.vlgmr.msra.gmra.mrb[0].mxu1 %vm565_vm2, %v878_v16 }
 0x185   : > { %1722 = vmatprep.mubr.msk.f32.mxu1 %vm1980_vm3, %v1981_v20 }
 0x257   : > { %v1682_v7 = vpop.f32.mrb[0].mxu1 }
 0x258   : > { %v985_v9 = vmul.f32 %v1682_v7, %v1337_v6  ;;  %v966_v10 = vpop.f32.mrb[1].mxu1 }
 0x259   : > { %v984_v12 = vmul.f32 %v1337_v6, %v966_v10 }
 0x25a   : > { %v994_v13 = vadd.f32 %v1338_v8, %v985_v9 }
 0x25b   : > { %v993_v14 = vadd.f32 %v1338_v8, %v984_v12 }
 0x25c   : > { %v996_v15 = vmax.f32 %v994_v13, 0.0 }
 0x25d   : > { %v995_v16 = vmax.f32 %v993_v14, 0.0 }
 0x25e   : > { %v998_v17 = vadd.f32 %v996_v15, %v2156_v47  ;;  %v1092_v47 = vld [vmem:[%s2463_s7] sm:$0xff] }
 0x25f   : > { %v997_v18 = vadd.f32 %v995_v16, %v2080_v11 }
 0x260   : > { %1000 = vst [vmem:[%s366_s17 + $0x8] sm:$0xff] %v998_v17 }
 0x261   : > { %999 = vst [vmem:[%s366_s17] sm:$0xff] %v997_v18  ;;  %1715 = vmatprep.mubr.f32.mxu0 %v997_v18 }
 0x262   : > { %1716 = vmatmul.mubr.f32.vlgmr.msra.gmra.mrb[2].mxu0 %v998_v17 }
 0x335   : > { %v1717_v21 = vpop.f32.mrb[2].mxu0 }
 0x336   : > { %v1083_v22 = vpop.f32.mrb[3].mxu0 }
 0x337   : > { %v1950_v23 = vpack.c.bf16 %v1717_v21, %v1083_v22 }
 0x339   : > { %1951 = vmatpush3.bf16.msra.mxu1 %v1950_v23 }
 0x33c   : > { %1723 = vmatmul.mubr.msk.f32.vlgmr.msra.gmra.mrb[2].mxu1 %vm1093_vm4, %v1092_v47 }
 0x40f   : > { %v1163_v11 = vpop.f32.mrb[2].mxu1 }
 0x410   : > { %1168 = vst.msk [vmem:[%s370_s21] sm:$0xff] %vm1167_vm5, %v1163_v11  ;;  %v1724_v24 = vpop.f32.mrb[3].mxu1 }
 0x411 PF: > { %s21_s13 = sadd.s32 1, %s1977_s13  }
 0x412   : > { %p18_p4 = scmp.ge.s32.totalorder %s21_s13, 4  }
 0x414   :  { %20 = sbr.rel (!%p18_p4) target bundleno = 1 (0x1), region = 102 }

// kernel: tile.158
= control target key start
LH: loop header
LB: loop body
LE: loop exit
PB: predicated region body
PF: predicated region fallthrough
CT: control target
= control target key end

     0   :  { %s22_s0 = inlined_call_operand.vmem [shape: f32[16], index: 0, kind: input, shape index: {}]   ;;  %s23_s1 = inlined_call_operand.vmem [shape: f32[8,16], index: 1, kind: output, shape index: {}]  }
   0x1   :  { %v4_v0 = vld [vmem:[%s22_s0] ss:$0 sm:$0xff] }
   0x2   :  { %5 = vst [vmem:[%s23_s1] sm:$0xff] %v4_v0 }

// kernel: tile.159
= control target key start
LH: loop header
LB: loop body
LE: loop exit
PB: predicated region body
PF: predicated region fallthrough
CT: control target
= control target key end

     0   :  { %s67_s10 = smov 112   ;;  %s68_s11 = smov 80   ;;  %vm3_vm0 = vcmask 130048   ;;  %vm9_vm1 = vcmask 1048448   ;;  %vm15_vm2 = vcmask 917248   ;;  %vm21_vm3 = vcmask 786048   ;;  %s111_s0 = inlined_call_operand.vmem [shape: f32[8,16], index: 0, kind: input, shape index: {}]   ;;  %s112_s1 = inlined_call_operand.vmem [shape: f32[1,128], index: 1, kind: output, shape index: {}]  }
   0x1   :  { %v53_v0 = vld [vmem:[%s111_s0 + $0x7] sm:$0x1]   ;;  %v55_v1 = vld [vmem:[%s111_s0 + $0x5] sm:$0x1]   ;;  %v54_v2 = vld [vmem:[%s111_s0 + $0x6] sm:$0x1]  }
   0x2   :  { %7 = vrot.lane.b32.xlu0 %v53_v0, %s67_s10  ;;  %19 = vrot.lane.b32.xlu1 %v55_v1, %s68_s11  ;;  %v56_v3 = vld [vmem:[%s111_s0 + $0x4] sm:$0x1]   ;;  %v2_v4 = vld [vmem:[%s111_s0] sm:$0x1]   ;;  %s69_s18 = smov 96   ;;  %s70_s19 = smov 64  }
   0x3   :  { %4 = vst.msk [vmem:[#allocation0] sm:$0x1] %vm3_vm0, %v2_v4   ;;  %v57_v5 = vld [vmem:[%s111_s0 + $0x3] sm:$0x1]   ;;  %v58_v6 = vld [vmem:[%s111_s0 + $0x2] sm:$0x1]  }
   0x4   :  { %s71_s24 = smov 48   ;;  %s72_s25 = smov 32   ;;  %v59_v7 = vld [vmem:[%s111_s0 + $0x1] sm:$0x1]   ;;  %vm27_vm4 = vcmask 654848   ;;  %vm33_vm5 = vcmask 523648  }
   0x5   :  { %s73_s0 = smov 16   ;;  %vm39_vm6 = vcmask 392448   ;;  %vm45_vm7 = vcmask 261248  }
   0x6   :  { %13 = vrot.lane.b32.xlu0 %v54_v2, %s69_s18  ;;  %25 = vrot.lane.b32.xlu1 %v56_v3, %s70_s19 }
   0xa   :  { %31 = vrot.lane.b32.xlu0 %v57_v5, %s71_s24  ;;  %37 = vrot.lane.b32.xlu1 %v58_v6, %s72_s25 }
   0xe   :  { %43 = vrot.lane.b32.xlu0 %v59_v7, %s73_s0 }
  0x74   :  { %v8_v8 = vpop.permute.xlu0 %7   ;;  %v20_v9 = vpop.permute.xlu1 %19  }
  0x75   :  { %10 = vst.msk [vmem:[#allocation0] sm:$0x1] %vm9_vm1, %v8_v8  }
  0x78   :  { %v14_v10 = vpop.permute.xlu0 %13   ;;  %v26_v11 = vpop.permute.xlu1 %25  }
  0x79   :  { %16 = vst.msk [vmem:[#allocation0] sm:$0x1] %vm15_vm2, %v14_v10  }
  0x7a   :  { %22 = vst.msk [vmem:[#allocation0] sm:$0x1] %vm21_vm3, %v20_v9  }
  0x7b   :  { %28 = vst.msk [vmem:[#allocation0] sm:$0x1] %vm27_vm4, %v26_v11  }
  0x7c   :  { %v32_v12 = vpop.permute.xlu0 %31   ;;  %v38_v13 = vpop.permute.xlu1 %37  }
  0x7d   :  { %34 = vst.msk [vmem:[#allocation0] sm:$0x1] %vm33_vm5, %v32_v12  }
  0x7e   :  { %40 = vst.msk [vmem:[#allocation0] sm:$0x1] %vm39_vm6, %v38_v13  }
  0x80   :  { %v44_v14 = vpop.permute.xlu0 %43  }
  0x81   :  { %46 = vst.msk [vmem:[#allocation0] sm:$0x1] %vm45_vm7, %v44_v14  }
  0x88   :  { %v50_v15 = vld [vmem:[#allocation0] sm:$0x1] }
  0x89   :  { %52 = vst [vmem:[%s112_s1] sm:$0x1] %v50_v15 }

// kernel: encoder_forward.6
= control target key start
LH: loop header
LB: loop body
LE: loop exit
PB: predicated region body
PF: predicated region fallthrough
CT: control target
= control target key end

     0   :  { %s1564_s30 = smov 0   ;;  %s1916_s0 = inlined_call_operand.vmem [shape: f32[2,8,64], index: 0, kind: input, shape index: {}]   ;;  %s1917_s1 = inlined_call_operand.vmem [shape: f32[3,64,128], index: 1, kind: input, shape index: {}]   ;;  %s1918_s2 = inlined_call_operand.vmem [shape: f32[1,128], index: 2, kind: input, shape index: {}]   ;;  %s1919_s3 = inlined_call_operand.vmem [shape: f32[1,128], index: 3, kind: input, shape index: {}]   ;;  %s1920_s4 = inlined_call_operand.vmem [shape: f32[3,128,128], index: 4, kind: input, shape index: {}]   ;;  %s1921_s5 = inlined_call_operand.vmem [shape: f32[1,128], index: 5, kind: input, shape index: {}]   ;;  %s1922_s6 = inlined_call_operand.vmem [shape: f32[1,128], index: 6, kind: input, shape index: {}]   ;;  %s1923_s7 = inlined_call_operand.vmem [shape: f32[64,128], index: 7, kind: input, shape index: {}]   ;;  %s1924_s8 = inlined_call_operand.vmem [shape: f32[1,128], index: 8, kind: input, shape index: {}]   ;;  %s1925_s9 = inlined_call_operand.vmem [shape: f32[2,8,128], index: 9, kind: output, shape index: {}]  }
   0x1 LB: > { %s1027_s10 = sadd.s32 4294967295, %s1509_s30   ;;  %p1031_p0 = scmp.ge.s32.totalorder %s1509_s30, 1  ;;  %s1509_s30 = sphi %s1564_s30, %s19_s30  }
   0x2   : > { %p286_p1 = scmp.lt.s32.totalorder %s1509_s30, 3 }
   0x4   : > { %p287_p2 = pnand %p1031_p0, %p286_p1 }
   0x5   : > { %v1034_v0 = vld [vmem:[%s1917_s1 + $0x40] sm:$0xff] (!%p287_p2)  ;;  %v1035_v1 = vld [vmem:[%s1917_s1 + $0x48] sm:$0xff] (!%p287_p2)  ;;  %v1036_v2 = vld [vmem:[%s1917_s1 + $0x50] sm:$0xff] (!%p287_p2)  ;;  %v1511_v3 = vmov (!%p287_p2), 0.0|0.0   ;;  %vm1512_vm0 = vmmov (!%p287_p2), 0   ;;  %v1513_v6 = vmov (!%p287_p2), 0.0  }
   0x6   : > { %290 = sbr.rel (%p287_p2) target bundleno = 560 (0x230), region = 56  ;;  %1364 = vmatprep.subr.bf16.mxu0 (!%p287_p2), %v1511_v3  ;;  %v1365_v4 = vpack.c.bf16 (!%p287_p2), %v1035_v1, %v1034_v0  ;;  %v1037_v5 = vld [vmem:[%s1917_s1 + $0x58] sm:$0xff] (!%p287_p2)  ;;  %1199 = vmatprep.mubr.msk.f32.mxu0 (!%p287_p2), %vm1512_vm0, %v1513_v6  ;;  %p320_p3 = scmp.lt.s32.totalorder (!%p287_p2), %s1027_s10, 1  ;;  %v1038_v8 = vld [vmem:[%s1917_s1 + $0x60] sm:$0xff] (!%p287_p2)  ;;  %v1039_v9 = vld [vmem:[%s1917_s1 + $0x68] sm:$0xff] (!%p287_p2)  ;;  %vm351_vm1 = vcmask (!%p287_p2), 523264  }
   0x7   : > { %1400 = vmatprep.subr.bf16.mxu1 (!%p287_p2), %v1511_v3  ;;  %1272 = vmatprep.mubr.msk.f32.mxu1 (!%p287_p2), %vm1512_vm0, %v1513_v6  ;;  %v1368_v7 = vpack.c.bf16 (!%p287_p2), %v1037_v5, %v1036_v2  ;;  %v1371_v10 = vpack.c.bf16 (!%p287_p2), %v1039_v9, %v1038_v8  ;;  %v1040_v11 = vld [vmem:[%s1917_s1 + $0x70] sm:$0xff] (!%p287_p2)  ;;  %v1041_v12 = vld [vmem:[%s1917_s1 + $0x78] sm:$0xff] (!%p287_p2)  ;;  %v1055_v13 = vld [vmem:[%s1920_s4 + $0x80] sm:$0xff] (!%p287_p2)  ;;  %vm332_vm2 = vcmask (!%p287_p2), 1040384   ;;  %vm499_vm3 = vcmask (!%p287_p2), 1046528  }
   0x8   : > { %1366 = vmatpush3.bf16.msra.mxu0 (!%p287_p2), %v1365_v4  ;;  %v1056_v14 = vld [vmem:[%s1920_s4 + $0x88] sm:$0xff] (!%p287_p2)  ;;  %v1057_v16 = vld [vmem:[%s1920_s4 + $0x90] sm:$0xff] (!%p287_p2)  ;;  %v1058_v17 = vld [vmem:[%s1920_s4 + $0x98] sm:$0xff] (!%p287_p2)  ;;  %v1374_v18 = vpack.c.bf16 (!%p287_p2), %v1041_v12, %v1040_v11 }
   0x9   : > { %1367 = vmatprep.subr.bf16.mxu0 (!%p287_p2), %v1511_v3  ;;  %v1401_v15 = vpack.c.bf16 (!%p287_p2), %v1056_v14, %v1055_v13  ;;  %v1404_v19 = vpack.c.bf16 (!%p287_p2), %v1058_v17, %v1057_v16  ;;  %v334_v20 = vld [vmem:[%s1917_s1] sm:$0xff] (!%p287_p2)  ;;  %v335_v21 = vld [vmem:[%s1917_s1 + $0x8] sm:$0xff] (!%p287_p2)  ;;  %v336_v26 = vld [vmem:[%s1917_s1 + $0x10] sm:$0xff] (!%p287_p2) }
   0xa   : > { %v1059_v22 = vld [vmem:[%s1920_s4 + $0xa0] sm:$0xff] (!%p287_p2)  ;;  %v1060_v23 = vld [vmem:[%s1920_s4 + $0xa8] sm:$0xff] (!%p287_p2)  ;;  %v1377_v25 = vpack.c.bf16 (!%p287_p2), %v335_v21, %v334_v20  ;;  %v337_v27 = vld [vmem:[%s1917_s1 + $0x18] sm:$0xff] (!%p287_p2) }
   0xb   : > { %1402 = vmatpush3.bf16.msra.mxu1 (!%p287_p2), %v1401_v15  ;;  %v1407_v28 = vpack.c.bf16 (!%p287_p2), %v1060_v23, %v1059_v22  ;;  %v1061_v29 = vld [vmem:[%s1920_s4 + $0xb0] sm:$0xff] (!%p287_p2)  ;;  %v1062_v30 = vld [vmem:[%s1920_s4 + $0xb8] sm:$0xff] (!%p287_p2)  ;;  %v1380_v31 = vpack.c.bf16 (!%p287_p2), %v337_v27, %v336_v26  ;;  %v338_v32 = vld [vmem:[%s1917_s1 + $0x20] sm:$0xff] (!%p287_p2) }
   0xc   : > { %1369 = vmatpush3.bf16.msra.mxu0 (!%p287_p2), %v1368_v7  ;;  %1403 = vmatprep.subr.bf16.mxu1 (!%p287_p2), %v1511_v3  ;;  %v339_v33 = vld [vmem:[%s1917_s1 + $0x28] sm:$0xff] (!%p287_p2)  ;;  %v1410_v34 = vpack.c.bf16 (!%p287_p2), %v1062_v30, %v1061_v29  ;;  %v1063_v35 = vld [vmem:[%s1920_s4 + $0xc0] sm:$0xff] (!%p287_p2)  ;;  %v340_v38 = vld [vmem:[%s1917_s1 + $0x30] sm:$0xff] (!%p287_p2) }
   0xd   : > { %s1927_s10 = smov (!%p320_p3, %s1027_s10), 1  ;;  %1370 = vmatprep.subr.bf16.mxu0 %v1511_v3  ;;  %v1064_v36 = vld [vmem:[%s1920_s4 + $0xc8] sm:$0xff]  ;;  %v1383_v37 = vpack.c.bf16 %v339_v33, %v338_v32  ;;  %v341_v39 = vld [vmem:[%s1917_s1 + $0x38] sm:$0xff]  ;;  %v1065_v41 = vld [vmem:[%s1920_s4 + $0xd0] sm:$0xff] }
   0xe   : > { %s1032_s12 = sshll.u32 %s1927_s10, 3  ;;  %v1413_v40 = vpack.c.bf16 %v1064_v36, %v1063_v35  ;;  %v1066_v42 = vld [vmem:[%s1920_s4 + $0xd8] sm:$0xff]  ;;  %v1386_v44 = vpack.c.bf16 %v341_v39, %v340_v38  ;;  %v1044_v45 = vld [vmem:[%s1917_s1 + $0x80] sm:$0xff]  ;;  %v1045_v46 = vld [vmem:[%s1917_s1 + $0x88] sm:$0xff] }
   0xf   : > { %s323_s19 = scalar_lea.vmem %s1916_s0, %s1032_s12  ;;  %1405 = vmatpush3.bf16.msra.mxu1 %v1404_v19  ;;  %v1416_v47 = vpack.c.bf16 %v1066_v42, %v1065_v41  ;;  %v1067_v48 = vld [vmem:[%s1920_s4 + $0xe0] sm:$0xff]  ;;  %v1068_v49 = vld [vmem:[%s1920_s4 + $0xe8] sm:$0xff]  ;;  %v1389_v51 = vpack.c.bf16 %v1045_v46, %v1044_v45  ;;  %v1046_v52 = vld [vmem:[%s1917_s1 + $0x90] sm:$0xff]  ;;  %s327_s24 = scalar_lea.vmem %s1925_s9, %s1032_s12 }
  0x10   : > { %1372 = vmatpush3.bf16.msra.mxu0 %v1371_v10  ;;  %v1638_v24 = vld [vmem:[%s323_s19] sm:$0xff]  ;;  %1406 = vmatprep.subr.bf16.mxu1 %v1511_v3  ;;  %v1047_v53 = vld [vmem:[%s1917_s1 + $0x98] sm:$0xff]  ;;  %v1419_v54 = vpack.c.bf16 %v1068_v49, %v1067_v48  ;;  %v1049_v57 = vld [vmem:[%s1917_s1 + $0xa8] sm:$0xff] }
  0x11   : > { %1373 = vmatprep.subr.bf16.mxu0 %v1511_v3  ;;  %v330_v43 = vrot.slane %v1638_v24, 7  ;;  %v1392_v55 = vpack.c.bf16 %v1047_v53, %v1046_v52  ;;  %v1048_v56 = vld [vmem:[%s1917_s1 + $0xa0] sm:$0xff]  ;;  %v1050_v59 = vld [vmem:[%s1917_s1 + $0xb0] sm:$0xff]  ;;  %v1051_v60 = vld [vmem:[%s1917_s1 + $0xb8] sm:$0xff]  ;;  %v497_v61 = vrot.slane %v1638_v24, 1 }
  0x12   : > { %v1395_v58 = vpack.c.bf16 %v1049_v57, %v1048_v56  ;;  %v1398_v62 = vpack.c.bf16 %v1051_v60, %v1050_v59  ;;  %v1069_v0 = vld [vmem:[%s1920_s4 + $0xf0] sm:$0xff]  ;;  %v1070_v1 = vld [vmem:[%s1920_s4 + $0xf8] sm:$0xff]  ;;  %v886_v4 = vld [vmem:[%s1923_s7] sm:$0xff] }
  0x13   : > { %1408 = vmatpush3.bf16.msra.mxu1 %v1407_v28  ;;  %v333_v50 = vsel %vm332_vm2, 0.0, %v330_v43  ;;  %v500_v63 = vsel %vm499_vm3, %v497_v61, 0.0  ;;  %v1422_v2 = vpack.c.bf16 %v1070_v1, %v1069_v0  ;;  %v887_v5 = vld [vmem:[%s1923_s7 + $0x8] sm:$0xff]  ;;  %v888_v8 = vld [vmem:[%s1923_s7 + $0x10] sm:$0xff]  ;;  %v889_v9 = vld [vmem:[%s1923_s7 + $0x18] sm:$0xff] }
  0x14   : > { %1375 = vmatpush3.bf16.msra.mxu0 %v1374_v18  ;;  %1409 = vmatprep.subr.bf16.mxu1 %v1511_v3  ;;  %v1473_v7 = vpack.c.bf16 %v887_v5, %v886_v4  ;;  %v1476_v10 = vpack.c.bf16 %v889_v9, %v888_v8  ;;  %v890_v11 = vld [vmem:[%s1923_s7 + $0x20] sm:$0xff]  ;;  %v891_v12 = vld [vmem:[%s1923_s7 + $0x28] sm:$0xff]  ;;  %v892_v14 = vld [vmem:[%s1923_s7 + $0x30] sm:$0xff] }
  0x15   : > { %1376 = vmatprep.subr.bf16.mxu0 %v1511_v3  ;;  %v1479_v13 = vpack.c.bf16 %v891_v12, %v890_v11  ;;  %v893_v15 = vld [vmem:[%s1923_s7 + $0x38] sm:$0xff]  ;;  %v1053_v17 = vld [vmem:[%s1918_s2] ss:$0 sm:$0xff]  ;;  %v606_v23 = vld [vmem:[%s1920_s4 + $0x8] sm:$0xff] }
  0x16   : > { %v1482_v16 = vpack.c.bf16 %v893_v15, %v892_v14  ;;  %v1054_v19 = vld [vmem:[%s1919_s3] ss:$0 sm:$0xff]  ;;  %v607_v27 = vld [vmem:[%s1920_s4 + $0x10] sm:$0xff]  ;;  %v608_v28 = vld [vmem:[%s1920_s4 + $0x18] sm:$0xff] }
  0x17   : > { %1200 = vmatmul.mubr.msk.f32.vlgmr.msra.gmra.mrb[0].mxu0 %vm351_vm1, %v1638_v24  ;;  %1411 = vmatpush3.bf16.msra.mxu1 %v1410_v34  ;;  %v605_v22 = vld [vmem:[%s1920_s4] sm:$0xff]  ;;  %v1428_v29 = vpack.c.bf16 %v608_v28, %v607_v27  ;;  %v611_v33 = vld [vmem:[%s1920_s4 + $0x30] sm:$0xff]  ;;  %v612_v34 = vld [vmem:[%s1920_s4 + $0x38] sm:$0xff] }
  0x18   : > { %1378 = vmatpush3.bf16.msra.mxu0 %v1377_v25  ;;  %1218 = vmatprep.mubr.msk.f32.mxu0 %vm1512_vm0, %v1513_v6  ;;  %v1425_v25 = vpack.c.bf16 %v606_v23, %v605_v22  ;;  %v609_v30 = vld [vmem:[%s1920_s4 + $0x20] sm:$0xff]  ;;  %v1434_v35 = vpack.c.bf16 %v612_v34, %v611_v33  ;;  %v615_v39 = vld [vmem:[%s1920_s4 + $0x50] sm:$0xff]  ;;  %v618_v43 = vld [vmem:[%s1920_s4 + $0x68] sm:$0xff] }
  0x19   : > { %1379 = vmatprep.subr.bf16.mxu0 %v1511_v3  ;;  %1412 = vmatprep.subr.bf16.mxu1 %v1511_v3  ;;  %v613_v36 = vld [vmem:[%s1920_s4 + $0x40] sm:$0xff]  ;;  %v619_v45 = vld [vmem:[%s1920_s4 + $0x70] sm:$0xff]  ;;  %v620_v46 = vld [vmem:[%s1920_s4 + $0x78] sm:$0xff] }
  0x1a   : > { %v617_v42 = vld [vmem:[%s1920_s4 + $0x60] sm:$0xff]  ;;  %v1074_v49 = vld [vmem:[%s1920_s4 + $0x108] sm:$0xff]  ;;  %vm1071_vm4 = vmneg %vm332_vm2 }
  0x1b   : > { %1414 = vmatpush3.bf16.msra.mxu1 %v1413_v40  ;;  %v616_v40 = vld [vmem:[%s1920_s4 + $0x58] sm:$0xff]  ;;  %v1073_v48 = vld [vmem:[%s1920_s4 + $0x100] sm:$0xff]  ;;  %v1075_v52 = vld [vmem:[%s1920_s4 + $0x110] sm:$0xff] }
  0x1c   : > { %1381 = vmatpush3.bf16.msra.mxu0 %v1380_v31  ;;  %1415 = vmatprep.subr.bf16.mxu1 %v1511_v3  ;;  %v610_v31 = vld [vmem:[%s1920_s4 + $0x28] sm:$0xff]  ;;  %v1440_v41 = vpack.c.bf16 %v616_v40, %v615_v39  ;;  %v1076_v53 = vld [vmem:[%s1920_s4 + $0x118] sm:$0xff]  ;;  %v1081_v60 = vld [vmem:[%s1920_s4 + $0x140] sm:$0xff] }
  0x1d   : > { %1382 = vmatprep.subr.bf16.mxu0 %v1511_v3  ;;  %v1431_v32 = vpack.c.bf16 %v610_v31, %v609_v30  ;;  %v1078_v56 = vld [vmem:[%s1920_s4 + $0x128] sm:$0xff]  ;;  %v1084_v0 = vld [vmem:[%s1920_s4 + $0x158] sm:$0xff]  ;;  %v1091_v15 = vld [vmem:[%s1922_s6] ss:$0 sm:$0xff] }
  0x1e   : > { %v1082_v61 = vld [vmem:[%s1920_s4 + $0x148] sm:$0xff]  ;;  %v1088_v8 = vld [vmem:[%s1920_s4 + $0x178] sm:$0xff] }
  0x1f   : > { %1417 = vmatpush3.bf16.msra.mxu1 %v1416_v47  ;;  %v1446_v47 = vpack.c.bf16 %v620_v46, %v619_v45  ;;  %v1086_v4 = vld [vmem:[%s1920_s4 + $0x168] sm:$0xff] }
  0x20   : > { %1384 = vmatpush3.bf16.msra.mxu0 %v1383_v37  ;;  %1418 = vmatprep.subr.bf16.mxu1 %v1511_v3  ;;  %v614_v37 = vld [vmem:[%s1920_s4 + $0x48] sm:$0xff] }
  0x21   : > { %1385 = vmatprep.subr.bf16.mxu0 %v1511_v3  ;;  %v1437_v38 = vpack.c.bf16 %v614_v37, %v613_v36 }
  0x23   : > { %1420 = vmatpush3.bf16.msra.mxu1 %v1419_v54  ;;  %v1452_v54 = vpack.c.bf16 %v1076_v53, %v1075_v52 }
  0x24   : > { %1387 = vmatpush3.bf16.msra.mxu0 %v1386_v44  ;;  %1421 = vmatprep.subr.bf16.mxu1 %v1511_v3  ;;  %v1443_v44 = vpack.c.bf16 %v618_v43, %v617_v42 }
  0x25   : > { %1388 = vmatprep.subr.bf16.mxu0 %v1511_v3 }
  0x27   : > { %1219 = vmatmul.mubr.msk.f32.vlgmr.msra.gmra.mrb[0].mxu0 %vm351_vm1, %v333_v50  ;;  %1423 = vmatpush3.bf16.msra.mxu1 %v1422_v2  ;;  %v1449_v50 = vpack.c.bf16 %v1074_v49, %v1073_v48  ;;  %v1085_v2 = vld [vmem:[%s1920_s4 + $0x160] sm:$0xff] }
  0x28   : > { %1390 = vmatpush3.bf16.msra.mxu0 %v1389_v51  ;;  %1237 = vmatprep.mubr.msk.f32.mxu0 %vm1512_vm0, %v1513_v6  ;;  %v1467_v5 = vpack.c.bf16 %v1086_v4, %v1085_v2 }
  0x29   : > { %1391 = vmatprep.subr.bf16.mxu0 %v1511_v3  ;;  %1424 = vmatprep.subr.bf16.mxu1 %v1511_v3 }
  0x2c   : > { %1393 = vmatpush3.bf16.msra.mxu0 %v1392_v55  ;;  %v1077_v55 = vld [vmem:[%s1920_s4 + $0x120] sm:$0xff] }
  0x2d   : > { %1394 = vmatprep.subr.bf16.mxu0 %v1511_v3  ;;  %v1455_v57 = vpack.c.bf16 %v1078_v56, %v1077_v55 }
  0x30   : > { %1396 = vmatpush3.bf16.msra.mxu0 %v1395_v58  ;;  %v1079_v58 = vld [vmem:[%s1920_s4 + $0x130] sm:$0xff] }
  0x31   : > { %1397 = vmatprep.subr.bf16.mxu0 %v1511_v3 }
  0x34   : > { %1399 = vmatpush3.bf16.msra.mxu0 %v1398_v62  ;;  %v1461_v62 = vpack.c.bf16 %v1082_v61, %v1081_v60 }
  0x35   : > { %1472 = vmatprep.subr.bf16.mxu0 %v1511_v3 }
  0x37   : > { %1238 = vmatmul.mubr.msk.f32.vlgmr.msra.gmra.mrb[0].mxu0 %vm351_vm1, %v500_v63  ;;  %v1083_v63 = vld [vmem:[%s1920_s4 + $0x150] sm:$0xff] }
  0x38   : > { %1361 = vmatprep.mubr.msk.f32.mxu0 %vm1512_vm0, %v1513_v6  ;;  %1474 = vmatpush3.bf16.msra.mxu0 %v1473_v7  ;;  %v1464_v1 = vpack.c.bf16 %v1084_v0, %v1083_v63  ;;  %v1087_v7 = vld [vmem:[%s1920_s4 + $0x170] sm:$0xff] }
  0x39   : > { %1475 = vmatprep.subr.bf16.mxu0 %v1511_v3  ;;  %v1470_v9 = vpack.c.bf16 %v1088_v8, %v1087_v7 }
  0x3c   : > { %1477 = vmatpush3.bf16.msra.mxu0 %v1476_v10 }
  0x3d   : > { %1478 = vmatprep.subr.bf16.mxu0 %v1511_v3 }
  0x40   : > { %1480 = vmatpush3.bf16.msra.mxu0 %v1479_v13  ;;  %v1090_v13 = vld [vmem:[%s1921_s5] ss:$0 sm:$0xff] }
  0x41   : > { %1481 = vmatprep.subr.bf16.mxu0 %v1511_v3 }
  0x44   : > { %1483 = vmatpush3.bf16.msra.mxu0 %v1482_v16 }
  0x47   : > { %1362 = vmatmul.mubr.msk.f32.vlgmr.msra.gmra.mrb[2].mxu0 %vm351_vm1, %v1638_v24 }
 0x10a   : > { %v579_v18 = vpop.f32.mrb[0].mxu0 }
 0x10b   : > { %v591_v20 = vmul.f32 %v1053_v17, %v579_v18  ;;  %v1239_v21 = vpop.f32.mrb[1].mxu0 }
 0x10d   : > { %v599_v24 = vadd.f32 %v1054_v19, %v591_v20  ;;  %v1093_v19 = vld [vmem:[%s1924_s8] ss:$0 sm:$0xff] }
 0x10f   : > { %v1783_v26 = vmax.f32 %v599_v24, 0.0 }
 0x111   : > { %1273 = vmatmul.mubr.f32.vlgmr.msra.gmra.mrb[0].mxu1 %v1783_v26  ;;  %v602_v51 = vrot.slane %v1783_v26, 7  ;;  %v778_v10 = vrot.slane %v1783_v26, 1 }
 0x112   : > { %1426 = vmatpush3.bf16.msra.mxu1 %v1425_v25  ;;  %1307 = vmatprep.mubr.msk.f32.mxu1 %vm1512_vm0, %v1513_v6 }
 0x113   : > { %1427 = vmatprep.subr.bf16.mxu1 %v1511_v3 }
 0x116   : > { %1429 = vmatpush3.bf16.msra.mxu1 %v1428_v29 }
 0x117   : > { %1430 = vmatprep.subr.bf16.mxu1 %v1511_v3 }
 0x11a   : > { %1432 = vmatpush3.bf16.msra.mxu1 %v1431_v32  ;;  %v960_v11 = vpop.f32.mrb[2].mxu0 }
 0x11b   : > { %1433 = vmatprep.subr.bf16.mxu1 %v1511_v3  ;;  %v1363_v12 = vpop.f32.mrb[3].mxu0 }
 0x11e   : > { %1435 = vmatpush3.bf16.msra.mxu1 %v1434_v35 }
 0x11f   : > { %1436 = vmatprep.subr.bf16.mxu1 %v1511_v3 }
 0x122   : > { %1438 = vmatpush3.bf16.msra.mxu1 %v1437_v38 }
 0x123   : > { %1439 = vmatprep.subr.bf16.mxu1 %v1511_v3 }
 0x126   : > { %1441 = vmatpush3.bf16.msra.mxu1 %v1440_v41 }
 0x127   : > { %1442 = vmatprep.subr.bf16.mxu1 %v1511_v3 }
 0x12a   : > { %1444 = vmatpush3.bf16.msra.mxu1 %v1443_v44 }
 0x12b   : > { %1445 = vmatprep.subr.bf16.mxu1 %v1511_v3 }
 0x12e   : > { %1447 = vmatpush3.bf16.msra.mxu1 %v1446_v47 }
 0x12f   : > { %1448 = vmatprep.subr.bf16.mxu1 %v1511_v3 }
 0x131   : > { %1308 = vmatmul.mubr.msk.f32.vlgmr.msra.gmra.mrb[0].mxu1 %vm1071_vm4, %v602_v51 }
 0x132   : > { %1450 = vmatpush3.bf16.msra.mxu1 %v1449_v50  ;;  %1342 = vmatprep.mubr.msk.f32.mxu1 %vm1512_vm0, %v1513_v6  ;;  %v1080_v6 = vld [vmem:[%s1920_s4 + $0x138] sm:$0xff] }
 0x133   : > { %1451 = vmatprep.subr.bf16.mxu1 %v1511_v3  ;;  %v1458_v59 = vpack.c.bf16 %v1080_v6, %v1079_v58 }
 0x136   : > { %1453 = vmatpush3.bf16.msra.mxu1 %v1452_v54 }
 0x137   : > { %1454 = vmatprep.subr.bf16.mxu1 %v1511_v3 }
 0x13a   : > { %1456 = vmatpush3.bf16.msra.mxu1 %v1455_v57 }
 0x13b   : > { %1457 = vmatprep.subr.bf16.mxu1 %v1511_v3 }
 0x13e   : > { %1459 = vmatpush3.bf16.msra.mxu1 %v1458_v59 }
 0x13f   : > { %1460 = vmatprep.subr.bf16.mxu1 %v1511_v3 }
 0x142   : > { %1462 = vmatpush3.bf16.msra.mxu1 %v1461_v62 }
 0x143   : > { %1463 = vmatprep.subr.bf16.mxu1 %v1511_v3 }
 0x146   : > { %1465 = vmatpush3.bf16.msra.mxu1 %v1464_v1 }
 0x147   : > { %1466 = vmatprep.subr.bf16.mxu1 %v1511_v3 }
 0x14a   : > { %1468 = vmatpush3.bf16.msra.mxu1 %v1467_v5 }
 0x14b   : > { %1469 = vmatprep.subr.bf16.mxu1 %v1511_v3 }
 0x14e   : > { %1471 = vmatpush3.bf16.msra.mxu1 %v1470_v9 }
 0x151   : > { %1343 = vmatmul.mubr.msk.f32.vlgmr.msra.gmra.mrb[0].mxu1 %vm499_vm3, %v778_v10 }
 0x224   : > { %v864_v14 = vpop.f32.mrb[0].mxu1 }
 0x225   : > { %v876_v16 = vmul.f32 %v1090_v13, %v864_v14  ;;  %v1344_v17 = vpop.f32.mrb[1].mxu1 }
 0x227   : > { %v884_v18 = vadd.f32 %v1091_v15, %v876_v16 }
 0x229   : > { %v885_v3 = vmax.f32 %v884_v18, 0.0 }
 0x22b   : > { %v964_v20 = vadd.f32 %v960_v11, %v885_v3 }
 0x22d   : > { %v972_v21 = vadd.f32 %v1093_v19, %v964_v20 }
 0x22f   : > { %973 = vst [vmem:[%s327_s24] sm:$0xff] %v972_v21 }
 0x230 PF: > { %s19_s30 = sadd.s32 1, %s1509_s30  }
 0x231   : > { %p16_p4 = scmp.ge.s32.totalorder %s19_s30, 4  }
 0x233   :  { %18 = sbr.rel (!%p16_p4) target bundleno = 1 (0x1), region = 90 }

// kernel: encoder_forward.7
= control target key start
LH: loop header
LB: loop body
LE: loop exit
PB: predicated region body
PF: predicated region fallthrough
CT: control target
= control target key end

     0   :  { %s1897_s13 = smov 0   ;;  %s2374_s0 = inlined_call_operand.vmem [shape: f32[2,8,128], index: 0, kind: input, shape index: {}]   ;;  %s2375_s1 = inlined_call_operand.vmem [shape: f32[3,128,128], index: 1, kind: input, shape index: {}]   ;;  %s2376_s2 = inlined_call_operand.vmem [shape: f32[1,128], index: 2, kind: input, shape index: {}]   ;;  %s2377_s3 = inlined_call_operand.vmem [shape: f32[1,128], index: 3, kind: input, shape index: {}]   ;;  %s2378_s4 = inlined_call_operand.vmem [shape: f32[3,128,128], index: 4, kind: input, shape index: {}]   ;;  %s2379_s5 = inlined_call_operand.vmem [shape: f32[1,128], index: 5, kind: input, shape index: {}]   ;;  %s2380_s6 = inlined_call_operand.vmem [shape: f32[1,128], index: 6, kind: input, shape index: {}]   ;;  %s2381_s7 = inlined_call_operand.vmem [shape: f32[4,8], index: 7, kind: input, shape index: {}]   ;;  %s2382_s8 = inlined_call_operand.vmem [shape: f32[128,64], index: 8, kind: input, shape index: {}]   ;;  %s2383_s9 = inlined_call_operand.vmem [shape: f32[2,8,128], index: 9, kind: output, shape index: {0}]   ;;  %s2384_s10 = inlined_call_operand.vmem [shape: f32[2,4,64], index: 10, kind: output, shape index: {1}]  }
   0x1 LB: > { %s1188_s14 = sadd.s32 4294967295, %s1837_s13   ;;  %p1192_p0 = scmp.ge.s32.totalorder %s1837_s13, 1  ;;  %s1837_s13 = sphi %s1897_s13, %s21_s13  }
   0x2   : > { %p314_p1 = scmp.lt.s32.totalorder %s1837_s13, 3 }
   0x4   : > { %p315_p2 = pnand %p1192_p0, %p314_p1 }
   0x5   : > { %v1196_v0 = vld [vmem:[%s2375_s1 + $0x80] sm:$0xff] (!%p315_p2)  ;;  %v1197_v1 = vld [vmem:[%s2375_s1 + $0x88] sm:$0xff] (!%p315_p2)  ;;  %v1198_v2 = vld [vmem:[%s2375_s1 + $0x90] sm:$0xff] (!%p315_p2)  ;;  %v1839_v3 = vmov (!%p315_p2), 0.0|0.0   ;;  %vm1840_vm0 = vmmov (!%p315_p2), 0   ;;  %v1841_v6 = vmov (!%p315_p2), 0.0  }
   0x6   : > { %318 = sbr.rel (%p315_p2) target bundleno = 1031 (0x407), region = 56  ;;  %1644 = vmatprep.subr.bf16.mxu0 (!%p315_p2), %v1839_v3  ;;  %v1645_v4 = vpack.c.bf16 (!%p315_p2), %v1197_v1, %v1196_v0  ;;  %v1199_v5 = vld [vmem:[%s2375_s1 + $0x98] sm:$0xff] (!%p315_p2)  ;;  %1426 = vmatprep.mubr.msk.f32.mxu0 (!%p315_p2), %vm1840_vm0, %v1841_v6  ;;  %v1200_v8 = vld [vmem:[%s2375_s1 + $0xa0] sm:$0xff] (!%p315_p2)  ;;  %v1201_v9 = vld [vmem:[%s2375_s1 + $0xa8] sm:$0xff] (!%p315_p2)  ;;  %p354_p3 = scmp.lt.s32.totalorder (!%p315_p2), %s1188_s14, 1  ;;  %vm370_vm1 = vcmask (!%p315_p2), 1040384  }
   0x7   : > { %1716 = vmatprep.subr.bf16.mxu1 (!%p315_p2), %v1839_v3  ;;  %1531 = vmatprep.mubr.msk.f32.mxu1 (!%p315_p2), %vm1840_vm0, %v1841_v6  ;;  %v1648_v7 = vpack.c.bf16 (!%p315_p2), %v1199_v5, %v1198_v2  ;;  %v1651_v10 = vpack.c.bf16 (!%p315_p2), %v1201_v9, %v1200_v8  ;;  %v1202_v11 = vld [vmem:[%s2375_s1 + $0xb0] sm:$0xff] (!%p315_p2)  ;;  %v1203_v12 = vld [vmem:[%s2375_s1 + $0xb8] sm:$0xff] (!%p315_p2)  ;;  %v1204_v14 = vld [vmem:[%s2375_s1 + $0xc0] sm:$0xff] (!%p315_p2)  ;;  %vm547_vm3 = vcmask (!%p315_p2), 1046528   ;;  %vm1028_vm4 = vcmask (!%p315_p2), 64512  }
   0x8   : > { %1646 = vmatpush3.bf16.msra.mxu0 (!%p315_p2), %v1645_v4  ;;  %v1654_v13 = vpack.c.bf16 (!%p315_p2), %v1203_v12, %v1202_v11  ;;  %v1205_v15 = vld [vmem:[%s2375_s1 + $0xc8] sm:$0xff] (!%p315_p2)  ;;  %v1206_v17 = vld [vmem:[%s2375_s1 + $0xd0] sm:$0xff] (!%p315_p2)  ;;  %v1207_v18 = vld [vmem:[%s2375_s1 + $0xd8] sm:$0xff] (!%p315_p2)  ;;  %vm1102_vm5 = vcmask (!%p315_p2), 519168  }
   0x9   : > { %1647 = vmatprep.subr.bf16.mxu0 (!%p315_p2), %v1839_v3  ;;  %v1657_v16 = vpack.c.bf16 (!%p315_p2), %v1205_v15, %v1204_v14  ;;  %v1233_v19 = vld [vmem:[%s2378_s4 + $0x80] sm:$0xff] (!%p315_p2)  ;;  %v1234_v20 = vld [vmem:[%s2378_s4 + $0x88] sm:$0xff] (!%p315_p2)  ;;  %v1235_v21 = vld [vmem:[%s2378_s4 + $0x90] sm:$0xff] (!%p315_p2)  ;;  %v1660_v24 = vpack.c.bf16 (!%p315_p2), %v1207_v18, %v1206_v17 }
   0xa   : > { %v1236_v22 = vld [vmem:[%s2378_s4 + $0x98] sm:$0xff] (!%p315_p2)  ;;  %v1717_v23 = vpack.c.bf16 (!%p315_p2), %v1234_v20, %v1233_v19  ;;  %v1208_v25 = vld [vmem:[%s2375_s1 + $0xe0] sm:$0xff] (!%p315_p2)  ;;  %v1209_v26 = vld [vmem:[%s2375_s1 + $0xe8] sm:$0xff] (!%p315_p2) }
   0xb   : > { %v1720_v27 = vpack.c.bf16 (!%p315_p2), %v1236_v22, %v1235_v21  ;;  %v1237_v28 = vld [vmem:[%s2378_s4 + $0xa0] sm:$0xff] (!%p315_p2)  ;;  %v1238_v29 = vld [vmem:[%s2378_s4 + $0xa8] sm:$0xff] (!%p315_p2)  ;;  %v1663_v30 = vpack.c.bf16 (!%p315_p2), %v1209_v26, %v1208_v25  ;;  %v1210_v31 = vld [vmem:[%s2375_s1 + $0xf0] sm:$0xff] (!%p315_p2) }
   0xc   : > { %1649 = vmatpush3.bf16.msra.mxu0 (!%p315_p2), %v1648_v7  ;;  %1718 = vmatpush3.bf16.msra.mxu1 (!%p315_p2), %v1717_v23  ;;  %v1211_v32 = vld [vmem:[%s2375_s1 + $0xf8] sm:$0xff] (!%p315_p2)  ;;  %v1723_v33 = vpack.c.bf16 (!%p315_p2), %v1238_v29, %v1237_v28  ;;  %v1239_v34 = vld [vmem:[%s2378_s4 + $0xb0] sm:$0xff] (!%p315_p2)  ;;  %v372_v37 = vld [vmem:[%s2375_s1] sm:$0xff] (!%p315_p2) }
   0xd   : > { %1650 = vmatprep.subr.bf16.mxu0 %v1839_v3  ;;  %s2388_s14 = smov (!%p354_p3, %s1188_s14), 1  ;;  %1719 = vmatprep.subr.bf16.mxu1 %v1839_v3  ;;  %v1240_v35 = vld [vmem:[%s2378_s4 + $0xb8] sm:$0xff]  ;;  %v1666_v36 = vpack.c.bf16 %v1211_v32, %v1210_v31  ;;  %v373_v38 = vld [vmem:[%s2375_s1 + $0x8] sm:$0xff]  ;;  %v1241_v40 = vld [vmem:[%s2378_s4 + $0xc0] sm:$0xff] }
   0xe   : > { %s1193_s23 = sshll.u32 %s2388_s14, 3  ;;  %v1726_v39 = vpack.c.bf16 %v1240_v35, %v1239_v34  ;;  %v1242_v41 = vld [vmem:[%s2378_s4 + $0xc8] sm:$0xff]  ;;  %v1669_v43 = vpack.c.bf16 %v373_v38, %v372_v37  ;;  %v374_v44 = vld [vmem:[%s2375_s1 + $0x10] sm:$0xff]  ;;  %v375_v45 = vld [vmem:[%s2375_s1 + $0x18] sm:$0xff]  ;;  %s1195_s15 = sshll.u32 %s2388_s14, 2 }
   0xf   : > { %s357_s30 = scalar_lea.vmem %s2374_s0, %s1193_s23  ;;  %v1729_v46 = vpack.c.bf16 %v1242_v41, %v1241_v40  ;;  %v1243_v47 = vld [vmem:[%s2378_s4 + $0xd0] sm:$0xff]  ;;  %v1244_v48 = vld [vmem:[%s2378_s4 + $0xd8] sm:$0xff]  ;;  %v1672_v49 = vpack.c.bf16 %v375_v45, %v374_v44  ;;  %v376_v50 = vld [vmem:[%s2375_s1 + $0x20] sm:$0xff]  ;;  %s365_s18 = scalar_lea.vmem %s2384_s10, %s1195_s15 }
  0x10   : > { %1652 = vmatpush3.bf16.msra.mxu0 %v1651_v10  ;;  %1721 = vmatpush3.bf16.msra.mxu1 %v1720_v27  ;;  %v2017_v42 = vld [vmem:[%s357_s30] sm:$0xff]  ;;  %v377_v51 = vld [vmem:[%s2375_s1 + $0x28] sm:$0xff]  ;;  %v1732_v52 = vpack.c.bf16 %v1244_v48, %v1243_v47  ;;  %v378_v56 = vld [vmem:[%s2375_s1 + $0x30] sm:$0xff]  ;;  %s361_s30 = scalar_lea.vmem %s2383_s9, %s1193_s23 }
  0x11   : > { %1653 = vmatprep.subr.bf16.mxu0 %v1839_v3  ;;  %1722 = vmatprep.subr.bf16.mxu1 %v1839_v3  ;;  %v1245_v53 = vld [vmem:[%s2378_s4 + $0xe0] sm:$0xff]  ;;  %v1246_v54 = vld [vmem:[%s2378_s4 + $0xe8] sm:$0xff]  ;;  %v1675_v55 = vpack.c.bf16 %v377_v51, %v376_v50  ;;  %v379_v57 = vld [vmem:[%s2375_s1 + $0x38] sm:$0xff]  ;;  %v368_v12 = vrot.slane %v2017_v42, 7 }
  0x12   : > { %v1735_v58 = vpack.c.bf16 %v1246_v54, %v1245_v53  ;;  %v1678_v59 = vpack.c.bf16 %v379_v57, %v378_v56  ;;  %v380_v60 = vld [vmem:[%s2375_s1 + $0x40] sm:$0xff]  ;;  %v381_v61 = vld [vmem:[%s2375_s1 + $0x48] sm:$0xff]  ;;  %v382_v63 = vld [vmem:[%s2375_s1 + $0x50] sm:$0xff] }
  0x13   : > { %v1681_v62 = vpack.c.bf16 %v381_v61, %v380_v60  ;;  %v383_v0 = vld [vmem:[%s2375_s1 + $0x58] sm:$0xff]  ;;  %v384_v2 = vld [vmem:[%s2375_s1 + $0x60] sm:$0xff]  ;;  %v385_v4 = vld [vmem:[%s2375_s1 + $0x68] sm:$0xff] }
  0x14   : > { %1655 = vmatpush3.bf16.msra.mxu0 %v1654_v13  ;;  %1724 = vmatpush3.bf16.msra.mxu1 %v1723_v33  ;;  %v1684_v1 = vpack.c.bf16 %v383_v0, %v382_v63  ;;  %v1687_v5 = vpack.c.bf16 %v385_v4, %v384_v2  ;;  %v386_v7 = vld [vmem:[%s2375_s1 + $0x70] sm:$0xff]  ;;  %v387_v8 = vld [vmem:[%s2375_s1 + $0x78] sm:$0xff]  ;;  %v1214_v10 = vld [vmem:[%s2375_s1 + $0x100] sm:$0xff] }
  0x15   : > { %1656 = vmatprep.subr.bf16.mxu0 %v1839_v3  ;;  %1725 = vmatprep.subr.bf16.mxu1 %v1839_v3  ;;  %v1690_v9 = vpack.c.bf16 %v387_v8, %v386_v7  ;;  %v1215_v11 = vld [vmem:[%s2375_s1 + $0x108] sm:$0xff]  ;;  %vm2095_vm2 = vmneg %vm370_vm1  ;;  %v1216_v15 = vld [vmem:[%s2375_s1 + $0x110] sm:$0xff] }
  0x16   : > { %v1693_v14 = vpack.c.bf16 %v1215_v11, %v1214_v10  ;;  %v1218_v18 = vld [vmem:[%s2375_s1 + $0x120] sm:$0xff]  ;;  %v1219_v19 = vld [vmem:[%s2375_s1 + $0x128] sm:$0xff]  ;;  %v1220_v21 = vld [vmem:[%s2375_s1 + $0x130] sm:$0xff] }
  0x17   : > { %v1699_v20 = vpack.c.bf16 %v1219_v19, %v1218_v18  ;;  %v1221_v22 = vld [vmem:[%s2375_s1 + $0x138] sm:$0xff]  ;;  %v1223_v25 = vld [vmem:[%s2375_s1 + $0x148] sm:$0xff]  ;;  %v1224_v27 = vld [vmem:[%s2375_s1 + $0x150] sm:$0xff] }
  0x18   : > { %1658 = vmatpush3.bf16.msra.mxu0 %v1657_v16  ;;  %1727 = vmatpush3.bf16.msra.mxu1 %v1726_v39  ;;  %v1217_v16 = vld [vmem:[%s2375_s1 + $0x118] sm:$0xff]  ;;  %v1702_v23 = vpack.c.bf16 %v1221_v22, %v1220_v21  ;;  %v1227_v31 = vld [vmem:[%s2375_s1 + $0x168] sm:$0xff]  ;;  %v1228_v33 = vld [vmem:[%s2375_s1 + $0x170] sm:$0xff] }
  0x19   : > { %1659 = vmatprep.subr.bf16.mxu0 %v1839_v3  ;;  %1728 = vmatprep.subr.bf16.mxu1 %v1839_v3  ;;  %v1696_v17 = vpack.c.bf16 %v1217_v16, %v1216_v15  ;;  %v1225_v28 = vld [vmem:[%s2375_s1 + $0x158] sm:$0xff]  ;;  %v1247_v37 = vld [vmem:[%s2378_s4 + $0xf0] sm:$0xff]  ;;  %v941_v40 = vld [vmem:[%s2382_s8] sm:$0xff] }
  0x1a   : > { %v1708_v29 = vpack.c.bf16 %v1225_v28, %v1224_v27  ;;  %v1229_v34 = vld [vmem:[%s2375_s1 + $0x178] sm:$0xff]  ;;  %v942_v41 = vld [vmem:[%s2382_s8 + $0x8] sm:$0xff]  ;;  %v945_v47 = vld [vmem:[%s2382_s8 + $0x20] sm:$0xff] }
  0x1b   : > { %v1714_v35 = vpack.c.bf16 %v1229_v34, %v1228_v33  ;;  %v1248_v38 = vld [vmem:[%s2378_s4 + $0xf8] sm:$0xff]  ;;  %v1789_v44 = vpack.c.bf16 %v942_v41, %v941_v40  ;;  %v946_v48 = vld [vmem:[%s2382_s8 + $0x28] sm:$0xff]  ;;  %v947_v50 = vld [vmem:[%s2382_s8 + $0x30] sm:$0xff] }
  0x1c   : > { %1661 = vmatpush3.bf16.msra.mxu0 %v1660_v24  ;;  %1730 = vmatpush3.bf16.msra.mxu1 %v1729_v46  ;;  %v1222_v24 = vld [vmem:[%s2375_s1 + $0x140] sm:$0xff]  ;;  %v1738_v39 = vpack.c.bf16 %v1248_v38, %v1247_v37  ;;  %v944_v45 = vld [vmem:[%s2382_s8 + $0x18] sm:$0xff]  ;;  %v950_v54 = vld [vmem:[%s2382_s8 + $0x48] sm:$0xff] }
  0x1d   : > { %1662 = vmatprep.subr.bf16.mxu0 %v1839_v3  ;;  %1731 = vmatprep.subr.bf16.mxu1 %v1839_v3  ;;  %v1705_v26 = vpack.c.bf16 %v1223_v25, %v1222_v24  ;;  %v948_v51 = vld [vmem:[%s2382_s8 + $0x38] sm:$0xff]  ;;  %v949_v53 = vld [vmem:[%s2382_s8 + $0x40] sm:$0xff]  ;;  %v951_v56 = vld [vmem:[%s2382_s8 + $0x50] sm:$0xff] }
  0x1e   : > { %v952_v57 = vld [vmem:[%s2382_s8 + $0x58] sm:$0xff]  ;;  %v1232_v61 = vld [vmem:[%s2377_s3] ss:$0 sm:$0xff]  ;;  %v660_v7 = vld [vmem:[%s2378_s4 + $0x10] sm:$0xff] }
  0x1f   : > { %v658_v0 = vld [vmem:[%s2378_s4] sm:$0xff]  ;;  %v661_v8 = vld [vmem:[%s2378_s4 + $0x18] sm:$0xff]  ;;  %v663_v11 = vld [vmem:[%s2378_s4 + $0x28] sm:$0xff] }
  0x20   : > { %1664 = vmatpush3.bf16.msra.mxu0 %v1663_v30  ;;  %1733 = vmatpush3.bf16.msra.mxu1 %v1732_v52  ;;  %v1226_v30 = vld [vmem:[%s2375_s1 + $0x160] sm:$0xff]  ;;  %v1798_v52 = vpack.c.bf16 %v948_v51, %v947_v50  ;;  %v665_v15 = vld [vmem:[%s2378_s4 + $0x38] sm:$0xff]  ;;  %v667_v18 = vld [vmem:[%s2378_s4 + $0x48] sm:$0xff] }
  0x21   : > { %1665 = vmatprep.subr.bf16.mxu0 %v1839_v3  ;;  %1734 = vmatprep.subr.bf16.mxu1 %v1839_v3  ;;  %v1711_v32 = vpack.c.bf16 %v1227_v31, %v1226_v30  ;;  %v662_v10 = vld [vmem:[%s2378_s4 + $0x20] sm:$0xff]  ;;  %v669_v21 = vld [vmem:[%s2378_s4 + $0x58] sm:$0xff]  ;;  %v671_v24 = vld [vmem:[%s2378_s4 + $0x68] sm:$0xff] }
  0x22   : > { %v673_v27 = vld [vmem:[%s2378_s4 + $0x78] sm:$0xff]  ;;  %v1252_v30 = vld [vmem:[%s2378_s4 + $0x108] sm:$0xff]  ;;  %v1253_v33 = vld [vmem:[%s2378_s4 + $0x110] sm:$0xff] }
  0x23   : > { %v1254_v34 = vld [vmem:[%s2378_s4 + $0x118] sm:$0xff]  ;;  %v1256_v37 = vld [vmem:[%s2378_s4 + $0x128] sm:$0xff]  ;;  %v1257_v13 = vld [vmem:[%s2378_s4 + $0x130] sm:$0xff] }
  0x24   : > { %1667 = vmatpush3.bf16.msra.mxu0 %v1666_v36  ;;  %1736 = vmatpush3.bf16.msra.mxu1 %v1735_v58  ;;  %v545_v36 = vrot.slane %v2017_v42, 1  ;;  %v1804_v58 = vpack.c.bf16 %v952_v57, %v951_v56  ;;  %v1259_v41 = vld [vmem:[%s2378_s4 + $0x140] sm:$0xff]  ;;  %v1265_v51 = vld [vmem:[%s2378_s4 + $0x170] sm:$0xff]  ;;  %v954_v56 = vld [vmem:[%s2382_s8 + $0x68] sm:$0xff] }
  0x25   : > { %1668 = vmatprep.subr.bf16.mxu0 %v1839_v3  ;;  %1737 = vmatprep.subr.bf16.mxu1 %v1839_v3 }
  0x27   : > { %1427 = vmatmul.mubr.f32.vlgmr.msra.gmra.mrb[0].mxu0 %v2017_v42 }
  0x28   : > { %1670 = vmatpush3.bf16.msra.mxu0 %v1669_v43  ;;  %1461 = vmatprep.mubr.msk.f32.mxu0 %vm1840_vm0, %v1841_v6  ;;  %v943_v43 = vld [vmem:[%s2382_s8 + $0x10] sm:$0xff] }
  0x29   : > { %1671 = vmatprep.subr.bf16.mxu0 %v1839_v3  ;;  %1739 = vmatpush3.bf16.msra.mxu1 %v1738_v39  ;;  %v1792_v46 = vpack.c.bf16 %v944_v45, %v943_v43  ;;  %v1258_v39 = vld [vmem:[%s2378_s4 + $0x138] sm:$0xff]  ;;  %v1260_v43 = vld [vmem:[%s2378_s4 + $0x148] sm:$0xff]  ;;  %v1261_v45 = vld [vmem:[%s2378_s4 + $0x150] sm:$0xff] }
  0x2a   : > { %1740 = vmatprep.subr.bf16.mxu1 %v1839_v3  ;;  %v1774_v40 = vpack.c.bf16 %v1258_v39, %v1257_v13 }
  0x2c   : > { %1673 = vmatpush3.bf16.msra.mxu0 %v1672_v49  ;;  %v1795_v49 = vpack.c.bf16 %v946_v48, %v945_v47  ;;  %v1263_v48 = vld [vmem:[%s2378_s4 + $0x160] sm:$0xff] }
  0x2d   : > { %1674 = vmatprep.subr.bf16.mxu0 %v1839_v3 }
  0x30   : > { %1676 = vmatpush3.bf16.msra.mxu0 %v1675_v55  ;;  %v1801_v55 = vpack.c.bf16 %v950_v54, %v949_v53 }
  0x31   : > { %1677 = vmatprep.subr.bf16.mxu0 %v1839_v3 }
  0x34   : > { %1679 = vmatpush3.bf16.msra.mxu0 %v1678_v59  ;;  %v1231_v59 = vld [vmem:[%s2376_s2] ss:$0 sm:$0xff] }
  0x35   : > { %1680 = vmatprep.subr.bf16.mxu0 %v1839_v3 }
  0x38   : > { %1682 = vmatpush3.bf16.msra.mxu0 %v1681_v62 }
  0x39   : > { %1683 = vmatprep.subr.bf16.mxu0 %v1839_v3 }
  0x3c   : > { %1685 = vmatpush3.bf16.msra.mxu0 %v1684_v1  ;;  %v659_v1 = vld [vmem:[%s2378_s4 + $0x8] sm:$0xff] }
  0x3d   : > { %1686 = vmatprep.subr.bf16.mxu0 %v1839_v3  ;;  %v1741_v4 = vpack.c.bf16 %v659_v1, %v658_v0 }
  0x40   : > { %1688 = vmatpush3.bf16.msra.mxu0 %v1687_v5 }
  0x41   : > { %1689 = vmatprep.subr.bf16.mxu0 %v1839_v3 }
  0x44   : > { %1691 = vmatpush3.bf16.msra.mxu0 %v1690_v9  ;;  %v1744_v9 = vpack.c.bf16 %v661_v8, %v660_v7 }
  0x45   : > { %1692 = vmatprep.subr.bf16.mxu0 %v1839_v3 }
  0x47   : > { %1462 = vmatmul.mubr.msk.f32.vlgmr.msra.gmra.mrb[0].mxu0 %vm2095_vm2, %v368_v12  ;;  %v1747_v12 = vpack.c.bf16 %v663_v11, %v662_v10 }
  0x48   : > { %1694 = vmatpush3.bf16.msra.mxu0 %v1693_v14  ;;  %1496 = vmatprep.mubr.msk.f32.mxu0 %vm1840_vm0, %v1841_v6  ;;  %v664_v14 = vld [vmem:[%s2378_s4 + $0x30] sm:$0xff] }
  0x49   : > { %1695 = vmatprep.subr.bf16.mxu0 %v1839_v3  ;;  %v1750_v16 = vpack.c.bf16 %v665_v15, %v664_v14 }
  0x4c   : > { %1697 = vmatpush3.bf16.msra.mxu0 %v1696_v17  ;;  %v666_v17 = vld [vmem:[%s2378_s4 + $0x40] sm:$0xff] }
  0x4d   : > { %1698 = vmatprep.subr.bf16.mxu0 %v1839_v3  ;;  %v1753_v19 = vpack.c.bf16 %v667_v18, %v666_v17 }
  0x50   : > { %1700 = vmatpush3.bf16.msra.mxu0 %v1699_v20  ;;  %v668_v20 = vld [vmem:[%s2378_s4 + $0x50] sm:$0xff] }
  0x51   : > { %1701 = vmatprep.subr.bf16.mxu0 %v1839_v3  ;;  %v1756_v22 = vpack.c.bf16 %v669_v21, %v668_v20 }
  0x54   : > { %1703 = vmatpush3.bf16.msra.mxu0 %v1702_v23  ;;  %v670_v23 = vld [vmem:[%s2378_s4 + $0x60] sm:$0xff] }
  0x55   : > { %1704 = vmatprep.subr.bf16.mxu0 %v1839_v3  ;;  %v1759_v25 = vpack.c.bf16 %v671_v24, %v670_v23 }
  0x58   : > { %1706 = vmatpush3.bf16.msra.mxu0 %v1705_v26  ;;  %v672_v26 = vld [vmem:[%s2378_s4 + $0x70] sm:$0xff] }
  0x59   : > { %1707 = vmatprep.subr.bf16.mxu0 %v1839_v3  ;;  %v1762_v28 = vpack.c.bf16 %v673_v27, %v672_v26 }
  0x5c   : > { %1709 = vmatpush3.bf16.msra.mxu0 %v1708_v29  ;;  %v1251_v29 = vld [vmem:[%s2378_s4 + $0x100] sm:$0xff] }
  0x5d   : > { %1710 = vmatprep.subr.bf16.mxu0 %v1839_v3  ;;  %v1765_v31 = vpack.c.bf16 %v1252_v30, %v1251_v29 }
  0x60   : > { %1712 = vmatpush3.bf16.msra.mxu0 %v1711_v32 }
  0x61   : > { %1713 = vmatprep.subr.bf16.mxu0 %v1839_v3 }
  0x64   : > { %1715 = vmatpush3.bf16.msra.mxu0 %v1714_v35  ;;  %v1768_v35 = vpack.c.bf16 %v1254_v34, %v1253_v33 }
  0x65   : > { %1788 = vmatprep.subr.bf16.mxu0 %v1839_v3 }
  0x67   : > { %1497 = vmatmul.mubr.msk.f32.vlgmr.msra.gmra.mrb[0].mxu0 %vm547_vm3, %v545_v36  ;;  %v1255_v36 = vld [vmem:[%s2378_s4 + $0x120] sm:$0xff] }
  0x68   : > { %1636 = vmatprep.mubr.msk.f32.mxu0 %vm1840_vm0, %v1841_v6  ;;  %1790 = vmatpush3.bf16.msra.mxu0 %v1789_v44  ;;  %v1771_v38 = vpack.c.bf16 %v1256_v37, %v1255_v36  ;;  %v1777_v44 = vpack.c.bf16 %v1260_v43, %v1259_v41 }
  0x69   : > { %1791 = vmatprep.subr.bf16.mxu0 %v1839_v3 }
  0x6c   : > { %1793 = vmatpush3.bf16.msra.mxu0 %v1792_v46  ;;  %v1262_v46 = vld [vmem:[%s2378_s4 + $0x158] sm:$0xff] }
  0x6d   : > { %1794 = vmatprep.subr.bf16.mxu0 %v1839_v3  ;;  %v1780_v47 = vpack.c.bf16 %v1262_v46, %v1261_v45 }
  0x70   : > { %1796 = vmatpush3.bf16.msra.mxu0 %v1795_v49  ;;  %v1264_v49 = vld [vmem:[%s2378_s4 + $0x168] sm:$0xff] }
  0x71   : > { %1797 = vmatprep.subr.bf16.mxu0 %v1839_v3  ;;  %v1783_v50 = vpack.c.bf16 %v1264_v49, %v1263_v48 }
  0x74   : > { %1799 = vmatpush3.bf16.msra.mxu0 %v1798_v52  ;;  %v1266_v52 = vld [vmem:[%s2378_s4 + $0x178] sm:$0xff] }
  0x75   : > { %1800 = vmatprep.subr.bf16.mxu0 %v1839_v3  ;;  %v1786_v53 = vpack.c.bf16 %v1266_v52, %v1265_v51 }
  0x78   : > { %1802 = vmatpush3.bf16.msra.mxu0 %v1801_v55  ;;  %v953_v55 = vld [vmem:[%s2382_s8 + $0x60] sm:$0xff] }
  0x79   : > { %1803 = vmatprep.subr.bf16.mxu0 %v1839_v3  ;;  %v1807_v57 = vpack.c.bf16 %v954_v56, %v953_v55 }
  0x7c   : > { %1805 = vmatpush3.bf16.msra.mxu0 %v1804_v58  ;;  %v955_v58 = vld [vmem:[%s2382_s8 + $0x70] sm:$0xff] }
  0x7d   : > { %1806 = vmatprep.subr.bf16.mxu0 %v1839_v3 }
  0x80   : > { %1808 = vmatpush3.bf16.msra.mxu0 %v1807_v57 }
  0x81   : > { %1809 = vmatprep.subr.bf16.mxu0 %v1839_v3 }
 0x13a   : > { %v632_v60 = vpop.f32.mrb[0].mxu0 }
 0x13b   : > { %v644_v62 = vmul.f32 %v1231_v59, %v632_v60  ;;  %v1498_v63 = vpop.f32.mrb[1].mxu0  ;;  %v1268_v60 = vld [vmem:[%s2379_s5] ss:$0 sm:$0xff] }
 0x13d   : > { %v652_v2 = vadd.f32 %v1232_v61, %v644_v62 }
 0x13f   : > { %v2219_v5 = vmax.f32 %v652_v2, 0.0 }
 0x141   : > { %1532 = vmatmul.mubr.f32.vlgmr.msra.gmra.mrb[0].mxu1 %v2219_v5  ;;  %v655_v32 = vrot.slane %v2219_v5, 7  ;;  %v831_v54 = vrot.slane %v2219_v5, 1 }
 0x142   : > { %1742 = vmatpush3.bf16.msra.mxu1 %v1741_v4  ;;  %1566 = vmatprep.mubr.msk.f32.mxu1 %vm1840_vm0, %v1841_v6  ;;  %v1027_v4 = vld [vmem:[%s2381_s7] sm:$0xf] }
 0x143   : > { %1743 = vmatprep.subr.bf16.mxu1 %v1839_v3 }
 0x146   : > { %1745 = vmatpush3.bf16.msra.mxu1 %v1744_v9 }
 0x147   : > { %1746 = vmatprep.subr.bf16.mxu1 %v1839_v3 }
 0x14a   : > { %1748 = vmatpush3.bf16.msra.mxu1 %v1747_v12 }
 0x14b   : > { %1749 = vmatprep.subr.bf16.mxu1 %v1839_v3 }
 0x14e   : > { %1751 = vmatpush3.bf16.msra.mxu1 %v1750_v16 }
 0x14f   : > { %1752 = vmatprep.subr.bf16.mxu1 %v1839_v3 }
 0x152   : > { %1754 = vmatpush3.bf16.msra.mxu1 %v1753_v19 }
 0x153   : > { %1755 = vmatprep.subr.bf16.mxu1 %v1839_v3 }
 0x156   : > { %1757 = vmatpush3.bf16.msra.mxu1 %v1756_v22 }
 0x157   : > { %1758 = vmatprep.subr.bf16.mxu1 %v1839_v3 }
 0x15a   : > { %1760 = vmatpush3.bf16.msra.mxu1 %v1759_v25 }
 0x15b   : > { %1761 = vmatprep.subr.bf16.mxu1 %v1839_v3 }
 0x15e   : > { %1763 = vmatpush3.bf16.msra.mxu1 %v1762_v28 }
 0x15f   : > { %1764 = vmatprep.subr.bf16.mxu1 %v1839_v3 }
 0x161   : > { %1567 = vmatmul.mubr.msk.f32.vlgmr.msra.gmra.mrb[0].mxu1 %vm2095_vm2, %v655_v32 }
 0x162   : > { %1766 = vmatpush3.bf16.msra.mxu1 %v1765_v31  ;;  %1601 = vmatprep.mubr.msk.f32.mxu1 %vm1840_vm0, %v1841_v6 }
 0x163   : > { %1767 = vmatprep.subr.bf16.mxu1 %v1839_v3 }
 0x166   : > { %1769 = vmatpush3.bf16.msra.mxu1 %v1768_v35 }
 0x167   : > { %1770 = vmatprep.subr.bf16.mxu1 %v1839_v3 }
 0x16a   : > { %1772 = vmatpush3.bf16.msra.mxu1 %v1771_v38 }
 0x16b   : > { %1773 = vmatprep.subr.bf16.mxu1 %v1839_v3 }
 0x16e   : > { %1775 = vmatpush3.bf16.msra.mxu1 %v1774_v40 }
 0x16f   : > { %1776 = vmatprep.subr.bf16.mxu1 %v1839_v3 }
 0x172   : > { %1778 = vmatpush3.bf16.msra.mxu1 %v1777_v44 }
 0x173   : > { %1779 = vmatprep.subr.bf16.mxu1 %v1839_v3 }
 0x176   : > { %1781 = vmatpush3.bf16.msra.mxu1 %v1780_v47 }
 0x177   : > { %1782 = vmatprep.subr.bf16.mxu1 %v1839_v3 }
 0x17a   : > { %1784 = vmatpush3.bf16.msra.mxu1 %v1783_v50 }
 0x17b   : > { %1785 = vmatprep.subr.bf16.mxu1 %v1839_v3  ;;  %v1269_v3 = vld [vmem:[%s2380_s6] ss:$0 sm:$0xff] }
 0x17e   : > { %1787 = vmatpush3.bf16.msra.mxu1 %v1786_v53 }
 0x17f   : > { %1639 = vmatprep.subr.mxu1 %v1841_v6 }
 0x181   : > { %1602 = vmatmul.mubr.msk.f32.vlgmr.msra.gmra.mrb[0].mxu1 %vm547_vm3, %v831_v54 }
 0x182   : > { %1641 = vmatprep.mubr.msk.f32.mxu1 %vm1840_vm0, %v1841_v6  ;;  %v956_v6 = vld [vmem:[%s2382_s8 + $0x78] sm:$0xff] }
 0x183   : > { %v1810_v59 = vpack.c.bf16 %v956_v6, %v955_v58 }
 0x185   : > { %1811 = vmatpush3.bf16.msra.mxu0 %v1810_v59 }
 0x254   : > { %v917_v61 = vpop.f32.mrb[0].mxu1 }
 0x255   : > { %v929_v62 = vmul.f32 %v1268_v60, %v917_v61  ;;  %v1603_v63 = vpop.f32.mrb[1].mxu1 }
 0x257   : > { %v937_v0 = vadd.f32 %v1269_v3, %v929_v62 }
 0x259   : > { %v938_v1 = vmax.f32 %v937_v0, 0.0 }
 0x25b   : > { %v939_v2 = vadd.f32 %v938_v1, %v2017_v42 }
 0x25d   : > { %940 = vst [vmem:[%s361_s30] sm:$0xff] %v939_v2  ;;  %1637 = vmatmul.mubr.f32.vlgmr.msra.gmra.mrb[2].mxu0 %v939_v2 }
 0x330   : > { %v1023_v5 = vpop.f32.mrb[2].mxu0 }
 0x331   : > { %v1638_v7 = vpop.f32.mrb[3].mxu0  ;;  %1640 = vmatpush3.msra.mxu1 %v1023_v5 }
 0x332   : > { %1642 = vmatmul.mubr.msk.f32.vlgmr.msra.gmra.mrb[2].mxu1 %vm1028_vm4, %v1027_v4 }
 0x405   : > { %v1098_v8 = vpop.f32.mrb[2].mxu1 }
 0x406   : > { %1103 = vst.msk [vmem:[%s365_s18] sm:$0xf] %vm1102_vm5, %v1098_v8  ;;  %v1643_v42 = vpop.f32.mrb[3].mxu1 }
 0x407 PF: > { %s21_s13 = sadd.s32 1, %s1837_s13  }
 0x408   : > { %p18_p4 = scmp.ge.s32.totalorder %s21_s13, 4  }
 0x40a   :  { %20 = sbr.rel (!%p18_p4) target bundleno = 1 (0x1), region = 102 }

</bundles_post_ra>
